<compile_context>
chip_gen: v7x
topology: tpu7x:2x2x1
jax: 0.10.0
libtpu: 0.0.40
codegen_flags: <defaults>
</compile_context>

<pallas_src>
import jax
import jax.numpy as jnp
from jax import lax
from jax.experimental import pallas as pl
from jax.experimental.pallas import tpu as pltpu

NEG_SLOPE = 0.01     # LeakyReLU slope (python float -> folded constant)
BIG = 1e30           # python float, NOT a jnp array (no captured traced const)


def _leaky(x):
    # 0 < slope < 1  =>  leaky_relu(x) == max(x, slope * x)   (one VPU max)
    return jnp.maximum(x, NEG_SLOPE * x)


def _fp_kernel(xyz1t_ref, xyz2_ref, pts1_ref, proj2_ref,
               wf1_ref, bf_ref,
               w1_ref, b1_ref, w2_ref, b2_ref,
               w3_ref, b3_ref, w4_ref, b4_ref,
               out_ref):
    # One grid step = one (batch, N-tile) pair, channels-first tiles.
    x1t = xyz1t_ref[0]          # [3, TN]      xyz1^T tile (N on lanes)
    x2 = xyz2_ref[0]            # [S, 3]       sampled coordinates (resident)
    p1t = pts1_ref[0]           # [D1, TN]     points1 tile (native layout)
    proj2 = proj2_ref[0]        # [out_ch, S]  Wf2 @ points2 (resident per batch)
    S = x2.shape[0]
    cdt = wf1_ref.dtype         # matmul compute dtype (bf16 by default)

    # -- squared pairwise distances [S, TN]: 3 broadcast VPU FMAs ------------
    d = None
    for k in range(3):
        diff = x2[:, k:k + 1] - x1t[k:k + 1, :]        # [S,1] - [1,TN] -> [S,TN]
        sq = diff * diff
        d = sq if d is None else d + sq

    # -- 3 nearest neighbours: sublane argmin, masked passes ------------------
    row_ids = lax.broadcasted_iota(jnp.int32, d.shape, 0)
    d_work = d
    sel_d = []
    sel_oh = []
    for j in range(3):
        mn = jnp.min(d_work, axis=0, keepdims=True)                    # [1, TN]
        is_min = d_work == mn
        first = jnp.min(jnp.where(is_min, row_ids, S), axis=0, keepdims=True)
        oh = (row_ids == first).astype(jnp.float32)                    # [S, TN]
        sel_d.append(mn)
        sel_oh.append(oh)
        if j < 2:                                                      # last mask unused
            d_work = d_work + BIG * oh                                 # FMA-form mask

    # -- inverse-distance weights (EUP reciprocals, single 1/norm) ------------
    r = [pl.reciprocal(sd + 1e-8, approx=True) for sd in sel_d]        # [1, TN]
    inv_norm = pl.reciprocal(r[0] + r[1] + r[2], approx=True)          # [1, TN]
    wT = ((r[0] * inv_norm) * sel_oh[0]
          + (r[1] * inv_norm) * sel_oh[1]
          + (r[2] * inv_norm) * sel_oh[2])                             # [S, TN]

    # -- fuse: Wf1 @ points1 + (Wf2 @ points2) @ W + b  ->  [out_ch, TN] ------
    fused = (jnp.dot(wf1_ref[...], p1t.astype(cdt),
                     preferred_element_type=jnp.float32)
             + jnp.dot(proj2, wT.astype(cdt),
                       preferred_element_type=jnp.float32)
             + bf_ref[...])
    h = _leaky(fused)

    # -- residual block 1: leaky(net2(net1(h)) + h) ---------------------------
    t = _leaky(jnp.dot(w1_ref[...], h.astype(cdt),
                       preferred_element_type=jnp.float32) + b1_ref[...])
    t = jnp.dot(w2_ref[...], t.astype(cdt),
                preferred_element_type=jnp.float32) + b2_ref[...]
    h = _leaky(t + h)

    # -- residual block 2: leaky(net4(net3(h)) + h) ---------------------------
    t = _leaky(jnp.dot(w3_ref[...], h.astype(cdt),
                       preferred_element_type=jnp.float32) + b3_ref[...])
    t = jnp.dot(w4_ref[...], t.astype(cdt),
                preferred_element_type=jnp.float32) + b4_ref[...]
    h = _leaky(t + h)

    out_ref[0] = h.astype(out_ref.dtype)                               # lane-dense store


def init_params(key, d1, d2, out_ch):
    """Synthetic init. Conv1d(k=1) weight [O, Cin, 1] is kept as [O, Cin]
    (channels-first), bias as [O, 1]."""
    ks = jax.random.split(key, 11)

    def w(k, co, ci):
        return jax.random.normal(k, (co, ci), jnp.float32) / jnp.sqrt(jnp.float32(ci))

    def b(k, co):
        return jax.random.normal(k, (co, 1), jnp.float32) * 0.05

    return dict(
        wf1=w(ks[0], out_ch, d1),      # fuse-weight columns acting on points1
        wf2=w(ks[1], out_ch, d2),      # fuse-weight columns acting on interpolated feats
        bf=b(ks[2], out_ch),
        w1=w(ks[3], out_ch, out_ch), b1=b(ks[4], out_ch),
        w2=w(ks[5], out_ch, out_ch), b2=b(ks[6], out_ch),
        w3=w(ks[7], out_ch, out_ch), b3=b(ks[8], out_ch),
        w4=w(ks[9], out_ch, out_ch), b4=b(ks[10], out_ch),
    )


def pointnet_fp_forward(xyz1, xyz2, points1, points2, params, *,
                        tile_n=256, compute_dtype=jnp.bfloat16):
    """xyz1:[B,N,3] xyz2:[B,S,3] points1:[B,D1,N] points2:[B,D2,S]
       returns [B, out_channel, N] (same layout as the PyTorch module)."""
    B, N, _ = xyz1.shape
    _, S, _ = xyz2.shape
    D1 = points1.shape[1]
    out_ch = params["bf"].shape[0]
    assert S >= 3, "kernel implements the 3-NN interpolation path"
    # TODO(synk): the S == 1 broadcast branch and the points1=None branch of the
    # PyTorch module are not implemented (plain-JAX glue outside the hot path).

    TN = min(tile_n, N)
    assert N % TN == 0, "N must be divisible by the N-tile size"
    assert TN % 128 == 0 or TN == N, "N tile should be a multiple of 128"

    # Only the tiny xyz1 tensor is transposed in the wrapper (3 channels);
    # feature tensors and the output keep their native channels-first layout.
    xyz1_t = jnp.transpose(xyz1, (0, 2, 1))                     # [B, 3, N]

    # Algebraic hoist of the fuse columns acting on the interpolated features:
    # Wf2 @ (points2 @ W) == (Wf2 @ points2) @ W.  proj2 is tiny ([B,out_ch,S])
    # and per-batch, so it is computed once here (f32) instead of once per tile.
    proj2 = jnp.einsum("od,bds->bos", params["wf2"], points2).astype(compute_dtype)

    param_order = ("wf1", "bf", "w1", "b1", "w2", "b2", "w3", "b3", "w4", "b4")
    flat_params = [
        params[k].astype(compute_dtype) if k.startswith("w")
        else params[k].astype(jnp.float32)                       # biases stay f32
        for k in param_order
    ]

    in_specs = [
        pl.BlockSpec((1, 3, TN), lambda b, n: (b, 0, n)),        # xyz1^T   (tiled over N)
        pl.BlockSpec((1, S, 3), lambda b, n: (b, 0, 0)),         # xyz2     (resident)
        pl.BlockSpec((1, D1, TN), lambda b, n: (b, 0, n)),       # points1  (tiled over N)
        pl.BlockSpec((1, out_ch, S), lambda b, n: (b, 0, 0)),    # Wf2@points2 (resident)
    ] + [pl.BlockSpec(p.shape, lambda b, n: (0, 0))              # all params are 2-D
         for p in flat_params]

    out = pl.pallas_call(
        _fp_kernel,
        out_shape=jax.ShapeDtypeStruct((B, out_ch, N), jnp.float32),
        grid=(B, N // TN),
        in_specs=in_specs,
        out_specs=pl.BlockSpec((1, out_ch, TN), lambda b, n: (b, 0, n)),
        compiler_params=pltpu.CompilerParams(
            dimension_semantics=("parallel", "parallel")),
    )(xyz1_t, xyz2, points1, proj2, *flat_params)

    return out                                                   # [B, out_channel, N]


if __name__ == "__main__":
    B, N, S = 2, 512, 128
    D1, D2 = 32, 64          # points1 / points2 channels; in_channel = D1 + D2
    OUT_CH = 64

    key = jax.random.PRNGKey(0)
    k_xyz1, k_xyz2, k_p1, k_p2, k_params = jax.random.split(key, 5)

    xyz1 = jax.random.normal(k_xyz1, (B, N, 3), jnp.float32)
    xyz2 = jax.random.normal(k_xyz2, (B, S, 3), jnp.float32)
    points1 = jax.random.normal(k_p1, (B, D1, N), jnp.float32)
    points2 = jax.random.normal(k_p2, (B, D2, S), jnp.float32)

    params = init_params(k_params, D1, D2, OUT_CH)

    out = pointnet_fp_forward(xyz1, xyz2, points1, points2, params)
    jax.block_until_ready(out)
    assert out.shape == (B, OUT_CH, N)
    assert bool(jnp.all(jnp.isfinite(out)))
    print("KERNEL_OK")
</pallas_src>

<mosaic_0001>
module attributes {stable_mosaic.version = 11 : i64} {
  func.func @_fp_kernel(%arg0: i32, %arg1: i32, %arg2: memref<1x3x256xf32, #tpu.memory_space<vmem>>, %arg3: memref<1x128x3xf32, #tpu.memory_space<vmem>>, %arg4: memref<1x32x256xf32, #tpu.memory_space<vmem>>, %arg5: memref<1x64x128xbf16, #tpu.memory_space<vmem>>, %arg6: memref<64x32xbf16, #tpu.memory_space<vmem>>, %arg7: memref<64x1xf32, #tpu.memory_space<vmem>>, %arg8: memref<64x64xbf16, #tpu.memory_space<vmem>>, %arg9: memref<64x1xf32, #tpu.memory_space<vmem>>, %arg10: memref<64x64xbf16, #tpu.memory_space<vmem>>, %arg11: memref<64x1xf32, #tpu.memory_space<vmem>>, %arg12: memref<64x64xbf16, #tpu.memory_space<vmem>>, %arg13: memref<64x1xf32, #tpu.memory_space<vmem>>, %arg14: memref<64x64xbf16, #tpu.memory_space<vmem>>, %arg15: memref<64x1xf32, #tpu.memory_space<vmem>>, %arg16: memref<1x64x256xf32, #tpu.memory_space<vmem>>) attributes {dimension_semantics = [#tpu.dimension_semantics<parallel>, #tpu.dimension_semantics<parallel>], iteration_bounds = array<i64: 2, 2>, scalar_prefetch = 0 : i64, scratch_operands = 0 : i64, tpu.core_type = #tpu.core_type<tc>, window_params = [{transform_indices = @transform_0, window_bounds = array<i64: 1, 3, 256>}, {transform_indices = @transform_1, window_bounds = array<i64: 1, 128, 3>}, {transform_indices = @transform_2, window_bounds = array<i64: 1, 32, 256>}, {transform_indices = @transform_3, window_bounds = array<i64: 1, 64, 128>}, {pipeline_mode = #tpu.pipeline_mode<synchronous>, transform_indices = @transform_4, window_bounds = array<i64: 64, 32>}, {pipeline_mode = #tpu.pipeline_mode<synchronous>, transform_indices = @transform_5, window_bounds = array<i64: 64, 1>}, {pipeline_mode = #tpu.pipeline_mode<synchronous>, transform_indices = @transform_6, window_bounds = array<i64: 64, 64>}, {pipeline_mode = #tpu.pipeline_mode<synchronous>, transform_indices = @transform_7, window_bounds = array<i64: 64, 1>}, {pipeline_mode = #tpu.pipeline_mode<synchronous>, transform_indices = @transform_8, window_bounds = array<i64: 64, 64>}, {pipeline_mode = #tpu.pipeline_mode<synchronous>, transform_indices = @transform_9, window_bounds = array<i64: 64, 1>}, {pipeline_mode = #tpu.pipeline_mode<synchronous>, transform_indices = @transform_10, window_bounds = array<i64: 64, 64>}, {pipeline_mode = #tpu.pipeline_mode<synchronous>, transform_indices = @transform_11, window_bounds = array<i64: 64, 1>}, {pipeline_mode = #tpu.pipeline_mode<synchronous>, transform_indices = @transform_12, window_bounds = array<i64: 64, 64>}, {pipeline_mode = #tpu.pipeline_mode<synchronous>, transform_indices = @transform_13, window_bounds = array<i64: 64, 1>}, {transform_indices = @transform_14, window_bounds = array<i64: 1, 64, 256>}]} {
    %c0 = arith.constant 0 : index
    %c0_0 = arith.constant 0 : index
    %c0_1 = arith.constant 0 : index
    %0 = vector.load %arg2[%c0, %c0_0, %c0_1] : memref<1x3x256xf32, #tpu.memory_space<vmem>>, vector<1x3x256xf32>
    %1 = vector.shape_cast %0 : vector<1x3x256xf32> to vector<3x256xf32>
    %c0_2 = arith.constant 0 : index
    %c0_3 = arith.constant 0 : index
    %c0_4 = arith.constant 0 : index
    %2 = vector.load %arg3[%c0_2, %c0_3, %c0_4] : memref<1x128x3xf32, #tpu.memory_space<vmem>>, vector<1x128x3xf32>
    %3 = vector.shape_cast %2 : vector<1x128x3xf32> to vector<128x3xf32>
    %c0_5 = arith.constant 0 : index
    %c0_6 = arith.constant 0 : index
    %c0_7 = arith.constant 0 : index
    %4 = vector.load %arg4[%c0_5, %c0_6, %c0_7] : memref<1x32x256xf32, #tpu.memory_space<vmem>>, vector<1x32x256xf32>
    %5 = vector.shape_cast %4 : vector<1x32x256xf32> to vector<32x256xf32>
    %c0_8 = arith.constant 0 : index
    %c0_9 = arith.constant 0 : index
    %c0_10 = arith.constant 0 : index
    %6 = vector.load %arg5[%c0_8, %c0_9, %c0_10] : memref<1x64x128xbf16, #tpu.memory_space<vmem>>, vector<1x64x128xbf16>
    %7 = vector.shape_cast %6 : vector<1x64x128xbf16> to vector<64x128xbf16>
    %8 = vector.extract_strided_slice %3 {offsets = [0, 0], sizes = [128, 1], strides = [1, 1]} : vector<128x3xf32> to vector<128x1xf32>
    %9 = vector.extract_strided_slice %1 {offsets = [0, 0], sizes = [1, 256], strides = [1, 1]} : vector<3x256xf32> to vector<1x256xf32>
    %10 = vector.broadcast %8 : vector<128x1xf32> to vector<128x256xf32>
    %11 = vector.broadcast %9 : vector<1x256xf32> to vector<128x256xf32>
    %12 = arith.subf %10, %11 : vector<128x256xf32>
    %13 = arith.mulf %12, %12 : vector<128x256xf32>
    %14 = vector.extract_strided_slice %3 {offsets = [0, 1], sizes = [128, 1], strides = [1, 1]} : vector<128x3xf32> to vector<128x1xf32>
    %15 = vector.extract_strided_slice %1 {offsets = [1, 0], sizes = [1, 256], strides = [1, 1]} : vector<3x256xf32> to vector<1x256xf32>
    %16 = vector.broadcast %14 : vector<128x1xf32> to vector<128x256xf32>
    %17 = vector.broadcast %15 : vector<1x256xf32> to vector<128x256xf32>
    %18 = arith.subf %16, %17 : vector<128x256xf32>
    %19 = arith.mulf %18, %18 : vector<128x256xf32>
    %20 = arith.addf %13, %19 : vector<128x256xf32>
    %21 = vector.extract_strided_slice %3 {offsets = [0, 2], sizes = [128, 1], strides = [1, 1]} : vector<128x3xf32> to vector<128x1xf32>
    %22 = vector.extract_strided_slice %1 {offsets = [2, 0], sizes = [1, 256], strides = [1, 1]} : vector<3x256xf32> to vector<1x256xf32>
    %23 = vector.broadcast %21 : vector<128x1xf32> to vector<128x256xf32>
    %24 = vector.broadcast %22 : vector<1x256xf32> to vector<128x256xf32>
    %25 = arith.subf %23, %24 : vector<128x256xf32>
    %26 = arith.mulf %25, %25 : vector<128x256xf32>
    %27 = arith.addf %20, %26 : vector<128x256xf32>
    %28 = tpu.iota {dimensions = array<i32: 0>} : vector<128x256xi32>
    %cst = arith.constant dense<0x7F800000> : vector<256xf32>
    %29 = vector.multi_reduction <minimumf>, %27, %cst [0] : vector<128x256xf32> to vector<256xf32>
    %30 = vector.shape_cast %29 : vector<256xf32> to vector<1x256xf32>
    %31 = vector.broadcast %30 : vector<1x256xf32> to vector<128x256xf32>
    %32 = arith.cmpf oeq, %27, %31 : vector<128x256xf32>
    %c128_i32 = arith.constant 128 : i32
    %33 = vector.broadcast %c128_i32 : i32 to vector<128x256xi32>
    %34 = arith.select %32, %28, %33 : vector<128x256xi1>, vector<128x256xi32>
    %cst_11 = arith.constant dense<2147483647> : vector<256xi32>
    %35 = vector.multi_reduction <minsi>, %34, %cst_11 [0] : vector<128x256xi32> to vector<256xi32>
    %36 = vector.shape_cast %35 : vector<256xi32> to vector<1x256xi32>
    %37 = vector.broadcast %36 : vector<1x256xi32> to vector<128x256xi32>
    %38 = arith.cmpi eq, %28, %37 : vector<128x256xi32>
    %39 = arith.extui %38 : vector<128x256xi1> to vector<128x256xi32>
    %40 = arith.sitofp %39 : vector<128x256xi32> to vector<128x256xf32>
    %cst_12 = arith.constant 1.000000e+30 : f32
    %41 = vector.broadcast %cst_12 : f32 to vector<128x256xf32>
    %42 = arith.mulf %41, %40 : vector<128x256xf32>
    %43 = arith.addf %27, %42 : vector<128x256xf32>
    %cst_13 = arith.constant dense<0x7F800000> : vector<256xf32>
    %44 = vector.multi_reduction <minimumf>, %43, %cst_13 [0] : vector<128x256xf32> to vector<256xf32>
    %45 = vector.shape_cast %44 : vector<256xf32> to vector<1x256xf32>
    %46 = vector.broadcast %45 : vector<1x256xf32> to vector<128x256xf32>
    %47 = arith.cmpf oeq, %43, %46 : vector<128x256xf32>
    %c128_i32_14 = arith.constant 128 : i32
    %48 = vector.broadcast %c128_i32_14 : i32 to vector<128x256xi32>
    %49 = arith.select %47, %28, %48 : vector<128x256xi1>, vector<128x256xi32>
    %cst_15 = arith.constant dense<2147483647> : vector<256xi32>
    %50 = vector.multi_reduction <minsi>, %49, %cst_15 [0] : vector<128x256xi32> to vector<256xi32>
    %51 = vector.shape_cast %50 : vector<256xi32> to vector<1x256xi32>
    %52 = vector.broadcast %51 : vector<1x256xi32> to vector<128x256xi32>
    %53 = arith.cmpi eq, %28, %52 : vector<128x256xi32>
    %54 = arith.extui %53 : vector<128x256xi1> to vector<128x256xi32>
    %55 = arith.sitofp %54 : vector<128x256xi32> to vector<128x256xf32>
    %cst_16 = arith.constant 1.000000e+30 : f32
    %56 = vector.broadcast %cst_16 : f32 to vector<128x256xf32>
    %57 = arith.mulf %56, %55 : vector<128x256xf32>
    %58 = arith.addf %43, %57 : vector<128x256xf32>
    %cst_17 = arith.constant dense<0x7F800000> : vector<256xf32>
    %59 = vector.multi_reduction <minimumf>, %58, %cst_17 [0] : vector<128x256xf32> to vector<256xf32>
    %60 = vector.shape_cast %59 : vector<256xf32> to vector<1x256xf32>
    %61 = vector.broadcast %60 : vector<1x256xf32> to vector<128x256xf32>
    %62 = arith.cmpf oeq, %58, %61 : vector<128x256xf32>
    %c128_i32_18 = arith.constant 128 : i32
    %63 = vector.broadcast %c128_i32_18 : i32 to vector<128x256xi32>
    %64 = arith.select %62, %28, %63 : vector<128x256xi1>, vector<128x256xi32>
    %cst_19 = arith.constant dense<2147483647> : vector<256xi32>
    %65 = vector.multi_reduction <minsi>, %64, %cst_19 [0] : vector<128x256xi32> to vector<256xi32>
    %66 = vector.shape_cast %65 : vector<256xi32> to vector<1x256xi32>
    %67 = vector.broadcast %66 : vector<1x256xi32> to vector<128x256xi32>
    %68 = arith.cmpi eq, %28, %67 : vector<128x256xi32>
    %69 = arith.extui %68 : vector<128x256xi1> to vector<128x256xi32>
    %70 = arith.sitofp %69 : vector<128x256xi32> to vector<128x256xf32>
    %cst_20 = arith.constant 9.99999993E-9 : f32
    %71 = vector.broadcast %cst_20 : f32 to vector<1x256xf32>
    %72 = arith.addf %30, %71 : vector<1x256xf32>
    %73 = tpu.reciprocal %72 {approx = true} : vector<1x256xf32> -> vector<1x256xf32>
    %cst_21 = arith.constant 9.99999993E-9 : f32
    %74 = vector.broadcast %cst_21 : f32 to vector<1x256xf32>
    %75 = arith.addf %45, %74 : vector<1x256xf32>
    %76 = tpu.reciprocal %75 {approx = true} : vector<1x256xf32> -> vector<1x256xf32>
    %cst_22 = arith.constant 9.99999993E-9 : f32
    %77 = vector.broadcast %cst_22 : f32 to vector<1x256xf32>
    %78 = arith.addf %60, %77 : vector<1x256xf32>
    %79 = tpu.reciprocal %78 {approx = true} : vector<1x256xf32> -> vector<1x256xf32>
    %80 = arith.addf %73, %76 : vector<1x256xf32>
    %81 = arith.addf %80, %79 : vector<1x256xf32>
    %82 = tpu.reciprocal %81 {approx = true} : vector<1x256xf32> -> vector<1x256xf32>
    %83 = arith.mulf %73, %82 : vector<1x256xf32>
    %84 = vector.broadcast %83 : vector<1x256xf32> to vector<128x256xf32>
    %85 = arith.mulf %84, %40 : vector<128x256xf32>
    %86 = arith.mulf %76, %82 : vector<1x256xf32>
    %87 = vector.broadcast %86 : vector<1x256xf32> to vector<128x256xf32>
    %88 = arith.mulf %87, %55 : vector<128x256xf32>
    %89 = arith.addf %85, %88 : vector<128x256xf32>
    %90 = arith.mulf %79, %82 : vector<1x256xf32>
    %91 = vector.broadcast %90 : vector<1x256xf32> to vector<128x256xf32>
    %92 = arith.mulf %91, %70 : vector<128x256xf32>
    %93 = arith.addf %89, %92 : vector<128x256xf32>
    %c0_23 = arith.constant 0 : index
    %c0_24 = arith.constant 0 : index
    %94 = vector.load %arg6[%c0_23, %c0_24] : memref<64x32xbf16, #tpu.memory_space<vmem>>, vector<64x32xbf16>
    %95 = arith.truncf %5 : vector<32x256xf32> to vector<32x256xbf16>
    %cst_25 = arith.constant dense<0.000000e+00> : vector<64x256xf32>
    %96 = tpu.matmul %94, %95, %cst_25 {dimension_numbers = #tpu.dot_dimension_numbers<[1], [0], [0], [1], [0, 0, 1, 1], [], []>} : vector<64x32xbf16>, vector<32x256xbf16>, vector<64x256xf32> -> vector<64x256xf32>
    %97 = arith.truncf %93 : vector<128x256xf32> to vector<128x256xbf16>
    %cst_26 = arith.constant dense<0.000000e+00> : vector<64x256xf32>
    %98 = tpu.matmul %7, %97, %cst_26 {dimension_numbers = #tpu.dot_dimension_numbers<[1], [0], [0], [1], [0, 0, 1, 1], [], []>} : vector<64x128xbf16>, vector<128x256xbf16>, vector<64x256xf32> -> vector<64x256xf32>
    %99 = arith.addf %96, %98 : vector<64x256xf32>
    %c0_27 = arith.constant 0 : index
    %c0_28 = arith.constant 0 : index
    %100 = vector.load %arg7[%c0_27, %c0_28] : memref<64x1xf32, #tpu.memory_space<vmem>>, vector<64x1xf32>
    %101 = vector.broadcast %100 : vector<64x1xf32> to vector<64x256xf32>
    %102 = arith.addf %99, %101 : vector<64x256xf32>
    %cst_29 = arith.constant 0.00999999977 : f32
    %103 = vector.broadcast %cst_29 : f32 to vector<64x256xf32>
    %104 = arith.mulf %103, %102 : vector<64x256xf32>
    %105 = arith.maximumf %102, %104 : vector<64x256xf32>
    %c0_30 = arith.constant 0 : index
    %c0_31 = arith.constant 0 : index
    %106 = vector.load %arg8[%c0_30, %c0_31] : memref<64x64xbf16, #tpu.memory_space<vmem>>, vector<64x64xbf16>
    %107 = arith.truncf %105 : vector<64x256xf32> to vector<64x256xbf16>
    %cst_32 = arith.constant dense<0.000000e+00> : vector<64x256xf32>
    %108 = tpu.matmul %106, %107, %cst_32 {dimension_numbers = #tpu.dot_dimension_numbers<[1], [0], [0], [1], [0, 0, 1, 1], [], []>} : vector<64x64xbf16>, vector<64x256xbf16>, vector<64x256xf32> -> vector<64x256xf32>
    %c0_33 = arith.constant 0 : index
    %c0_34 = arith.constant 0 : index
    %109 = vector.load %arg9[%c0_33, %c0_34] : memref<64x1xf32, #tpu.memory_space<vmem>>, vector<64x1xf32>
    %110 = vector.broadcast %109 : vector<64x1xf32> to vector<64x256xf32>
    %111 = arith.addf %108, %110 : vector<64x256xf32>
    %cst_35 = arith.constant 0.00999999977 : f32
    %112 = vector.broadcast %cst_35 : f32 to vector<64x256xf32>
    %113 = arith.mulf %112, %111 : vector<64x256xf32>
    %114 = arith.maximumf %111, %113 : vector<64x256xf32>
    %c0_36 = arith.constant 0 : index
    %c0_37 = arith.constant 0 : index
    %115 = vector.load %arg10[%c0_36, %c0_37] : memref<64x64xbf16, #tpu.memory_space<vmem>>, vector<64x64xbf16>
    %116 = arith.truncf %114 : vector<64x256xf32> to vector<64x256xbf16>
    %cst_38 = arith.constant dense<0.000000e+00> : vector<64x256xf32>
    %117 = tpu.matmul %115, %116, %cst_38 {dimension_numbers = #tpu.dot_dimension_numbers<[1], [0], [0], [1], [0, 0, 1, 1], [], []>} : vector<64x64xbf16>, vector<64x256xbf16>, vector<64x256xf32> -> vector<64x256xf32>
    %c0_39 = arith.constant 0 : index
    %c0_40 = arith.constant 0 : index
    %118 = vector.load %arg11[%c0_39, %c0_40] : memref<64x1xf32, #tpu.memory_space<vmem>>, vector<64x1xf32>
    %119 = vector.broadcast %118 : vector<64x1xf32> to vector<64x256xf32>
    %120 = arith.addf %117, %119 : vector<64x256xf32>
    %121 = arith.addf %120, %105 : vector<64x256xf32>
    %cst_41 = arith.constant 0.00999999977 : f32
    %122 = vector.broadcast %cst_41 : f32 to vector<64x256xf32>
    %123 = arith.mulf %122, %121 : vector<64x256xf32>
    %124 = arith.maximumf %121, %123 : vector<64x256xf32>
    %c0_42 = arith.constant 0 : index
    %c0_43 = arith.constant 0 : index
    %125 = vector.load %arg12[%c0_42, %c0_43] : memref<64x64xbf16, #tpu.memory_space<vmem>>, vector<64x64xbf16>
    %126 = arith.truncf %124 : vector<64x256xf32> to vector<64x256xbf16>
    %cst_44 = arith.constant dense<0.000000e+00> : vector<64x256xf32>
    %127 = tpu.matmul %125, %126, %cst_44 {dimension_numbers = #tpu.dot_dimension_numbers<[1], [0], [0], [1], [0, 0, 1, 1], [], []>} : vector<64x64xbf16>, vector<64x256xbf16>, vector<64x256xf32> -> vector<64x256xf32>
    %c0_45 = arith.constant 0 : index
    %c0_46 = arith.constant 0 : index
    %128 = vector.load %arg13[%c0_45, %c0_46] : memref<64x1xf32, #tpu.memory_space<vmem>>, vector<64x1xf32>
    %129 = vector.broadcast %128 : vector<64x1xf32> to vector<64x256xf32>
    %130 = arith.addf %127, %129 : vector<64x256xf32>
    %cst_47 = arith.constant 0.00999999977 : f32
    %131 = vector.broadcast %cst_47 : f32 to vector<64x256xf32>
    %132 = arith.mulf %131, %130 : vector<64x256xf32>
    %133 = arith.maximumf %130, %132 : vector<64x256xf32>
    %c0_48 = arith.constant 0 : index
    %c0_49 = arith.constant 0 : index
    %134 = vector.load %arg14[%c0_48, %c0_49] : memref<64x64xbf16, #tpu.memory_space<vmem>>, vector<64x64xbf16>
    %135 = arith.truncf %133 : vector<64x256xf32> to vector<64x256xbf16>
    %cst_50 = arith.constant dense<0.000000e+00> : vector<64x256xf32>
    %136 = tpu.matmul %134, %135, %cst_50 {dimension_numbers = #tpu.dot_dimension_numbers<[1], [0], [0], [1], [0, 0, 1, 1], [], []>} : vector<64x64xbf16>, vector<64x256xbf16>, vector<64x256xf32> -> vector<64x256xf32>
    %c0_51 = arith.constant 0 : index
    %c0_52 = arith.constant 0 : index
    %137 = vector.load %arg15[%c0_51, %c0_52] : memref<64x1xf32, #tpu.memory_space<vmem>>, vector<64x1xf32>
    %138 = vector.broadcast %137 : vector<64x1xf32> to vector<64x256xf32>
    %139 = arith.addf %136, %138 : vector<64x256xf32>
    %140 = arith.addf %139, %124 : vector<64x256xf32>
    %cst_53 = arith.constant 0.00999999977 : f32
    %141 = vector.broadcast %cst_53 : f32 to vector<64x256xf32>
    %142 = arith.mulf %141, %140 : vector<64x256xf32>
    %143 = arith.maximumf %140, %142 : vector<64x256xf32>
    %c0_54 = arith.constant 0 : index
    %c0_55 = arith.constant 0 : index
    %c0_56 = arith.constant 0 : index
    %144 = vector.load %arg16[%c0_54, %c0_55, %c0_56] : memref<1x64x256xf32, #tpu.memory_space<vmem>>, vector<1x64x256xf32>
    %145 = vector.shape_cast %144 : vector<1x64x256xf32> to vector<64x256xf32>
    %146 = vector.shape_cast %143 : vector<64x256xf32> to vector<1x64x256xf32>
    tpu.vector_store %arg16[%c0_54, %c0_55, %c0_56], %146 {strides = array<i32>} : memref<1x64x256xf32, #tpu.memory_space<vmem>>, vector<1x64x256xf32>,
    return
  }
  func.func @transform_0(%arg0: i32, %arg1: i32) -> (i32, i32, i32) {
    %c0_i32 = arith.constant 0 : i32
    %c0_i32_0 = arith.constant 0 : i32
    return %arg0, %c0_i32, %arg1 : i32, i32, i32
  }
  func.func @transform_1(%arg0: i32, %arg1: i32) -> (i32, i32, i32) {
    %c0_i32 = arith.constant 0 : i32
    %c0_i32_0 = arith.constant 0 : i32
    %c0_i32_1 = arith.constant 0 : i32
    return %arg0, %c0_i32, %c0_i32_0 : i32, i32, i32
  }
  func.func @transform_2(%arg0: i32, %arg1: i32) -> (i32, i32, i32) {
    %c0_i32 = arith.constant 0 : i32
    %c0_i32_0 = arith.constant 0 : i32
    return %arg0, %c0_i32, %arg1 : i32, i32, i32
  }
  func.func @transform_3(%arg0: i32, %arg1: i32) -> (i32, i32, i32) {
    %c0_i32 = arith.constant 0 : i32
    %c0_i32_0 = arith.constant 0 : i32
    %c0_i32_1 = arith.constant 0 : i32
    return %arg0, %c0_i32, %c0_i32_0 : i32, i32, i32
  }
  func.func @transform_4(%arg0: i32, %arg1: i32) -> (i32, i32) {
    %c0_i32 = arith.constant 0 : i32
    %c0_i32_0 = arith.constant 0 : i32
    %c0_i32_1 = arith.constant 0 : i32
    return %c0_i32, %c0_i32_0 : i32, i32
  }
  func.func @transform_5(%arg0: i32, %arg1: i32) -> (i32, i32) {
    %c0_i32 = arith.constant 0 : i32
    %c0_i32_0 = arith.constant 0 : i32
    %c0_i32_1 = arith.constant 0 : i32
    return %c0_i32, %c0_i32_0 : i32, i32
  }
  func.func @transform_6(%arg0: i32, %arg1: i32) -> (i32, i32) {
    %c0_i32 = arith.constant 0 : i32
    %c0_i32_0 = arith.constant 0 : i32
    %c0_i32_1 = arith.constant 0 : i32
    return %c0_i32, %c0_i32_0 : i32, i32
  }
  func.func @transform_7(%arg0: i32, %arg1: i32) -> (i32, i32) {
    %c0_i32 = arith.constant 0 : i32
    %c0_i32_0 = arith.constant 0 : i32
    %c0_i32_1 = arith.constant 0 : i32
    return %c0_i32, %c0_i32_0 : i32, i32
  }
  func.func @transform_8(%arg0: i32, %arg1: i32) -> (i32, i32) {
    %c0_i32 = arith.constant 0 : i32
    %c0_i32_0 = arith.constant 0 : i32
    %c0_i32_1 = arith.constant 0 : i32
    return %c0_i32, %c0_i32_0 : i32, i32
  }
  func.func @transform_9(%arg0: i32, %arg1: i32) -> (i32, i32) {
    %c0_i32 = arith.constant 0 : i32
    %c0_i32_0 = arith.constant 0 : i32
    %c0_i32_1 = arith.constant 0 : i32
    return %c0_i32, %c0_i32_0 : i32, i32
  }
  func.func @transform_10(%arg0: i32, %arg1: i32) -> (i32, i32) {
    %c0_i32 = arith.constant 0 : i32
    %c0_i32_0 = arith.constant 0 : i32
    %c0_i32_1 = arith.constant 0 : i32
    return %c0_i32, %c0_i32_0 : i32, i32
  }
  func.func @transform_11(%arg0: i32, %arg1: i32) -> (i32, i32) {
    %c0_i32 = arith.constant 0 : i32
    %c0_i32_0 = arith.constant 0 : i32
    %c0_i32_1 = arith.constant 0 : i32
    return %c0_i32, %c0_i32_0 : i32, i32
  }
  func.func @transform_12(%arg0: i32, %arg1: i32) -> (i32, i32) {
    %c0_i32 = arith.constant 0 : i32
    %c0_i32_0 = arith.constant 0 : i32
    %c0_i32_1 = arith.constant 0 : i32
    return %c0_i32, %c0_i32_0 : i32, i32
  }
  func.func @transform_13(%arg0: i32, %arg1: i32) -> (i32, i32) {
    %c0_i32 = arith.constant 0 : i32
    %c0_i32_0 = arith.constant 0 : i32
    %c0_i32_1 = arith.constant 0 : i32
    return %c0_i32, %c0_i32_0 : i32, i32
  }
  func.func @transform_14(%arg0: i32, %arg1: i32) -> (i32, i32, i32) {
    %c0_i32 = arith.constant 0 : i32
    %c0_i32_0 = arith.constant 0 : i32
    return %arg0, %c0_i32, %arg1 : i32, i32, i32
  }
}

</mosaic_0001>

<bundles_post_ra>
// kernel: tpu_custom_call.1
= control target key start
LH: loop header
LB: loop body
LE: loop exit
PB: predicated region body
PF: predicated region fallthrough
CT: control target
= control target key end

     0   :  { %s6837_s0 = inlined_call_operand.vmem [shape: f32[2,3,512], index: 0, kind: input, shape index: {}]   ;;  %s6838_s1 = inlined_call_operand.vmem [shape: f32[2,128,3], index: 1, kind: input, shape index: {}]   ;;  %s6839_s2 = inlined_call_operand.vmem [shape: f32[2,32,512], index: 2, kind: input, shape index: {}]   ;;  %s6840_s3 = inlined_call_operand.vmem [shape: bf16[2,64,128], index: 3, kind: input, shape index: {}]   ;;  %s6841_s4 = inlined_call_operand.vmem [shape: bf16[64,32], index: 4, kind: input, shape index: {}]   ;;  %s6842_s5 = inlined_call_operand.vmem [shape: f32[64,1], index: 5, kind: input, shape index: {}]   ;;  %s6843_s6 = inlined_call_operand.vmem [shape: bf16[64,64], index: 6, kind: input, shape index: {}]   ;;  %s6844_s7 = inlined_call_operand.vmem [shape: f32[64,1], index: 7, kind: input, shape index: {}]   ;;  %s6845_s8 = inlined_call_operand.vmem [shape: bf16[64,64], index: 8, kind: input, shape index: {}]   ;;  %s6846_s9 = inlined_call_operand.vmem [shape: f32[64,1], index: 9, kind: input, shape index: {}]   ;;  %s6847_s10 = inlined_call_operand.vmem [shape: bf16[64,64], index: 10, kind: input, shape index: {}]   ;;  %s6848_s11 = inlined_call_operand.vmem [shape: f32[64,1], index: 11, kind: input, shape index: {}]   ;;  %s6849_s12 = inlined_call_operand.vmem [shape: bf16[64,64], index: 12, kind: input, shape index: {}]   ;;  %s6850_s13 = inlined_call_operand.vmem [shape: f32[64,1], index: 13, kind: input, shape index: {}]   ;;  %s6851_s14 = inlined_call_operand.hbm [shape: f32[2,64,512], index: 14, kind: output, shape index: {}]  }
   0x1   :  { %7011 = sst [smem:[#allocation88_spill]] %s6837_s0 }
   0x2   :  { %7012 = sst [smem:[#allocation89_spill]] %s6838_s1 }
   0x3   :  { %7013 = sst [smem:[#allocation90_spill]] %s6839_s2 }
   0x4   :  { %7014 = sst [smem:[#allocation91_spill]] %s6847_s10 }
   0x5   :  { %7015 = sst [smem:[#allocation92_spill]] %s6849_s12 }
   0x6   :  { %7016 = sst [smem:[#allocation93_spill]] %s6851_s14 }
   0x7   :  { %19 = vsyncpa [#allocation4], 0 }
   0x8   :  { %21 = vsyncpa [#allocation4 + $0x1], 0  ;;  %s4149_s29 = smov 0   ;;  %s4151_s30 = smov 0  }
   0x9   :  { %s4153_s15 = smov 0   ;;  %s4155_s16 = smov 0  }
   0xa   :  { %s4157_s17 = smov 0   ;;  %s4159_s18 = smov 0  }
   0xb   :  { %s4161_s19 = smov 0   ;;  %s4163_s20 = smov 0  }
   0xc LB: > { %7017 = sst [smem:[#allocation6_spill]] %s4036_s29  ;;  %s3641_s21 = sadd.s32 4294967295, %s4064_s20   ;;  %s4064_s20 = sphi %s4163_s20, %s27_s20   ;;  %s4060_s19 = sphi %s4161_s19, %s7338_s19   ;;  %s4056_s18 = sphi %s4159_s18, %s7337_s18   ;;  %s4052_s17 = sphi %s4157_s17, %s7336_s17   ;;  %s4048_s16 = sphi %s4155_s16, %s7335_s16   ;;  %s4044_s15 = sphi %s4153_s15, %s7334_s15   ;;  %s4040_s30 = sphi %s4151_s30, %s7333_s30   ;;  %s4036_s29 = sphi %s4149_s29, %s7332_s29  }
   0xd   : > { %s3642_s22 = sadd.s32 4294967294, %s4064_s20   ;;  %s36_s23 = sadd.s32 1, %s4056_s18 }
   0xe   : > { %p37_p0 = scmp.ge.s32.totalorder %s36_s23, 2  ;;  %s39_s24 = sadd.s32 1, %s4060_s19 }
   0xf   : > { %p109_p1 = scmp.ne.s32.totalorder %s4044_s15, %s4040_s30  ;;  %p110_p2 = scmp.eq.s32.totalorder %s4064_s20, 0 }
  0x10   : > { %s7340_s23 = smov (%p37_p0, %s36_s23), 0  ;;  %s7342_s24 = smov (!%p37_p0, %s39_s24), %s4060_s19 }
  0x11   : > { %7018 = sst [smem:[#allocation7_spill]] %s7340_s23  ;;  %s98_s25 = ssub.s32 %s4056_s18, %s7340_s23 }
  0x12   : > { %p4201_p3 = por %p110_p2, %p109_p1  ;;  %p41_p4 = scmp.ge.s32.totalorder %s7342_s24, 2 }
  0x13   : > { %p377_p5 = scmp.eq.s32.totalorder %s3641_s21, 3  ;;  %p382_p6 = scmp.ne.s32.totalorder %s4040_s30, %s4036_s29 }
  0x14   : > { %p383_p7 = scmp.eq.s32.totalorder %s3642_s22, 3  ;;  %s7344_s24 = smov (%p41_p4, %s7342_s24), 0 }
  0x15   : > { %7020 = sst [smem:[#allocation8_spill]] %s7344_s24  ;;  %p4209_p8 = por %p377_p5, %p109_p1 }
  0x16   : > { %p4213_p9 = por %p383_p7, %p382_p6  ;;  %s97_s23 = ssub.s32 %s4060_s19, %s7344_s24 }
  0x17   : > { %s7021_s27 = scalar_select %p4209_p8, 1, 0 }
  0x18   : > { %s7023_s28 = scalar_select %p4213_p9, 1, 0 }
  0x19   : > { %7022 = sst [smem:[#allocation9_spill]] %s7021_s27  ;;  %s99_s14 = sor.u32 %s98_s25, %s97_s23 }
  0x1a   : > { %7024 = sst [smem:[#allocation10_spill]] %s7023_s28  ;;  %s102_s12 = sadd.s32 1, %s4044_s15 }
  0x1b   : > { %p100_p10 = scmp.eq.s32.totalorder %s99_s14, 0  ;;  %p3644_p11 = scmp.ge.s32.totalorder %s4064_s20, 4 }
  0x1d   : > { %s4221_s10 = scalar_select %p100_p10, %s4044_s15, %s102_s12  }
  0x1e   : > { %429 = sbr.rel (%p3644_p11) target bundleno = 51 (0x33), region = 56 }
  0x25   : > { %453 = sbr.rel (!%p4201_p3) target bundleno = 51 (0x33), region = 68  ;;  %s455_s21 = sand.u32 (%p4201_p3), 1, %s4044_s15  }
  0x26   : > { %s3646_s22 = sshll.u32 (%p4201_p3), %s4056_s18, 1  ;;  %s3645_s29 = sshll.u32 (%p4201_p3), %s455_s21, 6 }
  0x27   : > { %s3647_s27 = sshll.u32 (%p4201_p3), %s4060_s19, 4  ;;  %s7025_s2 = sld [smem:[#allocation90_spill]] (%p4201_p3) }
  0x28   : > { %s460_s28 = sadd.s32 (%p4201_p3), %s3647_s27, %s3646_s22  ;;  %s457_s14 = scalar_lea.vmem (%p4201_p3), [#allocation2], %s3645_s29 }
  0x29   : > { %s3648_s24 = sshll.u32 (%p4201_p3), %s460_s28, 3 }
  0x2d   : > { %s462_s12 = scalar_lea.vmem %s7025_s2, %s3648_s24 }
  0x2e   : > { %v475_v0 = vld [vmem:[%s462_s12] sm:$0xff]  ;;  %v477_v1 = vld [vmem:[%s462_s12 + $0x8] sm:$0xff] }
  0x2f   : > { %v479_v2 = vld [vmem:[%s462_s12 + $0x20] sm:$0xff]  ;;  %476 = vst [vmem:[%s457_s14] sm:$0xff] %v475_v0  ;;  %478 = vst [vmem:[%s457_s14 + $0x8] sm:$0xff] %v477_v1  ;;  %v481_v3 = vld [vmem:[%s462_s12 + $0x28] sm:$0xff] }
  0x30   : > { %480 = vst [vmem:[%s457_s14 + $0x10] sm:$0xff] %v479_v2  ;;  %v483_v4 = vld [vmem:[%s462_s12 + $0x40] sm:$0xff]  ;;  %v485_v5 = vld [vmem:[%s462_s12 + $0x48] sm:$0xff]  ;;  %482 = vst [vmem:[%s457_s14 + $0x18] sm:$0xff] %v481_v3 }
  0x31   : > { %484 = vst [vmem:[%s457_s14 + $0x20] sm:$0xff] %v483_v4  ;;  %486 = vst [vmem:[%s457_s14 + $0x28] sm:$0xff] %v485_v5  ;;  %v487_v6 = vld [vmem:[%s462_s12 + $0x60] sm:$0xff]  ;;  %v489_v7 = vld [vmem:[%s462_s12 + $0x68] sm:$0xff] }
  0x32   : > { %488 = vst [vmem:[%s457_s14 + $0x30] sm:$0xff] %v487_v6  ;;  %490 = vst [vmem:[%s457_s14 + $0x38] sm:$0xff] %v489_v7 }
  0x33 PF: > { %p3649_p12 = scmp.ge.s32.totalorder %s4064_s20, 1  ;;  %p503_p13 = scmp.lt.s32.totalorder %s4064_s20, 5 }
  0x35   : > { %p504_p0 = pnand %p3649_p12, %p503_p13 }
  0x37   : > { %507 = sbr.rel (%p504_p0) target bundleno = 1955 (0x7a3), region = 95 }
  0x3e   : > { %p575_p1 = scmp.lt.s32.totalorder %s4052_s17, 1  ;;  %v711_v8 = vlaneseq  ;;  %v4066_v9 = vmov 1   ;;  %v6861_v10 = vmov 0   ;;  %s4238_s29 = sshll.u32 %s4048_s16, 1  ;;  %v4068_v31 = vmov 2  }
  0x3f   : > { %3906 = vset.pattern.permute.xlu0 %v4066_v9  ;;  %3905 = vset.pattern.permute.xlu1 %v6861_v10  ;;  %p577_p2 = scmp.lt.s32.totalorder %s4238_s29, 3  ;;  %s7026_s1 = sld [smem:[#allocation89_spill]] }
  0x40   : > { %s4241_s24 = scalar_select %p575_p1, %s4052_s17, 1  ;;  %2402 = vmatprep.mubr.bf16.mxu0 %v6861_v10  ;;  %2528 = vmatprep.mubr.bf16.mxu1 %v6861_v10  ;;  %v4247_v11 = vshrl.u32 %v711_v8, 7 }
  0x41   : > { %s578_s22 = scalar_select %p577_p2, %s4238_s29, 3 }
  0x42   : > { %s3805_s26 = sshll.u32 %s4241_s24, 7  ;;  %s3653_s16 = sshll.u32 %s4241_s24, 2  ;;  %v4260_v15 = vsub.s32 0, %v4247_v11  ;;  %v4263_v16 = vsub.s32 1, %v4247_v11  ;;  %v4291_v28 = vsub.s32 2, %v4247_v11  ;;  %v717_v54 = vsub.s32 4, %v4247_v11 }
  0x43   : > { %s580_s23 = sadd.s32 %s3653_s16, %s578_s22  ;;  %s7027_s0 = sld [smem:[#allocation88_spill]]  ;;  %v863_v59 = vsub.s32 5, %v4247_v11 }
  0x44   : > { %s3654_s25 = sshll.u32 %s580_s23, 2  ;;  %s3806_s27 = sshll.u32 %s4241_s24, 5 }
  0x45   : > { %s4252_s21 = scalar_lea.vmem %s7026_s1, %s3805_s26  ;;  %s5751_s16 = scalar_lea.vmem %s6840_s3, %s3806_s27 }
  0x46   : > { %v600_v12 = vld [vmem:[%s4252_s21 + $0x10] sm:$0xff]  ;;  %v598_v13 = vld [vmem:[%s4252_s21] sm:$0xff]  ;;  %v601_v14 = vld [vmem:[%s4252_s21 + $0x18] sm:$0xff]  ;;  %s5762_s24 = sand.u32 1, %s4040_s30   ;;  %s3801_s12 = sshll.u32 %s4052_s17, 5 }
  0x47   : > { %642 = vperm.xlu1 %3905, %v600_v12   ;;  %794 = vperm.xlu0 %3906, %v598_v13   ;;  %v599_v18 = vld [vmem:[%s4252_s21 + $0x8] sm:$0xff]  ;;  %v602_v24 = vld [vmem:[%s4252_s21 + $0x20] sm:$0xff]  ;;  %v605_v25 = vld [vmem:[%s4252_s21 + $0x38] sm:$0xff]  ;;  %s3650_s22 = sshll.u32 %s5762_s24, 6  ;;  %s3651_s28 = sshll.u32 %s5762_s24, 7 }
  0x48   : > { %v603_v23 = vld [vmem:[%s4252_s21 + $0x28] sm:$0xff]  ;;  %v609_v27 = vld [vmem:[%s4252_s21 + $0x58] sm:$0xff]  ;;  %v604_v34 = vld [vmem:[%s4252_s21 + $0x30] sm:$0xff]  ;;  %s5845_s23 = scalar_lea.vmem [#allocation2], %s3650_s22  ;;  %s7324_s22 = sld [smem:[#allocation92_spill]] }
  0x49   : > { %s582_s26 = scalar_lea.vmem %s7027_s0, %s3654_s25  ;;  %v607_v26 = vld [vmem:[%s4252_s21 + $0x48] sm:$0xff]  ;;  %v613_v33 = vld [vmem:[%s4252_s21 + $0x78] sm:$0xff]  ;;  %v606_v35 = vld [vmem:[%s4252_s21 + $0x40] sm:$0xff]  ;;  %s7323_s25 = sld [smem:[#allocation91_spill]] }
  0x4a   : > { %v4268_v17 = vld [vmem:[%s582_s26] sm:$0x77]  ;;  %v611_v30 = vld [vmem:[%s4252_s21 + $0x68] sm:$0xff]  ;;  %v608_v36 = vld [vmem:[%s4252_s21 + $0x50] sm:$0xff]  ;;  %s7326_s27 = sld [smem:[#allocation93_spill]] }
  0x4b   : > { %647 = vperm.xlu1 %3905, %v601_v14   ;;  %806 = vperm.xlu0 %3906, %v601_v14   ;;  %v714_v19 = vrot.slane %v4268_v17, %v4260_v15  ;;  %v860_v20 = vrot.slane %v4268_v17, %v4263_v16  ;;  %v1038_v29 = vrot.slane %v4268_v17, %v4291_v28  ;;  %v610_v37 = vld [vmem:[%s4252_s21 + $0x60] sm:$0xff]  ;;  %v612_v38 = vld [vmem:[%s4252_s21 + $0x70] sm:$0xff]  ;;  %s6745_s21 = scalar_lea.vmem [#allocation3], %s3651_s28 }
  0x4c   : > { %v718_v63 = vrot.slane %v4268_v17, %v717_v54  ;;  %v864_v5 = vrot.slane %v4268_v17, %v863_v59 }
  0x4d   : > { %v4276_v21 = vrot.slane %v714_v19, %v4260_v15  ;;  %v4279_v22 = vrot.slane %v860_v20, %v4263_v16  ;;  %v4297_v32 = vrot.slane %v1038_v29, %v4291_v28 }
  0x4e   : > { %v4360_v19 = vrot.slane %v864_v5, %v4263_v16 }
  0x4f   : > { %3907 = vset.pattern.permute.xlu1 %v4066_v9  ;;  %3908 = vset.pattern.permute.xlu0 %v6861_v10 }
  0x50   : > { %798 = vperm.xlu1 %3907, %v599_v18   ;;  %632 = vperm.xlu0 %3908, %v598_v13  }
  0x54   : > { %802 = vperm.xlu1 %3907, %v600_v12   ;;  %637 = vperm.xlu0 %3908, %v599_v18  }
  0x58   : > { %3909 = vset.pattern.permute.xlu1 %v6861_v10  ;;  %657 = vperm.xlu0 %3908, %v603_v23  }
  0x59   : > { %652 = vperm.xlu1 %3909, %v602_v24  }
  0x5c   : > { %667 = vperm.xlu0 %3908, %v605_v25  }
  0x5d   : > { %3910 = vset.pattern.permute.xlu1 %v4066_v9 }
  0x5e   : > { %810 = vperm.xlu1 %3910, %v602_v24  }
  0x60   : > { %677 = vperm.xlu0 %3908, %v607_v26  }
  0x62   : > { %814 = vperm.xlu1 %3910, %v603_v23  }
  0x64   : > { %687 = vperm.xlu0 %3908, %v609_v27  }
  0x66   : > { %3911 = vset.pattern.permute.xlu1 %v4068_v31 }
  0x67   : > { %976 = vperm.xlu1 %3911, %v599_v18   ;;  %v1041_v18 = vsub.s32 6, %v4247_v11 }
  0x68   : > { %697 = vperm.xlu0 %3908, %v611_v30  }
  0x69   : > { %v1042_v29 = vrot.slane %v4268_v17, %v1041_v18 }
  0x6b   : > { %980 = vperm.xlu1 %3911, %v600_v12  }
  0x6c   : > { %707 = vperm.xlu0 %3908, %v613_v33  }
  0x6f   : > { %3912 = vset.pattern.permute.xlu1 %v6861_v10 }
  0x70   : > { %662 = vperm.xlu1 %3912, %v604_v34   ;;  %3925 = vset.pattern.permute.xlu0 %v4068_v31 }
  0x71   : > { %972 = vperm.xlu0 %3925, %v598_v13   ;;  %v4354_v13 = vrot.slane %v718_v63, %v4260_v15 }
  0x74   : > { %3913 = vset.pattern.permute.xlu1 %v4066_v9 }
  0x75   : > { %818 = vperm.xlu1 %3913, %v604_v34   ;;  %984 = vperm.xlu0 %3925, %v601_v14  }
  0x79   : > { %822 = vperm.xlu1 %3913, %v605_v25   ;;  %988 = vperm.xlu0 %3925, %v602_v24  }
  0x7d   : > { %3914 = vset.pattern.permute.xlu1 %v4068_v31  ;;  %996 = vperm.xlu0 %3925, %v604_v34  }
  0x7e   : > { %992 = vperm.xlu1 %3914, %v603_v23  }
  0x81   : > { %1004 = vperm.xlu0 %3925, %v606_v35  }
  0x82   : > { %3915 = vset.pattern.permute.xlu1 %v6861_v10 }
  0x83   : > { %672 = vperm.xlu1 %3915, %v606_v35  }
  0x85   : > { %1012 = vperm.xlu0 %3925, %v608_v36  }
  0x87   : > { %3916 = vset.pattern.permute.xlu1 %v4066_v9 }
  0x88   : > { %826 = vperm.xlu1 %3916, %v606_v35  }
  0x89   : > { %1020 = vperm.xlu0 %3925, %v610_v37  }
  0x8c   : > { %830 = vperm.xlu1 %3916, %v607_v26  }
  0x8d   : > { %1032 = vperm.xlu0 %3925, %v613_v33  }
  0x90   : > { %3917 = vset.pattern.permute.xlu1 %v4068_v31 }
  0x91   : > { %1000 = vperm.xlu1 %3917, %v605_v25   ;;  %3929 = vset.pattern.permute.xlu0 %v6861_v10 }
  0x95   : > { %3918 = vset.pattern.permute.xlu1 %v6861_v10 }
  0x96   : > { %682 = vperm.xlu1 %3918, %v608_v36  }
  0x9a   : > { %3919 = vset.pattern.permute.xlu1 %v4066_v9 }
  0x9b   : > { %834 = vperm.xlu1 %3919, %v608_v36  }
  0x9f   : > { %838 = vperm.xlu1 %3919, %v609_v27  }
  0xa3   : > { %3920 = vset.pattern.permute.xlu1 %v4068_v31 }
  0xa4   : > { %1008 = vperm.xlu1 %3920, %v607_v26  }
  0xa8   : > { %3921 = vset.pattern.permute.xlu1 %v6861_v10 }
  0xa9   : > { %692 = vperm.xlu1 %3921, %v610_v37  }
  0xad   : > { %3922 = vset.pattern.permute.xlu1 %v4066_v9 }
  0xae   : > { %842 = vperm.xlu1 %3922, %v610_v37  }
  0xb2   : > { %846 = vperm.xlu1 %3922, %v611_v30  }
  0xb6   : > { %3923 = vset.pattern.permute.xlu1 %v4068_v31 }
  0xb7   : > { %1016 = vperm.xlu1 %3923, %v609_v27  }
  0xbb   : > { %3924 = vset.pattern.permute.xlu1 %v6861_v10 }
  0xbc   : > { %702 = vperm.xlu1 %3924, %v612_v38  }
  0xc0   : > { %3926 = vset.pattern.permute.xlu1 %v4066_v9 }
  0xc1   : > { %850 = vperm.xlu1 %3926, %v612_v38  }
  0xc5   : > { %854 = vperm.xlu1 %3926, %v613_v33  }
  0xc6   : > { %v4316_v39 = vpop.permute.xlu1 %642  ;;  %v4318_v40 = vpop.permute.xlu0 %794 }
  0xc7   : > { %v875_v41 = vsub.f32 %v4318_v40, %v4279_v22  ;;  %v733_v55 = vsub.f32 %v4316_v39, %v4276_v21 }
  0xc9   : > { %3927 = vset.pattern.permute.xlu1 %v4068_v31  ;;  %v907_v51 = vmul.f32 %v875_v41, %v875_v41  ;;  %v765_v0 = vmul.f32 %v733_v55, %v733_v55 }
  0xca   : > { %v4322_v42 = vpop.permute.xlu1 %647  ;;  %1024 = vperm.xlu1 %3927, %v611_v30   ;;  %v4324_v43 = vpop.permute.xlu0 %806 }
  0xcb   : > { %v735_v44 = vsub.f32 %v4322_v42, %v4276_v21  ;;  %v881_v45 = vsub.f32 %v4324_v43, %v4279_v22 }
  0xcd   : > { %v767_v46 = vmul.f32 %v735_v44, %v735_v44  ;;  %v913_v47 = vmul.f32 %v881_v45, %v881_v45  ;;  %v4386_v45 = vrot.slane %v1042_v29, %v4291_v28  ;;  %v736_v29 = vsub.f32 %v4322_v42, %v4354_v13 }
  0xce   : > { %1028 = vperm.xlu1 %3927, %v612_v38  }
  0xcf   : > { %v4330_v48 = vadd.f32 %v913_v47, %v767_v46  ;;  %v799_v49 = vpop.permute.xlu1 %798  ;;  %v4332_v50 = vpop.permute.xlu0 %632 }
  0xd0   : > { %v877_v52 = vsub.f32 %v799_v49, %v4279_v22  ;;  %v729_v53 = vsub.f32 %v4332_v50, %v4276_v21  ;;  %v878_v38 = vsub.f32 %v799_v49, %v4360_v19 }
  0xd2   : > { %v761_v56 = vmul.f32 %v729_v53, %v729_v53  ;;  %3928 = vset.pattern.permute.xlu1 %v6861_v10  ;;  %v909_v2 = vmul.f32 %v877_v52, %v877_v52  ;;  %v734_v53 = vsub.f32 %v4316_v39, %v4354_v13  ;;  %v910_v54 = vmul.f32 %v878_v38, %v878_v38 }
  0xd3   : > { %v803_v57 = vpop.permute.xlu1 %802  ;;  %v638_v58 = vpop.permute.xlu0 %637  ;;  %v876_v39 = vsub.f32 %v4318_v40, %v4360_v19 }
  0xd4   : > { %v4342_v60 = vadd.f32 %v907_v51, %v761_v56  ;;  %v879_v61 = vsub.f32 %v803_v57, %v4279_v22  ;;  %v731_v62 = vsub.f32 %v638_v58, %v4276_v21  ;;  %v732_v34 = vsub.f32 %v638_v58, %v4354_v13 }
  0xd5   : > { %v880_v47 = vsub.f32 %v803_v57, %v4360_v19 }
  0xd6   : > { %v911_v1 = vmul.f32 %v879_v61, %v879_v61  ;;  %v763_v3 = vmul.f32 %v731_v62, %v731_v62  ;;  %v764_v51 = vmul.f32 %v732_v34, %v732_v34 }
  0xd7   : > { %v4347_v4 = vpop.permute.xlu0 %657  ;;  %v912_v57 = vmul.f32 %v880_v47, %v880_v47 }
  0xd8   : > { %v943_v6 = vadd.f32 %v911_v1, %v765_v0  ;;  %v653_v7 = vpop.permute.xlu1 %652  ;;  %v739_v8 = vsub.f32 %v4347_v4, %v4276_v21  ;;  %v941_v9 = vadd.f32 %v909_v2, %v763_v3  ;;  %v942_v61 = vadd.f32 %v910_v54, %v764_v51 }
  0xd9   : > { %v737_v12 = vsub.f32 %v653_v7, %v4276_v21  ;;  %v738_v20 = vsub.f32 %v653_v7, %v4354_v13  ;;  %v766_v0 = vmul.f32 %v734_v53, %v734_v53 }
  0xda   : > { %v771_v41 = vmul.f32 %v739_v8, %v739_v8 }
  0xdb   : > { %v4356_v14 = vpop.permute.xlu0 %667  ;;  %v769_v15 = vmul.f32 %v737_v12, %v737_v12  ;;  %v770_v30 = vmul.f32 %v738_v20, %v738_v20  ;;  %v730_v12 = vsub.f32 %v4332_v50, %v4354_v13  ;;  %v944_v20 = vadd.f32 %v912_v57, %v766_v0 }
  0xdc   : > { %v4365_v23 = vsub.f32 %v4356_v14, %v4276_v21 }
  0xdd   : > { %v811_v24 = vpop.permute.xlu1 %810  ;;  %v762_v50 = vmul.f32 %v730_v12, %v730_v12 }
  0xde   : > { %v883_v25 = vsub.f32 %v811_v24, %v4279_v22  ;;  %v884_v26 = vsub.f32 %v811_v24, %v4360_v19 }
  0xdf   : > { %v4369_v27 = vpop.permute.xlu0 %677 }
  0xe0   : > { %v915_v31 = vmul.f32 %v883_v25, %v883_v25  ;;  %v916_v16 = vmul.f32 %v884_v26, %v884_v26  ;;  %v4374_v33 = vsub.f32 %v4369_v27, %v4276_v21 }
  0xe1   : > { %v815_v35 = vpop.permute.xlu1 %814 }
  0xe2   : > { %v4377_v36 = vadd.f32 %v915_v31, %v769_v15  ;;  %v4379_v37 = vadd.f32 %v916_v16, %v770_v30  ;;  %v885_v44 = vsub.f32 %v815_v35, %v4279_v22  ;;  %v882_v30 = vsub.f32 %v4324_v43, %v4360_v19 }
  0xe3   : > { %v4383_v17 = vpop.permute.xlu0 %687  ;;  %v740_v43 = vsub.f32 %v4347_v4, %v4354_v13 }
  0xe4   : > { %v4390_v46 = vsub.f32 %v4383_v17, %v4276_v21  ;;  %v917_v52 = vmul.f32 %v885_v44, %v885_v44  ;;  %v768_v44 = vmul.f32 %v736_v29, %v736_v29  ;;  %v914_v47 = vmul.f32 %v882_v30, %v882_v30 }
  0xe5   : > { %v772_v30 = vmul.f32 %v740_v43, %v740_v43 }
  0xe6   : > { %v977_v49 = vpop.permute.xlu1 %976  ;;  %v4395_v55 = vadd.f32 %v917_v52, %v771_v41 }
  0xe7   : > { %v1055_v56 = vsub.f32 %v977_v49, %v4297_v32  ;;  %v1056_v28 = vsub.f32 %v977_v49, %v4386_v45  ;;  %v4399_v58 = vpop.permute.xlu0 %697 }
  0xe8   : > { %v4403_v59 = vsub.f32 %v4399_v58, %v4276_v21 }
  0xe9   : > { %v1087_v62 = vmul.f32 %v1055_v56, %v1055_v56  ;;  %v1088_v63 = vmul.f32 %v1056_v28, %v1056_v28  ;;  %v886_v28 = vsub.f32 %v815_v35, %v4360_v19 }
  0xea   : > { %v981_v1 = vpop.permute.xlu1 %980 }
  0xeb   : > { %v4407_v2 = vadd.f32 %v1087_v62, %v941_v9  ;;  %v4409_v3 = vadd.f32 %v1088_v63, %v942_v61  ;;  %v1057_v5 = vsub.f32 %v981_v1, %v4297_v32  ;;  %v1058_v7 = vsub.f32 %v981_v1, %v4386_v45  ;;  %v4413_v8 = vpop.permute.xlu0 %707 }
  0xec   : > { %v4419_v18 = vsub.f32 %v4413_v8, %v4276_v21  ;;  %v908_v9 = vmul.f32 %v876_v39, %v876_v39 }
  0xed   : > { %7028 = vst [vmem:[#allocation11_spill] sm:$0xff] %v4407_v2  ;;  %v1089_v40 = vmul.f32 %v1057_v5, %v1057_v5  ;;  %v1090_v24 = vmul.f32 %v1058_v7, %v1058_v7 }
  0xee   : > { %v940_v51 = vadd.f32 %v908_v9, %v762_v50  ;;  %v918_v50 = vmul.f32 %v886_v28, %v886_v28 }
  0xef   : > { %v4421_v25 = vadd.f32 %v1089_v40, %v943_v6  ;;  %v4423_v26 = vadd.f32 %v1090_v24, %v944_v20  ;;  %v663_v15 = vpop.permute.xlu1 %662 }
  0xf0   : > { %v741_v31 = vsub.f32 %v663_v15, %v4276_v21  ;;  %v973_v16 = vpop.permute.xlu0 %972  ;;  %v742_v6 = vsub.f32 %v663_v15, %v4354_v13 }
  0xf1   : > { %7029 = vst [vmem:[#allocation12_spill] sm:$0xff] %v4421_v25  ;;  %v1053_v34 = vsub.f32 %v973_v16, %v4297_v32  ;;  %v1054_v38 = vsub.f32 %v973_v16, %v4386_v45 }
  0xf2   : > { %v773_v57 = vmul.f32 %v741_v31, %v741_v31  ;;  %v774_v63 = vmul.f32 %v742_v6, %v742_v6 }
  0xf3   : > { %v1085_v41 = vmul.f32 %v1053_v34, %v1053_v34  ;;  %v1086_v52 = vmul.f32 %v1054_v38, %v1054_v38 }
  0xf4   : > { %v819_v53 = vpop.permute.xlu1 %818  ;;  %v985_v42 = vpop.permute.xlu0 %984 }
  0xf5   : > { %v4436_v49 = vadd.f32 %v1085_v41, %v4342_v60  ;;  %v887_v54 = vsub.f32 %v819_v53, %v4279_v22  ;;  %v888_v56 = vsub.f32 %v819_v53, %v4360_v19  ;;  %v1059_v61 = vsub.f32 %v985_v42, %v4297_v32 }
  0xf6   : > { %v1060_v62 = vsub.f32 %v985_v42, %v4386_v45  ;;  %v775_v60 = vmul.f32 %v4365_v23, %v4365_v23  ;;  %v4447_v1 = vadd.f32 %v1086_v52, %v940_v51  ;;  %v946_v23 = vadd.f32 %v914_v47, %v768_v44 }
  0xf7   : > { %7030 = vst [vmem:[#allocation13_spill] sm:$0xff] %v4436_v49  ;;  %v1166_v0 = vmin.f32 %v4436_v49, %v4421_v25  ;;  %v919_v39 = vmul.f32 %v887_v54, %v887_v54  ;;  %v920_v4 = vmul.f32 %v888_v56, %v888_v56  ;;  %v1091_v5 = vmul.f32 %v1059_v61, %v1059_v61 }
  0xf8   : > { %v4449_v7 = vpop.permute.xlu1 %822  ;;  %v989_v35 = vpop.permute.xlu0 %988  ;;  %v1092_v40 = vmul.f32 %v1060_v62, %v1060_v62  ;;  %v1187_v16 = vmin.f32 %v4447_v1, %v4423_v26  ;;  %v950_v56 = vadd.f32 %v918_v50, %v772_v30 }
  0xf9   : > { %v951_v12 = vadd.f32 %v919_v39, %v773_v57  ;;  %v952_v20 = vadd.f32 %v920_v4, %v774_v63  ;;  %v889_v24 = vsub.f32 %v4449_v7, %v4279_v22  ;;  %v4454_v9 = vadd.f32 %v1091_v5, %v4330_v48 }
  0xfa   : > { %v1061_v15 = vsub.f32 %v989_v35, %v4297_v32  ;;  %v1062_v29 = vsub.f32 %v989_v35, %v4386_v45  ;;  %v4462_v51 = vadd.f32 %v1092_v40, %v946_v23 }
  0xfb   : > { %7031 = vst [vmem:[#allocation14_spill] sm:$0xff] %v4454_v9  ;;  %v921_v31 = vmul.f32 %v889_v24, %v889_v24  ;;  %v1167_v34 = vmin.f32 %v4407_v2, %v4454_v9 }
  0xfc   : > { %v1093_v38 = vmul.f32 %v1061_v15, %v1061_v15  ;;  %v1094_v6 = vmul.f32 %v1062_v29, %v1062_v29  ;;  %v997_v41 = vpop.permute.xlu0 %996  ;;  %v1188_v5 = vmin.f32 %v4409_v3, %v4462_v51 }
  0xfd   : > { %v953_v48 = vadd.f32 %v921_v31, %v775_v60  ;;  %v1065_v52 = vsub.f32 %v997_v41, %v4297_v32  ;;  %v1066_v53 = vsub.f32 %v997_v41, %v4386_v45  ;;  %v993_v44 = vpop.permute.xlu1 %992 }
  0xfe   : > { %v4467_v47 = vadd.f32 %v1093_v38, %v4377_v36  ;;  %v4470_v42 = vadd.f32 %v1094_v6, %v4379_v37  ;;  %v1063_v43 = vsub.f32 %v993_v44, %v4297_v32  ;;  %v1064_v54 = vsub.f32 %v993_v44, %v4386_v45 }
  0xff   : > { %v1097_v28 = vmul.f32 %v1065_v52, %v1065_v52  ;;  %v1098_v57 = vmul.f32 %v1066_v53, %v1066_v53  ;;  %v779_v52 = vmul.f32 %v4374_v33, %v4374_v33 }
 0x100   : > { %7032 = vst [vmem:[#allocation15_spill] sm:$0xff] %v4467_v47  ;;  %7033 = vst [vmem:[#allocation16_spill] sm:$0xff] %v4470_v42  ;;  %v1168_v61 = vmin.f32 %v1166_v0, %v4467_v47  ;;  %v4476_v62 = vmin.f32 %v1187_v16, %v4470_v42  ;;  %v1095_v63 = vmul.f32 %v1063_v43, %v1063_v43  ;;  %v4478_v4 = vpop.permute.xlu0 %1004 }
 0x101   : > { %v1096_v39 = vmul.f32 %v1064_v54, %v1064_v54  ;;  %v4480_v36 = vadd.f32 %v1097_v28, %v951_v12  ;;  %v4482_v37 = vadd.f32 %v1098_v57, %v952_v20  ;;  %v1069_v60 = vsub.f32 %v4478_v4, %v4297_v32 }
 0x102   : > { %v4489_v35 = vadd.f32 %v1095_v63, %v4395_v55  ;;  %v4493_v40 = vpop.permute.xlu1 %672 }
 0x103   : > { %7034 = vst [vmem:[#allocation17_spill] sm:$0xff] %v4480_v36  ;;  %7035 = vst [vmem:[#allocation18_spill] sm:$0xff] %v4482_v37  ;;  %v4491_v0 = vadd.f32 %v1096_v39, %v950_v56  ;;  %v1170_v24 = vmin.f32 %v1168_v61, %v4480_v36  ;;  %v745_v20 = vsub.f32 %v4493_v40, %v4276_v21 }
 0x104   : > { %7036 = vst [vmem:[#allocation19_spill] sm:$0xff] %v4489_v35  ;;  %v1169_v15 = vmin.f32 %v1167_v34, %v4489_v35  ;;  %v4504_v23 = vpop.permute.xlu0 %1012  ;;  %v1101_v41 = vmul.f32 %v1069_v60, %v1069_v60 }
 0x105   : > { %7037 = vst [vmem:[#allocation20_spill] sm:$0xff] %v4491_v0  ;;  %v4502_v29 = vmin.f32 %v1188_v5, %v4491_v0  ;;  %v1073_v55 = vsub.f32 %v4504_v23, %v4297_v32  ;;  %v777_v38 = vmul.f32 %v745_v20, %v745_v20 }
 0x107   : > { %v827_v30 = vpop.permute.xlu1 %826 }
 0x108   : > { %v891_v50 = vsub.f32 %v827_v30, %v4279_v22  ;;  %v4509_v31 = vpop.permute.xlu0 %1020 }
 0x109   : > { %v1077_v16 = vsub.f32 %v4509_v31, %v4297_v32 }
 0x10a   : > { %v923_v6 = vmul.f32 %v891_v50, %v891_v50 }
 0x10b   : > { %v831_v34 = vpop.permute.xlu1 %830 }
 0x10c   : > { %v955_v53 = vadd.f32 %v923_v6, %v777_v38  ;;  %v893_v44 = vsub.f32 %v831_v34, %v4279_v22 }
 0x10e   : > { %v4516_v43 = vadd.f32 %v1101_v41, %v955_v53  ;;  %v925_v54 = vmul.f32 %v893_v44, %v893_v44 }
 0x110   : > { %7038 = vst [vmem:[#allocation21_spill] sm:$0xff] %v4516_v43  ;;  %v1172_v56 = vmin.f32 %v1170_v24, %v4516_v43  ;;  %v957_v28 = vadd.f32 %v925_v54, %v779_v52  ;;  %v1001_v57 = vpop.permute.xlu1 %1000  ;;  %v1105_v24 = vmul.f32 %v1073_v55, %v1073_v55 }
 0x111   : > { %v1067_v61 = vsub.f32 %v1001_v57, %v4297_v32 }
 0x113   : > { %v1099_v63 = vmul.f32 %v1067_v61, %v1067_v61 }
 0x115   : > { %v4520_v39 = vadd.f32 %v1099_v63, %v953_v48  ;;  %v4522_v60 = vpop.permute.xlu1 %682  ;;  %v783_v48 = vmul.f32 %v4390_v46, %v4390_v46 }
 0x116   : > { %v749_v33 = vsub.f32 %v4522_v60, %v4276_v21 }
 0x117   : > { %7039 = vst [vmem:[#allocation22_spill] sm:$0xff] %v4520_v39  ;;  %v1171_v5 = vmin.f32 %v1169_v15, %v4520_v39 }
 0x118   : > { %v781_v38 = vmul.f32 %v749_v33, %v749_v33 }
 0x11a   : > { %v835_v20 = vpop.permute.xlu1 %834 }
 0x11b   : > { %v895_v50 = vsub.f32 %v835_v20, %v4279_v22 }
 0x11d   : > { %v927_v6 = vmul.f32 %v895_v50, %v895_v50 }
 0x11e   : > { %v839_v41 = vpop.permute.xlu1 %838 }
 0x11f   : > { %v959_v52 = vadd.f32 %v927_v6, %v781_v38  ;;  %v897_v53 = vsub.f32 %v839_v41, %v4279_v22 }
 0x121   : > { %v4531_v44 = vadd.f32 %v1105_v24, %v959_v52  ;;  %v929_v54 = vmul.f32 %v897_v53, %v897_v53  ;;  %v1109_v53 = vmul.f32 %v1077_v16, %v1077_v16 }
 0x123   : > { %7040 = vst [vmem:[#allocation23_spill] sm:$0xff] %v4531_v44  ;;  %v1174_v61 = vmin.f32 %v1172_v56, %v4531_v44  ;;  %v961_v63 = vadd.f32 %v929_v54, %v783_v48  ;;  %v1009_v15 = vpop.permute.xlu1 %1008  ;;  %v890_v44 = vsub.f32 %v4449_v7, %v4360_v19 }
 0x124   : > { %v1071_v10 = vsub.f32 %v1009_v15, %v4297_v32 }
 0x126   : > { %v1103_v12 = vmul.f32 %v1071_v10, %v1071_v10  ;;  %v787_v10 = vmul.f32 %v4403_v59, %v4403_v59 }
 0x128   : > { %v4535_v33 = vadd.f32 %v1103_v12, %v957_v28  ;;  %v693_v55 = vpop.permute.xlu1 %692 }
 0x129   : > { %v753_v50 = vsub.f32 %v693_v55, %v4276_v21 }
 0x12a   : > { %7041 = vst [vmem:[#allocation24_spill] sm:$0xff] %v4535_v33  ;;  %v4539_v38 = vmin.f32 %v1171_v5, %v4535_v33  ;;  %v744_v5 = vsub.f32 %v4356_v14, %v4354_v13  ;;  %v756_v14 = vsub.f32 %v4399_v58, %v4354_v13  ;;  %v1068_v58 = vsub.f32 %v1001_v57, %v4386_v45 }
 0x12b   : > { %v785_v24 = vmul.f32 %v753_v50, %v753_v50  ;;  %v896_v57 = vsub.f32 %v835_v20, %v4360_v19 }
 0x12c   : > { %v1100_v43 = vmul.f32 %v1068_v58, %v1068_v58 }
 0x12d   : > { %v843_v6 = vpop.permute.xlu1 %842 }
 0x12e   : > { %v899_v46 = vsub.f32 %v843_v6, %v4279_v22 }
 0x130   : > { %v931_v52 = vmul.f32 %v899_v46, %v899_v46 }
 0x131   : > { %v847_v56 = vpop.permute.xlu1 %846 }
 0x132   : > { %v963_v48 = vadd.f32 %v931_v52, %v785_v24  ;;  %v901_v54 = vsub.f32 %v847_v56, %v4279_v22  ;;  %v748_v24 = vsub.f32 %v4369_v27, %v4354_v13  ;;  %v752_v52 = vsub.f32 %v4383_v17, %v4354_v13 }
 0x133   : > { %v1070_v27 = vsub.f32 %v4478_v4, %v4386_v45  ;;  %v900_v4 = vsub.f32 %v843_v6, %v4360_v19 }
 0x134   : > { %v4545_v12 = vadd.f32 %v1109_v53, %v963_v48  ;;  %v933_v28 = vmul.f32 %v901_v54, %v901_v54  ;;  %v892_v53 = vsub.f32 %v827_v30, %v4360_v19  ;;  %v776_v48 = vmul.f32 %v744_v5, %v744_v5 }
 0x135   : > { %v894_v54 = vsub.f32 %v831_v34, %v4360_v19  ;;  %v784_v33 = vmul.f32 %v752_v52, %v752_v52  ;;  %v1074_v30 = vsub.f32 %v4504_v23, %v4386_v45  ;;  %v4575_v5 = vmul.f32 %v756_v14, %v756_v14 }
 0x136   : > { %7042 = vst [vmem:[#allocation25_spill] sm:$0xff] %v4545_v12  ;;  %v4552_v50 = vmin.f32 %v1174_v61, %v4545_v12  ;;  %v4554_v16 = vadd.f32 %v933_v28, %v787_v10  ;;  %v1017_v46 = vpop.permute.xlu1 %1016  ;;  %v922_v61 = vmul.f32 %v890_v44, %v890_v44  ;;  %v780_v10 = vmul.f32 %v748_v24, %v748_v24 }
 0x137   : > { %v1075_v59 = vsub.f32 %v1017_v46, %v4297_v32  ;;  %v746_v28 = vsub.f32 %v4493_v40, %v4354_v13  ;;  %v760_v34 = vsub.f32 %v4413_v8, %v4354_v13  ;;  %v924_v40 = vmul.f32 %v892_v53, %v892_v53 }
 0x138   : > { %v954_v24 = vadd.f32 %v922_v61, %v776_v48  ;;  %v1102_v23 = vmul.f32 %v1070_v27, %v1070_v27  ;;  %v1072_v14 = vsub.f32 %v1009_v15, %v4386_v45  ;;  %v750_v8 = vsub.f32 %v4522_v60, %v4354_v13 }
 0x139   : > { %v1107_v7 = vmul.f32 %v1075_v59, %v1075_v59  ;;  %v926_v59 = vmul.f32 %v894_v54, %v894_v54  ;;  %v778_v52 = vmul.f32 %v746_v28, %v746_v28  ;;  %v1106_v53 = vmul.f32 %v1074_v30, %v1074_v30 }
 0x13a   : > { %v1078_v48 = vsub.f32 %v4509_v31, %v4386_v45  ;;  %v1076_v20 = vsub.f32 %v1017_v46, %v4386_v45  ;;  %v928_v54 = vmul.f32 %v896_v57, %v896_v57  ;;  %v754_v15 = vsub.f32 %v693_v55, %v4354_v13 }
 0x13b   : > { %v4569_v12 = vadd.f32 %v1107_v7, %v961_v63  ;;  %v703_v17 = vpop.permute.xlu1 %702  ;;  %v791_v63 = vmul.f32 %v4419_v18, %v4419_v18  ;;  %v1033_v7 = vpop.permute.xlu0 %1032  ;;  %v956_v18 = vadd.f32 %v924_v40, %v778_v52  ;;  %v1104_v60 = vmul.f32 %v1072_v14, %v1072_v14 }
 0x13c   : > { %v757_v44 = vsub.f32 %v703_v17, %v4276_v21  ;;  %v898_v21 = vsub.f32 %v839_v41, %v4360_v19  ;;  %v958_v41 = vadd.f32 %v926_v59, %v780_v10  ;;  %v1083_v28 = vsub.f32 %v1033_v7, %v4297_v32 }
 0x13d   : > { %7043 = vst [vmem:[#allocation26_spill] sm:$0xff] %v4569_v12  ;;  %v4595_v6 = vadd.f32 %v1100_v43, %v954_v24  ;;  %v782_v40 = vmul.f32 %v750_v8, %v750_v8  ;;  %v932_v52 = vmul.f32 %v900_v4, %v900_v4  ;;  %v902_v31 = vsub.f32 %v847_v56, %v4360_v19 }
 0x13e   : > { %v930_v27 = vmul.f32 %v898_v21, %v898_v21  ;;  %v789_v58 = vmul.f32 %v757_v44, %v757_v44  ;;  %v1108_v46 = vmul.f32 %v1076_v20, %v1076_v20  ;;  %v4600_v55 = vadd.f32 %v1102_v23, %v956_v18 }
 0x13f   : > { %7044 = vst [vmem:[#allocation27_spill] sm:$0xff] %v4595_v6  ;;  %v960_v57 = vadd.f32 %v928_v54, %v782_v40  ;;  %v786_v21 = vmul.f32 %v754_v15, %v754_v15  ;;  %v1110_v14 = vmul.f32 %v1078_v48, %v1078_v48  ;;  %v1192_v56 = vmin.f32 %v4502_v29, %v4595_v6 }
 0x140   : > { %v851_v39 = vpop.permute.xlu1 %850  ;;  %7045 = vst [vmem:[#allocation28_spill] sm:$0xff] %v4600_v55  ;;  %v962_v44 = vadd.f32 %v930_v27, %v784_v33  ;;  %v934_v8 = vmul.f32 %v902_v31, %v902_v31  ;;  %v1115_v20 = vmul.f32 %v1083_v28, %v1083_v28  ;;  %v792_v48 = vmul.f32 %v760_v34, %v760_v34 }
 0x141   : > { %v903_v61 = vsub.f32 %v851_v39, %v4279_v22  ;;  %v904_v43 = vsub.f32 %v851_v39, %v4360_v19  ;;  %v964_v24 = vadd.f32 %v932_v52, %v786_v21  ;;  %v1084_v33 = vsub.f32 %v1033_v7, %v4386_v45 }
 0x142   : > { %v4613_v39 = vadd.f32 %v1106_v53, %v960_v57  ;;  %v966_v34 = vadd.f32 %v934_v8, %v4575_v5 }
 0x143   : > { %v935_v30 = vmul.f32 %v903_v61, %v903_v61  ;;  %v4602_v61 = vadd.f32 %v1104_v60, %v958_v41  ;;  %v936_v15 = vmul.f32 %v904_v43, %v904_v43  ;;  %v4623_v27 = vadd.f32 %v1110_v14, %v964_v24 }
 0x144   : > { %v855_v36 = vpop.permute.xlu1 %854  ;;  %7048 = vst [vmem:[#allocation31_spill] sm:$0xff] %v4613_v39 }
 0x145   : > { %v967_v0 = vadd.f32 %v935_v30, %v789_v58  ;;  %v905_v10 = vsub.f32 %v855_v36, %v4279_v22  ;;  %v906_v59 = vsub.f32 %v855_v36, %v4360_v19  ;;  %7046 = vst [vmem:[#allocation29_spill] sm:$0xff] %v4602_v61  ;;  %v4607_v22 = vadd.f32 %v1108_v46, %v962_v44 }
 0x146   : > { %v758_v36 = vsub.f32 %v703_v17, %v4354_v13  ;;  %v1194_v29 = vmin.f32 %v1192_v56, %v4602_v61  ;;  %v7050_v13 = vmin.f32 %v4476_v62, %v4482_v37  ;;  %7051 = vst [vmem:[#allocation33_spill] sm:$0xff] %v4623_v27  ;;  %v1116_v46 = vmul.f32 %v1084_v33, %v1084_v33 }
 0x147   : > { %v937_v4 = vmul.f32 %v905_v10, %v905_v10  ;;  %7047 = vst [vmem:[#allocation30_spill] sm:$0xff] %v4607_v22  ;;  %v938_v23 = vmul.f32 %v906_v59, %v906_v59  ;;  %v7054_v59 = vmin.f32 %v4539_v38, %v4569_v12 }
 0x148   : > { %v1193_v17 = vmin.f32 %v7050_v13, %v4600_v55  ;;  %v1196_v60 = vmin.f32 %v1194_v29, %v4607_v22  ;;  %v790_v53 = vmul.f32 %v758_v36, %v758_v36  ;;  %v4655_v29 = vadd.s32 16, %v4247_v11 }
 0x149   : > { %v969_v18 = vadd.f32 %v937_v4, %v791_v63  ;;  %v1025_v54 = vpop.permute.xlu1 %1024  ;;  %v970_v58 = vadd.f32 %v938_v23, %v792_v48  ;;  %v4664_v13 = vadd.s32 40, %v4247_v11 }
 0x14a   : > { %v1079_v41 = vsub.f32 %v1025_v54, %v4297_v32  ;;  %v1080_v19 = vsub.f32 %v1025_v54, %v4386_v45  ;;  %v1195_v5 = vmin.f32 %v1193_v17, %v4613_v39  ;;  %v968_v10 = vadd.f32 %v936_v15, %v790_v53 }
 0x14b   : > { %v4616_v28 = vadd.f32 %v1115_v20, %v969_v18  ;;  %v4640_v43 = vadd.f32 %v1116_v46, %v970_v58  ;;  %v4661_v15 = vadd.s32 32, %v4247_v11  ;;  %v4676_v53 = vadd.s32 72, %v4247_v11 }
 0x14c   : > { %v1111_v63 = vmul.f32 %v1079_v41, %v1079_v41  ;;  %v1112_v7 = vmul.f32 %v1080_v19, %v1080_v19  ;;  %v1197_v44 = vmin.f32 %v1195_v5, %v4623_v27  ;;  %v4652_v19 = vadd.s32 8, %v4247_v11 }
 0x14d   : > { %7049 = vst [vmem:[#allocation32_spill] sm:$0xff] %v4616_v28  ;;  %v1029_v30 = vpop.permute.xlu1 %1028  ;;  %7055 = vst [vmem:[#allocation36_spill] sm:$0xff] %v4640_v43  ;;  %v4679_v58 = vadd.s32 80, %v4247_v11  ;;  %v4689_v5 = vadd.s32 96, %v4247_v11  ;;  %v4692_v46 = vadd.s32 104, %v4247_v11 }
 0x14e   : > { %v4627_v40 = vadd.f32 %v1111_v63, %v4554_v16  ;;  %v4629_v52 = vadd.f32 %v1112_v7, %v966_v34  ;;  %v1081_v31 = vsub.f32 %v1029_v30, %v4297_v32  ;;  %v1082_v62 = vsub.f32 %v1029_v30, %v4386_v45  ;;  %7061 = vst [vmem:[#allocation42_spill] sm:$0xff] %v4676_v53 }
 0x14f   : > { %v4667_v63 = vadd.s32 48, %v4247_v11  ;;  %v4670_v7 = vadd.s32 56, %v4247_v11  ;;  %7062 = vst [vmem:[#allocation43_spill] sm:$0xff] %v4679_v58  ;;  %v4682_v30 = vadd.s32 88, %v4247_v11  ;;  %7066 = vst [vmem:[#allocation47_spill] sm:$0xff] %v4689_v5 }
 0x150   : > { %7052 = vst [vmem:[#allocation34_spill] sm:$0xff] %v4627_v40  ;;  %7053 = vst [vmem:[#allocation35_spill] sm:$0xff] %v4629_v52  ;;  %v1177_v57 = vmin.f32 %v7054_v59, %v4627_v40  ;;  %v1198_v21 = vmin.f32 %v1196_v60, %v4629_v52  ;;  %v1113_v14 = vmul.f32 %v1081_v31, %v1081_v31  ;;  %v4673_v60 = vadd.s32 64, %v4247_v11 }
 0x151   : > { %v1114_v16 = vmul.f32 %v1082_v62, %v1082_v62  ;;  %7058 = vst [vmem:[#allocation39_spill] sm:$0xff] %v4667_v63  ;;  %7059 = vst [vmem:[#allocation40_spill] sm:$0xff] %v4670_v7  ;;  %v4698_v59 = vadd.s32 120, %v4247_v11 }
 0x152   : > { %v1179_v32 = vmin.f32 %v1177_v57, %v4616_v28  ;;  %v4643_v45 = vadd.f32 %v1113_v14, %v967_v0  ;;  %v1200_v56 = vmin.f32 %v1198_v21, %v4640_v43  ;;  %7060 = vst [vmem:[#allocation41_spill] sm:$0xff] %v4673_v60  ;;  %7063 = vst [vmem:[#allocation44_spill] sm:$0xff] %v4682_v30  ;;  %v7067_v57 = vld [vmem:[#allocation20_spill] sm:$0xff]  ;;  %v7068_v21 = vld [vmem:[#allocation17_spill] sm:$0xff] }
 0x153   : > { %v4645_v4 = vadd.f32 %v1114_v16, %v968_v10  ;;  %v4695_v10 = vadd.s32 112, %v4247_v11  ;;  %v7069_v14 = vld [vmem:[#allocation22_spill] sm:$0xff]  ;;  %v7070_v16 = vld [vmem:[#allocation21_spill] sm:$0xff] }
 0x154   : > { %7056 = vst [vmem:[#allocation37_spill] sm:$0xff] %v4643_v45  ;;  %v1178_v38 = vmin.f32 %v4552_v50, %v4643_v45  ;;  %v4658_v50 = vadd.s32 24, %v4247_v11 }
 0x155   : > { %7057 = vst [vmem:[#allocation38_spill] sm:$0xff] %v4645_v4  ;;  %v1199_v24 = vmin.f32 %v1197_v44, %v4645_v4  ;;  %v7071_v44 = vld [vmem:[#allocation24_spill] sm:$0xff] }
 0x156   : > { %v1180_v8 = vmin.f32 %v1178_v38, %v1179_v32  ;;  %v7072_v32 = vld [vmem:[#allocation23_spill] sm:$0xff] }
 0x157   : > { %v1201_v20 = vmin.f32 %v1199_v24, %v1200_v56  ;;  %v7073_v56 = vld [vmem:[#allocation25_spill] sm:$0xff] }
 0x158   : > { %v1181_v36 = vrot.slane %v1180_v8, 4 }
 0x159   : > { %v1202_v23 = vrot.slane %v1201_v20, 4 }
 0x15a   : > { %v1182_v18 = vmin.f32 %v1180_v8, %v1181_v36 }
 0x15b   : > { %v1203_v54 = vmin.f32 %v1201_v20, %v1202_v23 }
 0x15c   : > { %v1183_v48 = vrot.slane %v1182_v18, 2 }
 0x15d   : > { %v1204_v33 = vrot.slane %v1203_v54, 2 }
 0x15e   : > { %v1184_v41 = vmin.f32 %v1182_v18, %v1183_v48 }
 0x15f   : > { %v1205_v0 = vmin.f32 %v1203_v54, %v1204_v33 }
 0x160   : > { %v1185_v17 = vrot.slane %v1184_v41, 1 }
 0x161   : > { %v1206_v34 = vrot.slane %v1205_v0, 1 }
 0x162   : > { %v4684_v31 = vmin.f32 %v1184_v41, %v1185_v17 }
 0x163   : > { %v4686_v62 = vmin.f32 %v1205_v0, %v1206_v34 }
 0x164   : > { %7064 = vst [vmem:[#allocation45_spill] sm:$0xff] %v4684_v31  ;;  %vm1208_vm0 = vcmp.eq.f32.partialorder %v4436_v49, %v4684_v31  ;;  %vm1210_vm2 = vcmp.eq.f32.partialorder %v4407_v2, %v4684_v31  ;;  %vm1212_vm4 = vcmp.eq.f32.partialorder %v4421_v25, %v4684_v31  ;;  %vm1214_vm6 = vcmp.eq.f32.partialorder %v4454_v9, %v4684_v31 }
 0x165   : > { %7065 = vst [vmem:[#allocation46_spill] sm:$0xff] %v4686_v62  ;;  %vm1209_vm1 = vcmp.eq.f32.partialorder %v4447_v1, %v4686_v62  ;;  %vm1211_vm3 = vcmp.eq.f32.partialorder %v4409_v3, %v4686_v62  ;;  %vm1213_vm5 = vcmp.eq.f32.partialorder %v4423_v26, %v4686_v62  ;;  %vm1215_vm7 = vcmp.eq.f32.partialorder %v4462_v51, %v4686_v62 }
 0x166   : > { %vm1216_vm8 = vcmp.eq.f32.partialorder %v4467_v47, %v4684_v31  ;;  %vm1233_vm11 = vcmp.eq.f32.partialorder %v4623_v27, %v4686_v62  ;;  %vm1234_vm12 = vcmp.eq.f32.partialorder %v4627_v40, %v4684_v31  ;;  %vm1235_vm13 = vcmp.eq.f32.partialorder %v4629_v52, %v4686_v62 }
 0x167   : > { %vm1236_vm14 = vcmp.eq.f32.partialorder %v4643_v45, %v4684_v31  ;;  %vm1237_vm15 = vcmp.eq.f32.partialorder %v4645_v4, %v4686_v62  ;;  %vm1238_vm9 = vcmp.eq.f32.partialorder %v4616_v28, %v4684_v31  ;;  %vm1239_vm10 = vcmp.eq.f32.partialorder %v4640_v43, %v4686_v62 }
 0x168   : > { %v1240_v38 = vsel %vm1208_vm0, %v4247_v11, 128  ;;  %v1241_v24 = vsel %vm1209_vm1, %v4247_v11, 128  ;;  %v1242_v8 = vsel %vm1210_vm2, %v4652_v19, 128  ;;  %v1243_v20 = vsel %vm1211_vm3, %v4652_v19, 128 }
 0x169   : > { %v1244_v36 = vsel %vm1212_vm4, %v4655_v29, 128  ;;  %v1245_v23 = vsel %vm1213_vm5, %v4655_v29, 128  ;;  %v1246_v18 = vsel %vm1214_vm6, %v4658_v50, 128  ;;  %v1247_v54 = vsel %vm1215_vm7, %v4658_v50, 128 }
 0x16a   : > { %v1248_v48 = vsel %vm1216_vm8, %v4661_v15, 128  ;;  %vm7074_vm0 = vcmp.eq.f32.partialorder %v4470_v42, %v4686_v62  ;;  %vm7075_vm1 = vcmp.eq.f32.partialorder %v4489_v35, %v4684_v31  ;;  %vm7076_vm2 = vcmp.eq.f32.partialorder %v7067_v57, %v4686_v62 }
 0x16b   : > { %v1249_v33 = vsel %vm7074_vm0, %v4661_v15, 128  ;;  %v1250_v41 = vsel %vm7075_vm1, %v4664_v13, 128  ;;  %v1251_v0 = vsel %vm7076_vm2, %v4664_v13, 128  ;;  %vm7077_vm3 = vcmp.eq.f32.partialorder %v7068_v21, %v4684_v31 }
 0x16c   : > { %v1252_v17 = vsel %vm7077_vm3, %v4667_v63, 128  ;;  %vm7078_vm4 = vcmp.eq.f32.partialorder %v4482_v37, %v4686_v62  ;;  %vm7079_vm5 = vcmp.eq.f32.partialorder %v7069_v14, %v4684_v31  ;;  %vm7080_vm6 = vcmp.eq.f32.partialorder %v4595_v6, %v4686_v62 }
 0x16d   : > { %v1253_v34 = vsel %vm7078_vm4, %v4667_v63, 128  ;;  %v1254_v35 = vsel %vm7079_vm5, %v4670_v7, 128  ;;  %v1255_v47 = vsel %vm7080_vm6, %v4670_v7, 128  ;;  %vm7081_vm7 = vcmp.eq.f32.partialorder %v7070_v16, %v4684_v31 }
 0x16e   : > { %v1256_v21 = vsel %vm7081_vm7, %v4673_v60, 128  ;;  %vm7082_vm8 = vcmp.eq.f32.partialorder %v4600_v55, %v4686_v62  ;;  %vm7083_vm0 = vcmp.eq.f32.partialorder %v7071_v44, %v4684_v31  ;;  %vm7084_vm1 = vcmp.eq.f32.partialorder %v4602_v61, %v4686_v62 }
 0x16f   : > { %v1257_v9 = vsel %vm7082_vm8, %v4673_v60, 128  ;;  %v1258_v14 = vsel %vm7083_vm0, %v4676_v53, 128  ;;  %v1259_v25 = vsel %vm7084_vm1, %v4676_v53, 128  ;;  %vm7085_vm2 = vcmp.eq.f32.partialorder %v7072_v32, %v4684_v31 }
 0x170   : > { %v1260_v16 = vsel %vm7085_vm2, %v4679_v58, 128  ;;  %vm7086_vm3 = vcmp.eq.f32.partialorder %v4613_v39, %v4686_v62  ;;  %vm7087_vm4 = vcmp.eq.f32.partialorder %v4569_v12, %v4684_v31  ;;  %vm7088_vm5 = vcmp.eq.f32.partialorder %v4607_v22, %v4686_v62 }
 0x171   : > { %v1261_v2 = vsel %vm7086_vm3, %v4679_v58, 128  ;;  %v1262_v44 = vsel %vm7087_vm4, %v4682_v30, 128  ;;  %v1263_v49 = vsel %vm7088_vm5, %v4682_v30, 128  ;;  %vm7089_vm6 = vcmp.eq.f32.partialorder %v7073_v56, %v4684_v31 }
 0x172   : > { %v1264_v32 = vsel %vm7089_vm6, %v4689_v5, 128  ;;  %v1265_v39 = vsel %vm1233_vm11, %v4689_v5, 128  ;;  %v1266_v12 = vsel %vm1234_vm12, %v4692_v46, 128  ;;  %v1267_v22 = vsel %vm1235_vm13, %v4692_v46, 128 }
 0x173   : > { %v1268_v56 = vsel %vm1236_vm14, %v4695_v10, 128  ;;  %v1269_v27 = vsel %vm1237_vm15, %v4695_v10, 128  ;;  %v1270_v40 = vsel %vm1238_vm9, %v4698_v59, 128  ;;  %v1271_v52 = vsel %vm1239_vm10, %v4698_v59, 128 }
 0x174   : > { %vm1272_vm11 = vcmp.lt.s32.totalorder %v1240_v38, %v1244_v36  ;;  %vm1274_vm12 = vcmp.lt.s32.totalorder %v1242_v8, %v1246_v18  ;;  %vm1311_vm13 = vcmp.lt.s32.totalorder %v1241_v24, %v1245_v23  ;;  %vm1313_vm7 = vcmp.lt.s32.totalorder %v1243_v20, %v1247_v54 }
 0x175   : > { %v1273_v45 = vsel %vm1272_vm11, %v1240_v38, %v1244_v36  ;;  %v1275_v61 = vsel %vm1274_vm12, %v1242_v8, %v1246_v18  ;;  %v1312_v55 = vsel %vm1311_vm13, %v1241_v24, %v1245_v23  ;;  %v1314_v6 = vsel %vm1313_vm7, %v1243_v20, %v1247_v54 }
 0x176   : > { %vm1276_vm14 = vcmp.lt.s32.totalorder %v1273_v45, %v1248_v48  ;;  %vm1278_vm15 = vcmp.lt.s32.totalorder %v1275_v61, %v1250_v41  ;;  %vm1315_vm8 = vcmp.lt.s32.totalorder %v1312_v55, %v1249_v33  ;;  %vm1317_vm0 = vcmp.lt.s32.totalorder %v1314_v6, %v1251_v0 }
 0x177   : > { %v1277_v4 = vsel %vm1276_vm14, %v1273_v45, %v1248_v48  ;;  %v1279_v31 = vsel %vm1278_vm15, %v1275_v61, %v1250_v41  ;;  %v1316_v28 = vsel %vm1315_vm8, %v1312_v55, %v1249_v33  ;;  %v1318_v37 = vsel %vm1317_vm0, %v1314_v6, %v1251_v0 }
 0x178   : > { %vm1280_vm9 = vcmp.lt.s32.totalorder %v1277_v4, %v1252_v17  ;;  %vm1282_vm1 = vcmp.lt.s32.totalorder %v1279_v31, %v1254_v35  ;;  %vm1319_vm2 = vcmp.lt.s32.totalorder %v1316_v28, %v1253_v34  ;;  %vm1321_vm10 = vcmp.lt.s32.totalorder %v1318_v37, %v1255_v47 }
 0x179   : > { %v1281_v62 = vsel %vm1280_vm9, %v1277_v4, %v1252_v17  ;;  %v1283_v43 = vsel %vm1282_vm1, %v1279_v31, %v1254_v35  ;;  %v1320_v57 = vsel %vm1319_vm2, %v1316_v28, %v1253_v34  ;;  %v1322_v42 = vsel %vm1321_vm10, %v1318_v37, %v1255_v47 }
 0x17a   : > { %vm1284_vm3 = vcmp.lt.s32.totalorder %v1281_v62, %v1256_v21  ;;  %vm1286_vm4 = vcmp.lt.s32.totalorder %v1283_v43, %v1258_v14  ;;  %vm1323_vm5 = vcmp.lt.s32.totalorder %v1320_v57, %v1257_v9  ;;  %vm1325_vm6 = vcmp.lt.s32.totalorder %v1322_v42, %v1259_v25 }
 0x17b   : > { %v1285_v38 = vsel %vm1284_vm3, %v1281_v62, %v1256_v21  ;;  %v1287_v24 = vsel %vm1286_vm4, %v1283_v43, %v1258_v14  ;;  %v1324_v8 = vsel %vm1323_vm5, %v1320_v57, %v1257_v9  ;;  %v1326_v20 = vsel %vm1325_vm6, %v1322_v42, %v1259_v25 }
 0x17c   : > { %vm1288_vm11 = vcmp.lt.s32.totalorder %v1285_v38, %v1260_v16  ;;  %vm1290_vm12 = vcmp.lt.s32.totalorder %v1287_v24, %v1262_v44  ;;  %vm1327_vm13 = vcmp.lt.s32.totalorder %v1324_v8, %v1261_v2  ;;  %vm1329_vm7 = vcmp.lt.s32.totalorder %v1326_v20, %v1263_v49 }
 0x17d   : > { %v1289_v6 = vsel %vm1288_vm11, %v1285_v38, %v1260_v16  ;;  %v1291_v55 = vsel %vm1290_vm12, %v1287_v24, %v1262_v44  ;;  %v1328_v61 = vsel %vm1327_vm13, %v1324_v8, %v1261_v2  ;;  %v1330_v45 = vsel %vm1329_vm7, %v1326_v20, %v1263_v49 }
 0x17e   : > { %vm1292_vm14 = vcmp.lt.s32.totalorder %v1289_v6, %v1264_v32  ;;  %vm1294_vm15 = vcmp.lt.s32.totalorder %v1291_v55, %v1266_v12  ;;  %vm1331_vm8 = vcmp.lt.s32.totalorder %v1328_v61, %v1265_v39  ;;  %vm1333_vm0 = vcmp.lt.s32.totalorder %v1330_v45, %v1267_v22 }
 0x17f   : > { %v1293_v47 = vsel %vm1292_vm14, %v1289_v6, %v1264_v32  ;;  %v1295_v37 = vsel %vm1294_vm15, %v1291_v55, %v1266_v12  ;;  %v1332_v35 = vsel %vm1331_vm8, %v1328_v61, %v1265_v39  ;;  %v1334_v28 = vsel %vm1333_vm0, %v1330_v45, %v1267_v22 }
 0x180   : > { %vm1296_vm9 = vcmp.lt.s32.totalorder %v1293_v47, %v1268_v56  ;;  %vm1298_vm1 = vcmp.lt.s32.totalorder %v1295_v37, %v1270_v40  ;;  %vm1335_vm2 = vcmp.lt.s32.totalorder %v1332_v35, %v1269_v27  ;;  %vm1337_vm10 = vcmp.lt.s32.totalorder %v1334_v28, %v1271_v52 }
 0x181   : > { %v1297_v25 = vsel %vm1296_vm9, %v1293_v47, %v1268_v56  ;;  %v1299_v9 = vsel %vm1298_vm1, %v1295_v37, %v1270_v40  ;;  %v1336_v42 = vsel %vm1335_vm2, %v1332_v35, %v1269_v27  ;;  %v1338_v43 = vsel %vm1337_vm10, %v1334_v28, %v1271_v52 }
 0x182   : > { %vm1300_vm3 = vcmp.lt.s32.totalorder %v1297_v25, %v1299_v9  ;;  %vm1339_vm4 = vcmp.lt.s32.totalorder %v1336_v42, %v1338_v43  ;;  %v6918_v16 = vmov 0.0  }
 0x183   : > { %v1301_v2 = vsel %vm1300_vm3, %v1297_v25, %v1299_v9  ;;  %v1340_v49 = vsel %vm1339_vm4, %v1336_v42, %v1338_v43  ;;  %v7109_v43 = vld [vmem:[#allocation16_spill] sm:$0xff] }
 0x184   : > { %v1302_v4 = vrot.slane %v1301_v2, 4  ;;  %v1341_v31 = vrot.slane %v1340_v49, 4 }
 0x186   : > { %vm1303_vm5 = vcmp.lt.s32.totalorder %v1301_v2, %v1302_v4  ;;  %vm1342_vm6 = vcmp.lt.s32.totalorder %v1340_v49, %v1341_v31 }
 0x187   : > { %v1304_v62 = vsel %vm1303_vm5, %v1301_v2, %v1302_v4  ;;  %v1343_v12 = vsel %vm1342_vm6, %v1340_v49, %v1341_v31  ;;  %v7111_v49 = vld [vmem:[#allocation20_spill] sm:$0xff] }
 0x188   : > { %v1305_v39 = vrot.slane %v1304_v62, 2  ;;  %v1344_v22 = vrot.slane %v1343_v12, 2 }
 0x18a   : > { %vm1345_vm11 = vcmp.lt.s32.totalorder %v1343_v12, %v1344_v22  ;;  %vm1306_vm12 = vcmp.lt.s32.totalorder %v1304_v62, %v1305_v39 }
 0x18b   : > { %v1346_v57 = vsel %vm1345_vm11, %v1343_v12, %v1344_v22  ;;  %v1307_v40 = vsel %vm1306_vm12, %v1304_v62, %v1305_v39 }
 0x18c   : > { %v1347_v21 = vrot.slane %v1346_v57, 1  ;;  %v1308_v52 = vrot.slane %v1307_v40, 1 }
 0x18e   : > { %vm1348_vm13 = vcmp.lt.s32.totalorder %v1346_v57, %v1347_v21  ;;  %vm4897_vm9 = vcmp.lt.s32.totalorder %v1307_v40, %v1308_v52 }
 0x18f   : > { %v1349_v27 = vsel %vm1348_vm13, %v1346_v57, %v1347_v21  ;;  %v4962_v45 = vsel %vm4897_vm9, %v1307_v40, %v1308_v52  ;;  %v7113_v57 = vld [vmem:[#allocation18_spill] sm:$0xff]  ;;  %v7114_v40 = vld [vmem:[#allocation27_spill] sm:$0xff] }
 0x190   : > { %vm1351_vm7 = vcmp.eq.s32.totalorder %v4247_v11, %v1349_v27  ;;  %vm1353_vm14 = vcmp.eq.s32.totalorder %v4652_v19, %v1349_v27  ;;  %vm1379_vm15 = vcmp.eq.s32.totalorder %v4695_v10, %v1349_v27  ;;  %vm1355_vm8 = vcmp.eq.s32.totalorder %v4655_v29, %v1349_v27 }
 0x191   : > { %vm1357_vm0 = vcmp.eq.s32.totalorder %v4658_v50, %v1349_v27  ;;  %vm1359_vm1 = vcmp.eq.s32.totalorder %v4661_v15, %v1349_v27  ;;  %v4903_v44 = vsel %vm1351_vm7, 1.0, %v6918_v16  ;;  %v4906_v32 = vsel %vm1353_vm14, 1.0, %v6918_v16 }
 0x192   : > { %7092 = vst [vmem:[#allocation48_spill] sm:$0xff] %v4903_v44  ;;  %7093 = vst [vmem:[#allocation49_spill] sm:$0xff] %v4906_v32  ;;  %v4909_v56 = vsel %vm1379_vm15, 1.0, %v6918_v16  ;;  %vm1361_vm2 = vcmp.eq.s32.totalorder %v4664_v13, %v1349_v27  ;;  %v4913_v36 = vsel %vm1355_vm8, 1.0, %v6918_v16  ;;  %v4916_v23 = vsel %vm1357_vm0, 1.0, %v6918_v16 }
 0x193   : > { %7094 = vst [vmem:[#allocation50_spill] sm:$0xff] %v4909_v56  ;;  %7095 = vst [vmem:[#allocation51_spill] sm:$0xff] %v4913_v36  ;;  %vm1363_vm10 = vcmp.eq.s32.totalorder %v4667_v63, %v1349_v27  ;;  %vm1365_vm3 = vcmp.eq.s32.totalorder %v4670_v7, %v1349_v27  ;;  %vm1367_vm4 = vcmp.eq.s32.totalorder %v4673_v60, %v1349_v27  ;;  %v4924_v18 = vsel %vm1359_vm1, 1.0, %v6918_v16 }
 0x194   : > { %7096 = vst [vmem:[#allocation52_spill] sm:$0xff] %v4916_v23  ;;  %vm1369_vm5 = vcmp.eq.s32.totalorder %v4676_v53, %v1349_v27  ;;  %vm1371_vm6 = vcmp.eq.s32.totalorder %v4679_v58, %v1349_v27  ;;  %7097 = vst [vmem:[#allocation53_spill] sm:$0xff] %v4924_v18  ;;  %v1447_v54 = vmul.f32 1e+30, %v4903_v44  ;;  %v1449_v48 = vmul.f32 1e+30, %v4906_v32 }
 0x195   : > { %vm1373_vm11 = vcmp.eq.s32.totalorder %v4682_v30, %v1349_v27  ;;  %v4930_v33 = vsel %vm1361_vm2, 1.0, %v6918_v16  ;;  %v1451_v41 = vmul.f32 1e+30, %v4913_v36  ;;  %v1453_v0 = vmul.f32 1e+30, %v4916_v23  ;;  %v7165_v36 = vld [vmem:[#allocation46_spill] sm:$0xff] }
 0x196   : > { %7098 = vst [vmem:[#allocation54_spill] sm:$0xff] %v4930_v33  ;;  %vm1375_vm12 = vcmp.eq.s32.totalorder %v4689_v5, %v1349_v27  ;;  %vm1377_vm13 = vcmp.eq.s32.totalorder %v4692_v46, %v1349_v27  ;;  %vm1381_vm7 = vcmp.eq.s32.totalorder %v4698_v59, %v1349_v27  ;;  %v4938_v17 = vsel %vm1363_vm10, 1.0, %v6918_v16 }
 0x197   : > { %7099 = vst [vmem:[#allocation55_spill] sm:$0xff] %v4938_v17  ;;  %v4941_v34 = vsel %vm1365_vm3, 1.0, %v6918_v16  ;;  %v4944_v38 = vsel %vm1367_vm4, 1.0, %v6918_v16  ;;  %v4947_v24 = vsel %vm1369_vm5, 1.0, %v6918_v16  ;;  %v1455_v8 = vmul.f32 1e+30, %v4924_v18 }
 0x198   : > { %7100 = vst [vmem:[#allocation56_spill] sm:$0xff] %v4941_v34  ;;  %7101 = vst [vmem:[#allocation57_spill] sm:$0xff] %v4944_v38  ;;  %v1457_v20 = vmul.f32 1e+30, %v4930_v33  ;;  %v4952_v6 = vadd.f32 %v1447_v54, %v4447_v1  ;;  %v4955_v55 = vadd.f32 %v1449_v48, %v4409_v3  ;;  %v4958_v61 = vadd.f32 %v1451_v41, %v4423_v26  ;;  %v7115_v54 = vld [vmem:[#allocation38_spill] sm:$0xff] }
 0x199   : > { %7102 = vst [vmem:[#allocation58_spill] sm:$0xff] %v4947_v24  ;;  %v1475_v47 = vmul.f32 1e+30, %v4909_v56  ;;  %v4968_v37 = vsel %vm1371_vm6, 1.0, %v6918_v16  ;;  %v4971_v1 = vadd.f32 %v1453_v0, %v4462_v51  ;;  %v4976_v3 = vsel %vm1373_vm11, 1.0, %v6918_v16  ;;  %v7134_v56 = vld [vmem:[#allocation13_spill] sm:$0xff] }
 0x19a   : > { %7103 = vst [vmem:[#allocation59_spill] sm:$0xff] %v4968_v37  ;;  %7105 = vst [vmem:[#allocation61_spill] sm:$0xff] %v4976_v3  ;;  %v4981_v26 = vsel %vm1375_vm12, 1.0, %v6918_v16  ;;  %v1459_v35 = vmul.f32 1e+30, %v4938_v17  ;;  %v4988_v25 = vsel %vm1377_vm13, 1.0, %v6918_v16  ;;  %v4998_v2 = vadd.f32 %v1455_v8, %v7109_v43 }
 0x19b   : > { %7104 = vst [vmem:[#allocation60_spill] sm:$0xff] %v4971_v1  ;;  %7106 = vst [vmem:[#allocation62_spill] sm:$0xff] %v4981_v26  ;;  %v1461_v28 = vmul.f32 1e+30, %v4941_v34  ;;  %v4993_v51 = vsel %vm1381_vm7, 1.0, %v6918_v16  ;;  %v5001_v4 = vadd.f32 %v1457_v20, %v7111_v49  ;;  %v1531_v31 = vmin.f32 %v4952_v6, %v4958_v61  ;;  %v7116_v8 = vld [vmem:[#allocation28_spill] sm:$0xff] }
 0x19c   : > { %7107 = vst [vmem:[#allocation63_spill] sm:$0xff] %v4988_v25  ;;  %7108 = vst [vmem:[#allocation64_spill] sm:$0xff] %v4993_v51  ;;  %v1463_v9 = vmul.f32 1e+30, %v4944_v38  ;;  %v1465_v42 = vmul.f32 1e+30, %v4947_v24  ;;  %v1532_v62 = vmin.f32 %v4955_v55, %v4971_v1  ;;  %v5011_v21 = vadd.f32 %v1459_v35, %v7113_v57 }
 0x19d   : > { %7110 = vst [vmem:[#allocation16_spill] sm:$0xff] %v4998_v2  ;;  %7112 = vst [vmem:[#allocation20_spill] sm:$0xff] %v5001_v4  ;;  %v1467_v12 = vmul.f32 1e+30, %v4968_v37  ;;  %v1469_v39 = vmul.f32 1e+30, %v4976_v3  ;;  %v5014_v27 = vadd.f32 %v1461_v28, %v7114_v40  ;;  %v1533_v52 = vmin.f32 %v1531_v31, %v4998_v2 }
 0x19e   : > { %v1471_v22 = vmul.f32 1e+30, %v4981_v26  ;;  %v1534_v14 = vmin.f32 %v1532_v62, %v5001_v4  ;;  %v5019_v48 = vadd.f32 %v1475_v47, %v7115_v54  ;;  %v1473_v41 = vmul.f32 1e+30, %v4988_v25  ;;  %v7117_v35 = vld [vmem:[#allocation29_spill] sm:$0xff]  ;;  %v7118_v31 = vld [vmem:[#allocation31_spill] sm:$0xff] }
 0x19f   : > { %v1477_v0 = vmul.f32 1e+30, %v4993_v51  ;;  %vm1350_vm14 = vcmp.eq.s32.totalorder %v4247_v11, %v4962_v45  ;;  %v5026_v20 = vadd.f32 %v1463_v9, %v7116_v8  ;;  %v5029_v28 = vadd.f32 %v1465_v42, %v7117_v35  ;;  %v7119_v62 = vld [vmem:[#allocation30_spill] sm:$0xff]  ;;  %v7120_v9 = vld [vmem:[#allocation33_spill] sm:$0xff]  ;;  %v7136_v26 = vld [vmem:[#allocation11_spill] sm:$0xff] }
 0x1a0   : > { %v1535_v43 = vmin.f32 %v1533_v52, %v5011_v21  ;;  %v1536_v49 = vmin.f32 %v1534_v14, %v5014_v27  ;;  %v5034_v47 = vadd.f32 %v1467_v12, %v7118_v31  ;;  %v5037_v57 = vadd.f32 %v1469_v39, %v7119_v62  ;;  %v7121_v12 = vld [vmem:[#allocation35_spill] sm:$0xff]  ;;  %v7122_v39 = vld [vmem:[#allocation36_spill] sm:$0xff] }
 0x1a1   : > { %vm1352_vm15 = vcmp.eq.s32.totalorder %v4652_v19, %v4962_v45  ;;  %vm1354_vm8 = vcmp.eq.s32.totalorder %v4655_v29, %v4962_v45  ;;  %v5044_v40 = vadd.f32 %v1471_v22, %v7120_v9  ;;  %vm1356_vm0 = vcmp.eq.s32.totalorder %v4658_v50, %v4962_v45  ;;  %v7138_v37 = vld [vmem:[#allocation12_spill] sm:$0xff]  ;;  %v7147_v38 = vld [vmem:[#allocation19_spill] sm:$0xff] }
 0x1a2   : > { %v1537_v42 = vmin.f32 %v1535_v43, %v5026_v20  ;;  %v1538_v52 = vmin.f32 %v1536_v49, %v5029_v28  ;;  %v5051_v14 = vadd.f32 %v1473_v41, %v7121_v12  ;;  %v5054_v54 = vadd.f32 %v1477_v0, %v7122_v39 }
 0x1a3   : > { %vm1358_vm9 = vcmp.eq.s32.totalorder %v4661_v15, %v4962_v45  ;;  %v5062_v22 = vsel %vm1350_vm14, 1.0, %v6918_v16  ;;  %v5067_v43 = vsel %vm1352_vm15, 1.0, %v6918_v16  ;;  %v5070_v41 = vsel %vm1354_vm8, 1.0, %v6918_v16 }
 0x1a4   : > { %7123 = vst [vmem:[#allocation18_spill] sm:$0xff] %v5054_v54  ;;  %7124 = vst [vmem:[#allocation27_spill] sm:$0xff] %v5062_v22  ;;  %v1539_v8 = vmin.f32 %v1537_v42, %v5034_v47  ;;  %v1540_v35 = vmin.f32 %v1538_v52, %v5037_v57  ;;  %vm1360_vm1 = vcmp.eq.s32.totalorder %v4664_v13, %v4962_v45  ;;  %v5079_v0 = vsel %vm1356_vm0, 1.0, %v6918_v16 }
 0x1a5   : > { %7125 = vst [vmem:[#allocation38_spill] sm:$0xff] %v5067_v43  ;;  %7126 = vst [vmem:[#allocation28_spill] sm:$0xff] %v5070_v41  ;;  %vm1362_vm2 = vcmp.eq.s32.totalorder %v4667_v63, %v4962_v45  ;;  %vm1364_vm10 = vcmp.eq.s32.totalorder %v4670_v7, %v4962_v45  ;;  %vm1366_vm3 = vcmp.eq.s32.totalorder %v4673_v60, %v4962_v45  ;;  %v5086_v62 = vsel %vm1358_vm9, 1.0, %v6918_v16 }
 0x1a6   : > { %7127 = vst [vmem:[#allocation29_spill] sm:$0xff] %v5079_v0  ;;  %v1541_v49 = vmin.f32 %v1539_v8, %v5044_v40  ;;  %v1542_v31 = vmin.f32 %v1540_v35, %v5051_v14  ;;  %7128 = vst [vmem:[#allocation31_spill] sm:$0xff] %v5086_v62  ;;  %vm1368_vm4 = vcmp.eq.s32.totalorder %v4676_v53, %v4962_v45  ;;  %v1446_v9 = vmul.f32 1e+30, %v5062_v22 }
 0x1a7   : > { %v1448_v42 = vmul.f32 1e+30, %v5067_v43  ;;  %v1450_v52 = vmul.f32 1e+30, %v5070_v41  ;;  %v5096_v8 = vsel %vm1360_vm1, 1.0, %v6918_v16  ;;  %vm1370_vm5 = vcmp.eq.s32.totalorder %v4679_v58, %v4962_v45 }
 0x1a8   : > { %v1543_v12 = vmin.f32 %v1541_v49, %v5019_v48  ;;  %v1544_v39 = vmin.f32 %v1542_v31, %v5054_v54  ;;  %7129 = vst [vmem:[#allocation30_spill] sm:$0xff] %v5096_v8  ;;  %v1452_v35 = vmul.f32 1e+30, %v5079_v0  ;;  %vm1372_vm6 = vcmp.eq.s32.totalorder %v4682_v30, %v4962_v45 }
 0x1a9   : > { %v5107_v41 = vsel %vm1362_vm2, 1.0, %v6918_v16  ;;  %v5113_v49 = vsel %vm1364_vm10, 1.0, %v6918_v16  ;;  %v5116_v0 = vsel %vm1366_vm3, 1.0, %v6918_v16  ;;  %v5119_v43 = vsel %vm1368_vm4, 1.0, %v6918_v16 }
 0x1aa   : > { %7130 = vst [vmem:[#allocation33_spill] sm:$0xff] %v5107_v41  ;;  %7131 = vst [vmem:[#allocation35_spill] sm:$0xff] %v5113_v49  ;;  %v1545_v31 = vmin.f32 %v1543_v12, %v1544_v39  ;;  %v1454_v22 = vmul.f32 1e+30, %v5086_v62  ;;  %v1456_v51 = vmul.f32 1e+30, %v5096_v8  ;;  %v5124_v25 = vadd.f32 %v1446_v9, %v7134_v56 }
 0x1ab   : > { %7132 = vst [vmem:[#allocation36_spill] sm:$0xff] %v5116_v0  ;;  %7133 = vst [vmem:[#allocation65_spill] sm:$0xff] %v5119_v43  ;;  %v5127_v3 = vadd.f32 %v1448_v42, %v7136_v26  ;;  %v5130_v24 = vadd.f32 %v1450_v52, %v7138_v37  ;;  %vm1378_vm11 = vcmp.eq.s32.totalorder %v4695_v10, %v4962_v45  ;;  %v7140_v39 = vld [vmem:[#allocation14_spill] sm:$0xff]  ;;  %v7142_v8 = vmov 0.0  }
 0x1ac   : > { %7135 = vst [vmem:[#allocation13_spill] sm:$0xff] %v5124_v25  ;;  %v1546_v12 = vrot.slane %v1545_v31, 4  ;;  %vm1374_vm12 = vcmp.eq.s32.totalorder %v4689_v5, %v4962_v45  ;;  %v5137_v16 = vadd.f32 %v1452_v35, %v7140_v39  ;;  %v5143_v56 = vsel %vm1370_vm5, 1.0, %v7142_v8  ;;  %v7145_v39 = vld [vmem:[#allocation15_spill] sm:$0xff] }
 0x1ad   : > { %7137 = vst [vmem:[#allocation11_spill] sm:$0xff] %v5127_v3  ;;  %7139 = vst [vmem:[#allocation12_spill] sm:$0xff] %v5130_v24  ;;  %v5149_v37 = vsel %vm1372_vm6, 1.0, %v7142_v8  ;;  %v1458_v26 = vmul.f32 1e+30, %v5107_v41  ;;  %vm1376_vm13 = vcmp.eq.s32.totalorder %v4692_v46, %v4962_v45  ;;  %v5158_v62 = vadd.f32 %v1454_v22, %v7145_v39  ;;  %v7151_v39 = vld [vmem:[#allocation22_spill] sm:$0xff] }
 0x1ae   : > { %7141 = vst [vmem:[#allocation14_spill] sm:$0xff] %v5137_v16  ;;  %7143 = vst [vmem:[#allocation66_spill] sm:$0xff] %v5143_v56  ;;  %v1460_v9 = vmul.f32 1e+30, %v5113_v49  ;;  %v1547_v42 = vmin.f32 %v1545_v31, %v1546_v12  ;;  %v1462_v52 = vmul.f32 1e+30, %v5116_v0  ;;  %v5161_v34 = vadd.f32 %v1456_v51, %v7147_v38 }
 0x1af   : > { %7144 = vst [vmem:[#allocation67_spill] sm:$0xff] %v5149_v37  ;;  %v1464_v35 = vmul.f32 1e+30, %v5119_v43  ;;  %7146 = vst [vmem:[#allocation15_spill] sm:$0xff] %v5158_v62  ;;  %v1510_v17 = vmin.f32 %v5124_v25, %v5130_v24  ;;  %v1511_v49 = vmin.f32 %v5127_v3, %v5137_v16  ;;  %vm1380_vm7 = vcmp.eq.s32.totalorder %v4698_v59, %v4962_v45  ;;  %v7149_v0 = vld [vmem:[#allocation17_spill] sm:$0xff] }
 0x1b0   : > { %7148 = vst [vmem:[#allocation19_spill] sm:$0xff] %v5161_v34  ;;  %v1548_v31 = vrot.slane %v1547_v42, 2  ;;  %v1466_v12 = vmul.f32 1e+30, %v5143_v56  ;;  %v1468_v43 = vmul.f32 1e+30, %v5149_v37  ;;  %v5172_v22 = vadd.f32 %v1458_v26, %v7149_v0 }
 0x1b1   : > { %v5175_v38 = vadd.f32 %v1460_v9, %v7151_v39  ;;  %v1512_v51 = vmin.f32 %v1510_v17, %v5158_v62  ;;  %v1513_v41 = vmin.f32 %v1511_v49, %v5161_v34  ;;  %v5183_v33 = vsel %vm1378_vm11, 1.0, %v7142_v8  ;;  %v7154_v56 = vld [vmem:[#allocation21_spill] sm:$0xff]  ;;  %v7156_v37 = vld [vmem:[#allocation24_spill] sm:$0xff] }
 0x1b2   : > { %7150 = vst [vmem:[#allocation17_spill] sm:$0xff] %v5172_v22  ;;  %7153 = vst [vmem:[#allocation68_spill] sm:$0xff] %v5183_v33  ;;  %v1549_v18 = vmin.f32 %v1547_v42, %v1548_v31  ;;  %v5186_v23 = vadd.f32 %v1462_v52, %v7154_v56  ;;  %v5189_v0 = vadd.f32 %v1464_v35, %v7156_v37  ;;  %v5197_v49 = vsel %vm1374_vm12, 1.0, %v7142_v8  ;;  %v7163_v52 = vld [vmem:[#allocation26_spill] sm:$0xff] }
 0x1b3   : > { %7152 = vst [vmem:[#allocation22_spill] sm:$0xff] %v5175_v38  ;;  %v1514_v26 = vmin.f32 %v1512_v51, %v5172_v22  ;;  %v1515_v9 = vmin.f32 %v1513_v41, %v5175_v38  ;;  %7158 = vst [vmem:[#allocation69_spill] sm:$0xff] %v5197_v49  ;;  %v5203_v56 = vsel %vm1376_vm13, 1.0, %v7142_v8  ;;  %v5209_v37 = vsel %vm1380_vm7, 1.0, %v7142_v8  ;;  %v7161_v41 = vld [vmem:[#allocation23_spill] sm:$0xff] }
 0x1b4   : > { %7155 = vst [vmem:[#allocation21_spill] sm:$0xff] %v5186_v23  ;;  %7157 = vst [vmem:[#allocation24_spill] sm:$0xff] %v5189_v0  ;;  %v1550_v17 = vrot.slane %v1549_v18, 1  ;;  %v5212_v42 = vadd.f32 %v1466_v12, %v7161_v41  ;;  %v5215_v35 = vadd.f32 %v1468_v43, %v7163_v52  ;;  %v2135_v32 = vadd.f32 1e-08, %v7165_v36  ;;  %v7166_v36 = vld [vmem:[#allocation37_spill] sm:$0xff] }
 0x1b5   : > { %7159 = vst [vmem:[#allocation70_spill] sm:$0xff] %v5203_v56  ;;  %7160 = vst [vmem:[#allocation71_spill] sm:$0xff] %v5209_v37  ;;  %v1516_v31 = vmin.f32 %v1514_v26, %v5186_v23  ;;  %v1517_v39 = vmin.f32 %v1515_v9, %v5189_v0  ;;  %v1474_v44 = vmul.f32 1e+30, %v5183_v33  ;;  %v1470_v45 = vmul.f32 1e+30, %v5197_v49 }
 0x1b6   : > { %7162 = vst [vmem:[#allocation23_spill] sm:$0xff] %v5212_v42  ;;  %7164 = vst [vmem:[#allocation26_spill] sm:$0xff] %v5215_v35  ;;  %v5219_v51 = vmin.f32 %v1549_v18, %v1550_v17  ;;  %v1472_v43 = vmul.f32 1e+30, %v5203_v56  ;;  %v1476_v18 = vmul.f32 1e+30, %v5209_v37  ;;  %3954 = vrcp.f32 %v2135_v32 }
 0x1b7   : > { %v1518_v8 = vmin.f32 %v1516_v31, %v5212_v42  ;;  %v1519_v12 = vmin.f32 %v1517_v39, %v5215_v35  ;;  %v5243_v26 = vadd.f32 %v1474_v44, %v7166_v36  ;;  %v7167_v9 = vld [vmem:[#allocation25_spill] sm:$0xff]  ;;  %v7169_v41 = vld [vmem:[#allocation34_spill] sm:$0xff]  ;;  %v7170_v31 = vld [vmem:[#allocation32_spill] sm:$0xff] }
 0x1b8   : > { %vm1555_vm14 = vcmp.eq.f32.partialorder %v4955_v55, %v5219_v51  ;;  %vm1557_vm15 = vcmp.eq.f32.partialorder %v4958_v61, %v5219_v51  ;;  %vm1561_vm8 = vcmp.eq.f32.partialorder %v4998_v2, %v5219_v51  ;;  %vm1563_vm0 = vcmp.eq.f32.partialorder %v5001_v4, %v5219_v51 }
 0x1b9   : > { %vm1565_vm9 = vcmp.eq.f32.partialorder %v5011_v21, %v5219_v51  ;;  %vm1553_vm1 = vcmp.eq.f32.partialorder %v4952_v6, %v5219_v51  ;;  %vm1559_vm2 = vcmp.eq.f32.partialorder %v4971_v1, %v5219_v51  ;;  %v5246_v17 = vadd.f32 %v1470_v45, %v7167_v9 }
 0x1ba   : > { %v5249_v52 = vadd.f32 %v1472_v43, %v7169_v41  ;;  %v5252_v39 = vadd.f32 %v1476_v18, %v7170_v31  ;;  %v1585_v37 = vsel %vm1553_vm1, %v4247_v11, 128  ;;  %v1587_v33 = vsel %vm1555_vm14, %v4652_v19, 128 }
 0x1bb   : > { %7168 = vst [vmem:[#allocation46_spill] sm:$0xff] %v5246_v17  ;;  %v1589_v56 = vsel %vm1557_vm15, %v4655_v29, 128  ;;  %v1591_v32 = vsel %vm1559_vm2, %v4658_v50, 128  ;;  %vm1567_vm10 = vcmp.eq.f32.partialorder %v5014_v27, %v5219_v51  ;;  %vm1569_vm3 = vcmp.eq.f32.partialorder %v5026_v20, %v5219_v51 }
 0x1bc   : > { %vm1571_vm4 = vcmp.eq.f32.partialorder %v5029_v28, %v5219_v51  ;;  %vm1573_vm5 = vcmp.eq.f32.partialorder %v5034_v47, %v5219_v51  ;;  %vm1575_vm6 = vcmp.eq.f32.partialorder %v5037_v57, %v5219_v51  ;;  %vm1577_vm11 = vcmp.eq.f32.partialorder %v5044_v40, %v5219_v51 }
 0x1bd   : > { %v1593_v44 = vsel %vm1561_vm8, %v4661_v15, 128  ;;  %v1595_v45 = vsel %vm1563_vm0, %v4664_v13, 128  ;;  %vm1655_vm12 = vcmp.lt.s32.totalorder %v1585_v37, %v1589_v56  ;;  %vm1657_vm13 = vcmp.lt.s32.totalorder %v1587_v33, %v1591_v32 }
 0x1be   : > { %v2139_v43 = vadd.f32 1e-08, %v5219_v51  ;;  %v1520_v18 = vmin.f32 %v1518_v8, %v5246_v17  ;;  %v1597_v36 = vsel %vm1565_vm9, %v4667_v63, 128  ;;  %v1656_v9 = vsel %vm1655_vm12, %v1585_v37, %v1589_v56 }
 0x1bf   : > { %v1658_v41 = vsel %vm1657_vm13, %v1587_v33, %v1591_v32  ;;  %v1521_v31 = vmin.f32 %v1519_v12, %v5249_v52  ;;  %vm1659_vm7 = vcmp.lt.s32.totalorder %v1656_v9, %v1593_v44  ;;  %v1599_v4 = vsel %vm1567_vm10, %v4670_v7, 128 }
 0x1c0   : > { %vm1661_vm14 = vcmp.lt.s32.totalorder %v1658_v41, %v1595_v45  ;;  %3956 = vrcp.f32 %v2139_v43  ;;  %v1522_v49 = vmin.f32 %v1520_v18, %v5243_v26  ;;  %v1660_v8 = vsel %vm1659_vm7, %v1656_v9, %v1593_v44  ;;  %v5297_v56 = vpop.eup %3954 }
 0x1c1   : > { %v1662_v2 = vsel %vm1661_vm14, %v1658_v41, %v1595_v45  ;;  %v1523_v1 = vmin.f32 %v1521_v31, %v5252_v39  ;;  %vm1579_vm15 = vcmp.eq.f32.partialorder %v5051_v14, %v5219_v51  ;;  %v1601_v33 = vsel %vm1569_vm3, %v4673_v60, 128  ;;  %7171 = vst [vmem:[#allocation37_spill] sm:$0xff] %v5297_v56 }
 0x1c2   : > { %vm1663_vm8 = vcmp.lt.s32.totalorder %v1660_v8, %v1597_v36  ;;  %vm1665_vm0 = vcmp.lt.s32.totalorder %v1662_v2, %v1599_v4  ;;  %v1603_v37 = vsel %vm1571_vm4, %v4676_v53, 128  ;;  %vm1581_vm9 = vcmp.eq.f32.partialorder %v5019_v48, %v5219_v51 }
 0x1c3   : > { %v1664_v12 = vsel %vm1663_vm8, %v1660_v8, %v1597_v36  ;;  %v1666_v32 = vsel %vm1665_vm0, %v1662_v2, %v1599_v4  ;;  %v1524_v44 = vmin.f32 %v1522_v49, %v1523_v1  ;;  %v1605_v45 = vsel %vm1573_vm5, %v4679_v58, 128 }
 0x1c4   : > { %vm1667_vm1 = vcmp.lt.s32.totalorder %v1664_v12, %v1601_v33  ;;  %vm1669_vm2 = vcmp.lt.s32.totalorder %v1666_v32, %v1603_v37  ;;  %v1607_v43 = vsel %vm1575_vm6, %v4682_v30, 128  ;;  %vm1583_vm10 = vcmp.eq.f32.partialorder %v5054_v54, %v5219_v51 }
 0x1c5   : > { %v1668_v18 = vsel %vm1667_vm1, %v1664_v12, %v1601_v33  ;;  %v1670_v9 = vsel %vm1669_vm2, %v1666_v32, %v1603_v37  ;;  %v1525_v36 = vrot.slane %v1524_v44, 4  ;;  %v1609_v1 = vsel %vm1577_vm11, %v4689_v5, 128 }
 0x1c6   : > { %vm1671_vm3 = vcmp.lt.s32.totalorder %v1668_v18, %v1605_v45  ;;  %vm1673_vm4 = vcmp.lt.s32.totalorder %v1670_v9, %v1607_v43  ;;  %v1611_v2 = vsel %vm1579_vm15, %v4692_v46, 128  ;;  %v1613_v31 = vsel %vm1581_vm9, %v4695_v10, 128 }
 0x1c7   : > { %v1672_v4 = vsel %vm1671_vm3, %v1668_v18, %v1605_v45  ;;  %v1674_v49 = vsel %vm1673_vm4, %v1670_v9, %v1607_v43  ;;  %v1526_v41 = vmin.f32 %v1524_v44, %v1525_v36  ;;  %v1615_v8 = vsel %vm1583_vm10, %v4698_v59, 128 }
 0x1c8   : > { %vm1675_vm5 = vcmp.lt.s32.totalorder %v1672_v4, %v1609_v1  ;;  %vm1677_vm6 = vcmp.lt.s32.totalorder %v1674_v49, %v1611_v2 }
 0x1c9   : > { %v1676_v33 = vsel %vm1675_vm5, %v1672_v4, %v1609_v1  ;;  %v1678_v37 = vsel %vm1677_vm6, %v1674_v49, %v1611_v2  ;;  %v1527_v12 = vrot.slane %v1526_v41, 2  ;;  %v7174_v49 = vld [vmem:[#allocation45_spill] sm:$0xff] }
 0x1ca   : > { %v5328_v32 = vpop.eup %3956  ;;  %vm1679_vm11 = vcmp.lt.s32.totalorder %v1676_v33, %v1613_v31  ;;  %vm1681_vm12 = vcmp.lt.s32.totalorder %v1678_v37, %v1615_v8 }
 0x1cb   : > { %7172 = vst [vmem:[#allocation25_spill] sm:$0xff] %v5328_v32  ;;  %v1680_v54 = vsel %vm1679_vm11, %v1676_v33, %v1613_v31  ;;  %v1682_v45 = vsel %vm1681_vm12, %v1678_v37, %v1615_v8  ;;  %v5332_v44 = vadd.f32 %v5328_v32, %v5297_v56  ;;  %v1528_v43 = vmin.f32 %v1526_v41, %v1527_v12 }
 0x1cc   : > { %vm1683_vm13 = vcmp.lt.s32.totalorder %v1680_v54, %v1682_v45  ;;  %v5369_v41 = vadd.f32 1e-08, %v7174_v49  ;;  %v7177_v49 = vmov 0.0  }
 0x1cd   : > { %7173 = vst [vmem:[#allocation34_spill] sm:$0xff] %v5332_v44  ;;  %v1684_v51 = vsel %vm1683_vm13, %v1680_v54, %v1682_v45  ;;  %v1529_v18 = vrot.slane %v1528_v43, 1 }
 0x1ce   : > { %v1685_v9 = vrot.slane %v1684_v51, 4  ;;  %3958 = vrcp.f32 %v5369_v41 }
 0x1cf   : > { %v5334_v36 = vmin.f32 %v1528_v43, %v1529_v18 }
 0x1d0   : > { %vm1686_vm7 = vcmp.lt.s32.totalorder %v1684_v51, %v1685_v9 }
 0x1d1   : > { %v1687_v1 = vsel %vm1686_vm7, %v1684_v51, %v1685_v9  ;;  %vm1552_vm14 = vcmp.eq.f32.partialorder %v5124_v25, %v5334_v36  ;;  %vm1554_vm15 = vcmp.eq.f32.partialorder %v5127_v3, %v5334_v36  ;;  %vm1556_vm8 = vcmp.eq.f32.partialorder %v5130_v24, %v5334_v36 }
 0x1d2   : > { %v1688_v2 = vrot.slane %v1687_v1, 2  ;;  %vm1558_vm0 = vcmp.eq.f32.partialorder %v5137_v16, %v5334_v36  ;;  %vm1560_vm9 = vcmp.eq.f32.partialorder %v5158_v62, %v5334_v36  ;;  %vm1562_vm1 = vcmp.eq.f32.partialorder %v5161_v34, %v5334_v36 }
 0x1d3   : > { %vm1564_vm2 = vcmp.eq.f32.partialorder %v5172_v22, %v5334_v36  ;;  %vm1566_vm10 = vcmp.eq.f32.partialorder %v5175_v38, %v5334_v36  ;;  %vm1568_vm3 = vcmp.eq.f32.partialorder %v5186_v23, %v5334_v36  ;;  %vm1574_vm11 = vcmp.eq.f32.partialorder %v5215_v35, %v5334_v36 }
 0x1d4   : > { %vm1689_vm5 = vcmp.lt.s32.totalorder %v1687_v1, %v1688_v2  ;;  %vm1576_vm12 = vcmp.eq.f32.partialorder %v5246_v17, %v5334_v36  ;;  %v1584_v31 = vsel %vm1552_vm14, %v4247_v11, 128  ;;  %v5379_v8 = vsel %vm1554_vm15, %v4652_v19, 128 }
 0x1d5   : > { %v1690_v54 = vsel %vm1689_vm5, %v1687_v1, %v1688_v2  ;;  %v1588_v33 = vsel %vm1556_vm8, %v4655_v29, 128  ;;  %v5389_v12 = vsel %vm1558_vm0, %v4658_v50, 128  ;;  %v5395_v45 = vsel %vm1560_vm9, %v4661_v15, 128 }
 0x1d6   : > { %v1691_v4 = vrot.slane %v1690_v54, 1  ;;  %v5401_v43 = vsel %vm1562_vm1, %v4664_v13, 128  ;;  %v5407_v51 = vsel %vm1564_vm2, %v4667_v63, 128  ;;  %v5413_v18 = vsel %vm1566_vm10, %v4670_v7, 128 }
 0x1d7   : > { %v5419_v9 = vsel %vm1568_vm3, %v4673_v60, 128  ;;  %vm7175_vm14 = vcmp.eq.f32.partialorder %v5189_v0, %v5334_v36  ;;  %vm7176_vm8 = vcmp.eq.f32.partialorder %v5212_v42, %v5334_v36 }
 0x1d8   : > { %vm1692_vm6 = vcmp.lt.s32.totalorder %v1690_v54, %v1691_v4  ;;  %v5425_v1 = vsel %vm7175_vm14, %v4676_v53, 128  ;;  %v5432_v2 = vsel %vm7176_vm8, %v4679_v58, 128 }
 0x1d9   : > { %v1693_v37 = vsel %vm1692_vm6, %v1690_v54, %v1691_v4  ;;  %v5438_v54 = vsel %vm1574_vm11, %v4682_v30, 128  ;;  %v5444_v4 = vsel %vm1576_vm12, %v4689_v5, 128 }
 0x1da   : > { %vm1695_vm15 = vcmp.eq.s32.totalorder %v4247_v11, %v1693_v37  ;;  %vm1697_vm0 = vcmp.eq.s32.totalorder %v4652_v19, %v1693_v37  ;;  %vm1699_vm9 = vcmp.eq.s32.totalorder %v4655_v29, %v1693_v37  ;;  %vm1701_vm1 = vcmp.eq.s32.totalorder %v4658_v50, %v1693_v37 }
 0x1db   : > { %vm1703_vm2 = vcmp.eq.s32.totalorder %v4661_v15, %v1693_v37  ;;  %vm1705_vm10 = vcmp.eq.s32.totalorder %v4664_v13, %v1693_v37  ;;  %vm1707_vm3 = vcmp.eq.s32.totalorder %v4667_v63, %v1693_v37  ;;  %vm1709_vm5 = vcmp.eq.s32.totalorder %v4670_v7, %v1693_v37 }
 0x1dc   : > { %vm1711_vm6 = vcmp.eq.s32.totalorder %v4673_v60, %v1693_v37  ;;  %vm1713_vm11 = vcmp.eq.s32.totalorder %v4676_v53, %v1693_v37  ;;  %vm1715_vm12 = vcmp.eq.s32.totalorder %v4679_v58, %v1693_v37  ;;  %vm1717_vm14 = vcmp.eq.s32.totalorder %v4682_v30, %v1693_v37 }
 0x1dd   : > { %vm1719_vm8 = vcmp.eq.s32.totalorder %v4689_v5, %v1693_v37  ;;  %vm1721_vm4 = vcmp.eq.s32.totalorder %v4692_v46, %v1693_v37  ;;  %v5462_v32 = vsel %vm1695_vm15, 1.0, %v7177_v49  ;;  %v5465_v56 = vsel %vm1697_vm0, 1.0, %v7177_v49 }
 0x1de   : > { %7178 = vst [vmem:[#allocation32_spill] sm:$0xff] %v5462_v32  ;;  %7179 = vst [vmem:[#allocation45_spill] sm:$0xff] %v5465_v56  ;;  %v5468_v17 = vsel %vm1699_vm9, 1.0, %v7177_v49  ;;  %vm1723_vm7 = vcmp.eq.s32.totalorder %v4695_v10, %v1693_v37  ;;  %vm1725_vm13 = vcmp.eq.s32.totalorder %v4698_v59, %v1693_v37  ;;  %v5475_v35 = vsel %vm1701_vm1, 1.0, %v7177_v49 }
 0x1df   : > { %7180 = vst [vmem:[#allocation72_spill] sm:$0xff] %v5468_v17  ;;  %7181 = vst [vmem:[#allocation73_spill] sm:$0xff] %v5475_v35  ;;  %v5480_v42 = vsel %vm1703_vm2, 1.0, %v7177_v49  ;;  %v5485_v0 = vsel %vm1705_vm10, 1.0, %v7177_v49  ;;  %v5490_v23 = vsel %vm1707_vm3, 1.0, %v7177_v49  ;;  %v5495_v38 = vsel %vm1709_vm5, 1.0, %v7177_v49 }
 0x1e0   : > { %7182 = vst [vmem:[#allocation74_spill] sm:$0xff] %v5480_v42  ;;  %7183 = vst [vmem:[#allocation75_spill] sm:$0xff] %v5485_v0  ;;  %v5500_v22 = vsel %vm1711_vm6, 1.0, %v7177_v49  ;;  %v1791_v34 = vmul.f32 1e+30, %v5462_v32  ;;  %vm1616_vm15 = vcmp.lt.s32.totalorder %v1584_v31, %v1588_v33  ;;  %v5508_v24 = vsel %vm1713_vm11, 1.0, %v7177_v49 }
 0x1e1   : > { %7184 = vst [vmem:[#allocation76_spill] sm:$0xff] %v5495_v38  ;;  %v1793_v62 = vmul.f32 1e+30, %v5465_v56  ;;  %v1795_v16 = vmul.f32 1e+30, %v5468_v17  ;;  %7185 = vst [vmem:[#allocation77_spill] sm:$0xff] %v5508_v24  ;;  %v1617_v44 = vsel %vm1616_vm15, %v1584_v31, %v1588_v33  ;;  %vm7194_vm3 = vcmp.eq.f32.partialorder %v5249_v52, %v5334_v36 }
 0x1e2   : > { %v5513_v3 = vsel %vm1715_vm12, 1.0, %v7177_v49  ;;  %v1797_v25 = vmul.f32 1e+30, %v5475_v35  ;;  %v5519_v56 = vsel %vm1717_vm14, 1.0, %v7177_v49  ;;  %v5524_v17 = vsel %vm1719_vm8, 1.0, %v7177_v49 }
 0x1e3   : > { %7186 = vst [vmem:[#allocation78_spill] sm:$0xff] %v5513_v3  ;;  %v5529_v32 = vsel %vm1721_vm4, 1.0, %v7177_v49  ;;  %v5534_v35 = vsel %vm1723_vm7, 1.0, %v7177_v49  ;;  %v5539_v31 = vsel %vm1725_vm13, 1.0, %v7177_v49  ;;  %v1799_v33 = vmul.f32 1e+30, %v5480_v42 }
 0x1e4   : > { %7187 = vst [vmem:[#allocation79_spill] sm:$0xff] %v5529_v32  ;;  %7188 = vst [vmem:[#allocation80_spill] sm:$0xff] %v5539_v31  ;;  %v1801_v5 = vmul.f32 1e+30, %v5485_v0  ;;  %v5544_v30 = vadd.f32 %v1793_v62, %v4955_v55  ;;  %v1803_v58 = vmul.f32 1e+30, %v5490_v23  ;;  %v5549_v60 = vadd.f32 %v1791_v34, %v4952_v6 }
 0x1e5   : > { %v1805_v53 = vmul.f32 1e+30, %v5495_v38  ;;  %v5552_v7 = vadd.f32 %v1795_v16, %v4958_v61  ;;  %v1807_v37 = vmul.f32 1e+30, %v5500_v22  ;;  %v1809_v49 = vmul.f32 1e+30, %v5508_v24 }
 0x1e6   : > { %v1811_v42 = vmul.f32 1e+30, %v5513_v3  ;;  %v7189_v0 = vld [vmem:[#allocation60_spill] sm:$0xff]  ;;  %v1813_v55 = vmul.f32 1e+30, %v5519_v56  ;;  %vm1618_vm4 = vcmp.lt.s32.totalorder %v5379_v8, %v5389_v12  ;;  %vm1620_vm13 = vcmp.lt.s32.totalorder %v1617_v44, %v5395_v45 }
 0x1e7   : > { %v5558_v63 = vadd.f32 %v1797_v25, %v7189_v0  ;;  %v1815_v62 = vmul.f32 1e+30, %v5524_v17  ;;  %v1817_v38 = vmul.f32 1e+30, %v5529_v32  ;;  %v1819_v16 = vmul.f32 1e+30, %v5534_v35 }
 0x1e8   : > { %v1821_v34 = vmul.f32 1e+30, %v5539_v31  ;;  %v7190_v6 = vld [vmem:[#allocation16_spill] sm:$0xff]  ;;  %v5573_v25 = vadd.f32 %v1803_v58, %v5011_v21  ;;  %v5576_v0 = vadd.f32 %v1805_v53, %v5014_v27  ;;  %v1875_v32 = vmin.f32 %v5549_v60, %v5552_v7 }
 0x1e9   : > { %v5567_v61 = vadd.f32 %v1799_v33, %v7190_v6  ;;  %v7191_v24 = vld [vmem:[#allocation20_spill] sm:$0xff]  ;;  %v1876_v41 = vmin.f32 %v5544_v30, %v5558_v63  ;;  %v5583_v31 = vadd.f32 %v1807_v37, %v5026_v20  ;;  %v5586_v33 = vadd.f32 %v1809_v49, %v5029_v28 }
 0x1ea   : > { %v5570_v3 = vadd.f32 %v1801_v5, %v7191_v24  ;;  %v5589_v5 = vadd.f32 %v1811_v42, %v5034_v47  ;;  %v1619_v24 = vsel %vm1618_vm4, %v5379_v8, %v5389_v12  ;;  %v5599_v21 = vadd.f32 %v1813_v55, %v5037_v57  ;;  %v7193_v55 = vld [vmem:[#allocation18_spill] sm:$0xff] }
 0x1eb   : > { %v1877_v53 = vmin.f32 %v1875_v32, %v5567_v61  ;;  %v1621_v27 = vsel %vm1620_vm13, %v1617_v44, %v5395_v45  ;;  %vm1622_vm7 = vcmp.lt.s32.totalorder %v1619_v24, %v5401_v43  ;;  %v2138_v20 = vadd.f32 1e-08, %v5334_v36 }
 0x1ec   : > { %v1878_v58 = vmin.f32 %v1876_v41, %v5570_v3  ;;  %v1623_v42 = vsel %vm1622_vm7, %v1619_v24, %v5401_v43  ;;  %vm1624_vm0 = vcmp.lt.s32.totalorder %v1621_v27, %v5407_v51  ;;  %v5609_v32 = vadd.f32 %v1815_v62, %v5044_v40 }
 0x1ed   : > { %v1879_v28 = vmin.f32 %v1877_v53, %v5573_v25  ;;  %v1625_v57 = vsel %vm1624_vm0, %v1621_v27, %v5407_v51  ;;  %vm1626_vm9 = vcmp.lt.s32.totalorder %v1623_v42, %v5413_v18  ;;  %3960 = vrcp.f32 %v2138_v20  ;;  %v5625_v51 = vpop.eup %3958 }
 0x1ee   : > { %v1880_v47 = vmin.f32 %v1878_v58, %v5576_v0  ;;  %v1627_v12 = vsel %vm1626_vm9, %v1623_v42, %v5413_v18  ;;  %vm1628_vm1 = vcmp.lt.s32.totalorder %v1625_v57, %v5419_v9  ;;  %v5618_v45 = vadd.f32 %v1817_v38, %v5051_v14  ;;  %7192 = vst [vmem:[#allocation60_spill] sm:$0xff] %v5625_v51 }
 0x1ef   : > { %v1881_v44 = vmin.f32 %v1879_v28, %v5583_v31  ;;  %v5621_v43 = vadd.f32 %v1819_v16, %v5019_v48  ;;  %v1629_v40 = vsel %vm1628_vm1, %v1625_v57, %v5419_v9  ;;  %vm1630_vm2 = vcmp.lt.s32.totalorder %v1627_v12, %v5425_v1 }
 0x1f0   : > { %v1882_v8 = vmin.f32 %v1880_v47, %v5586_v33  ;;  %v1631_v18 = vsel %vm1630_vm2, %v1627_v12, %v5425_v1  ;;  %vm1632_vm10 = vcmp.lt.s32.totalorder %v1629_v40, %v5432_v2  ;;  %v5632_v14 = vadd.f32 %v1821_v34, %v7193_v55 }
 0x1f1   : > { %v1883_v49 = vmin.f32 %v1881_v44, %v5589_v5  ;;  %v1610_v48 = vsel %vm7194_vm3, %v4692_v46, 128  ;;  %v1633_v38 = vsel %vm1632_vm10, %v1629_v40, %v5432_v2  ;;  %vm1634_vm5 = vcmp.lt.s32.totalorder %v1631_v18, %v5438_v54 }
 0x1f2   : > { %v1884_v37 = vmin.f32 %v1882_v8, %v5599_v21  ;;  %v1635_v1 = vsel %vm1634_vm5, %v1631_v18, %v5438_v54  ;;  %vm1636_vm6 = vcmp.lt.s32.totalorder %v1633_v38, %v5444_v4  ;;  %vm7195_vm11 = vcmp.eq.f32.partialorder %v5243_v26, %v5334_v36 }
 0x1f3   : > { %v1885_v9 = vmin.f32 %v1883_v49, %v5609_v32  ;;  %v1612_v16 = vsel %vm7195_vm11, %v4695_v10, 128  ;;  %vm7196_vm12 = vcmp.eq.f32.partialorder %v5252_v39, %v5334_v36  ;;  %v1637_v34 = vsel %vm1636_vm6, %v1633_v38, %v5444_v4 }
 0x1f4   : > { %v1886_v62 = vmin.f32 %v1884_v37, %v5618_v45  ;;  %v1614_v2 = vsel %vm7196_vm12, %v4698_v59, 128  ;;  %vm1638_vm14 = vcmp.lt.s32.totalorder %v1635_v1, %v1610_v48  ;;  %vm1640_vm8 = vcmp.lt.s32.totalorder %v1637_v34, %v1612_v16 }
 0x1f5   : > { %v1887_v6 = vmin.f32 %v1885_v9, %v5621_v43  ;;  %v1639_v54 = vsel %vm1638_vm14, %v1635_v1, %v1610_v48  ;;  %v1641_v53 = vsel %vm1640_vm8, %v1637_v34, %v1612_v16  ;;  %v7201_v1 = vld [vmem:[#allocation39_spill] sm:$0xff]  ;;  %v7202_v16 = vld [vmem:[#allocation40_spill] sm:$0xff]  ;;  %v7204_v34 = vld [vmem:[#allocation42_spill] sm:$0xff] }
 0x1f6   : > { %v1888_v41 = vmin.f32 %v1886_v62, %v5632_v14  ;;  %vm1642_vm15 = vcmp.lt.s32.totalorder %v1639_v54, %v1614_v2 }
 0x1f7   : > { %v1643_v24 = vsel %vm1642_vm15, %v1639_v54, %v1614_v2  ;;  %v5655_v27 = vpop.eup %3960  ;;  %v7203_v2 = vld [vmem:[#allocation41_spill] sm:$0xff]  ;;  %v7207_v54 = vld [vmem:[#allocation47_spill] sm:$0xff] }
 0x1f8   : > { %v1889_v58 = vmin.f32 %v1887_v6, %v1888_v41  ;;  %7197 = vst [vmem:[#allocation16_spill] sm:$0xff] %v5655_v27  ;;  %vm1644_vm4 = vcmp.lt.s32.totalorder %v1641_v53, %v1643_v24  ;;  %v5659_v36 = vadd.f32 %v5655_v27, %v5625_v51  ;;  %v7205_v6 = vld [vmem:[#allocation43_spill] sm:$0xff]  ;;  %v7206_v41 = vld [vmem:[#allocation44_spill] sm:$0xff] }
 0x1f9   : > { %v1645_v28 = vsel %vm1644_vm4, %v1641_v53, %v1643_v24 }
 0x1fa   : > { %v1890_v20 = vrot.slane %v1889_v58, 4  ;;  %v1646_v4 = vrot.slane %v1645_v28, 4 }
 0x1fc   : > { %v1891_v47 = vmin.f32 %v1889_v58, %v1890_v20  ;;  %vm1647_vm13 = vcmp.lt.s32.totalorder %v1645_v28, %v1646_v4 }
 0x1fd   : > { %v1648_v57 = vsel %vm1647_vm13, %v1645_v28, %v1646_v4 }
 0x1fe   : > { %v1892_v42 = vrot.slane %v1891_v47, 2  ;;  %v1649_v44 = vrot.slane %v1648_v57, 2 }
 0x200   : > { %v1893_v8 = vmin.f32 %v1891_v47, %v1892_v42  ;;  %vm1650_vm7 = vcmp.lt.s32.totalorder %v1648_v57, %v1649_v44  ;;  %v7209_v42 = vmov 0.0  }
 0x201   : > { %v1651_v40 = vsel %vm1650_vm7, %v1648_v57, %v1649_v44 }
 0x202   : > { %v1894_v12 = vrot.slane %v1893_v8, 1  ;;  %v1652_v49 = vrot.slane %v1651_v40, 1 }
 0x204   : > { %v1895_v37 = vmin.f32 %v1893_v8, %v1894_v12  ;;  %vm5661_vm0 = vcmp.lt.s32.totalorder %v1651_v40, %v1652_v49 }
 0x206   : > { %vm1897_vm9 = vcmp.eq.f32.partialorder %v5549_v60, %v1895_v37  ;;  %vm1899_vm1 = vcmp.eq.f32.partialorder %v5544_v30, %v1895_v37  ;;  %vm1901_vm2 = vcmp.eq.f32.partialorder %v5552_v7, %v1895_v37  ;;  %vm1903_vm10 = vcmp.eq.f32.partialorder %v5558_v63, %v1895_v37 }
 0x207   : > { %vm1905_vm3 = vcmp.eq.f32.partialorder %v5567_v61, %v1895_v37  ;;  %vm1909_vm6 = vcmp.eq.f32.partialorder %v5573_v25, %v1895_v37  ;;  %vm1911_vm11 = vcmp.eq.f32.partialorder %v5576_v0, %v1895_v37  ;;  %vm1913_vm12 = vcmp.eq.f32.partialorder %v5583_v31, %v1895_v37 }
 0x208   : > { %vm1915_vm14 = vcmp.eq.f32.partialorder %v5586_v33, %v1895_v37  ;;  %vm1917_vm8 = vcmp.eq.f32.partialorder %v5589_v5, %v1895_v37  ;;  %vm1919_vm15 = vcmp.eq.f32.partialorder %v5599_v21, %v1895_v37  ;;  %vm1921_vm4 = vcmp.eq.f32.partialorder %v5609_v32, %v1895_v37 }
 0x209   : > { %vm1923_vm13 = vcmp.eq.f32.partialorder %v5618_v45, %v1895_v37  ;;  %vm1925_vm7 = vcmp.eq.f32.partialorder %v5621_v43, %v1895_v37  ;;  %v1929_v55 = vsel %vm1897_vm9, %v4247_v11, 128  ;;  %v1931_v48 = vsel %vm1899_vm1, %v4652_v19, 128 }
 0x20a   : > { %v1933_v38 = vsel %vm1901_vm2, %v4655_v29, 128  ;;  %v1935_v9 = vsel %vm1903_vm10, %v4658_v50, 128  ;;  %v1937_v62 = vsel %vm1905_vm3, %v4661_v15, 128  ;;  %vm7200_vm5 = vcmp.eq.f32.partialorder %v5570_v3, %v1895_v37 }
 0x20b   : > { %v1939_v60 = vsel %vm7200_vm5, %v4664_v13, 128  ;;  %v1941_v30 = vsel %vm1909_vm6, %v7201_v1, 128  ;;  %v1943_v7 = vsel %vm1911_vm11, %v7202_v16, 128  ;;  %v1945_v63 = vsel %vm1913_vm12, %v7203_v2, 128 }
 0x20c   : > { %v1947_v61 = vsel %vm1915_vm14, %v7204_v34, 128  ;;  %v1949_v3 = vsel %vm1917_vm8, %v7205_v6, 128  ;;  %v1951_v25 = vsel %vm1919_vm15, %v7206_v41, 128  ;;  %v1953_v0 = vsel %vm1921_vm4, %v7207_v54, 128 }
 0x20d   : > { %v1955_v31 = vsel %vm1923_vm13, %v4692_v46, 128  ;;  %v1957_v33 = vsel %vm1925_vm7, %v4695_v10, 128  ;;  %vm7208_vm9 = vcmp.eq.f32.partialorder %v5632_v14, %v1895_v37  ;;  %vm1999_vm1 = vcmp.lt.s32.totalorder %v1929_v55, %v1933_v38 }
 0x20e   : > { %v1959_v5 = vsel %vm7208_vm9, %v4698_v59, 128  ;;  %vm2001_vm2 = vcmp.lt.s32.totalorder %v1931_v48, %v1935_v9  ;;  %v2143_v21 = vadd.f32 1e-08, %v1895_v37  ;;  %v5731_v32 = vsel %vm5661_vm0, %v1651_v40, %v1652_v49 }
 0x20f   : > { %v2000_v53 = vsel %vm1999_vm1, %v1929_v55, %v1933_v38  ;;  %v2002_v58 = vsel %vm2001_vm2, %v1931_v48, %v1935_v9  ;;  %vm1694_vm10 = vcmp.eq.s32.totalorder %v4247_v11, %v5731_v32  ;;  %vm1696_vm3 = vcmp.eq.s32.totalorder %v4652_v19, %v5731_v32 }
 0x210   : > { %vm2003_vm5 = vcmp.lt.s32.totalorder %v2000_v53, %v1937_v62  ;;  %vm2005_vm6 = vcmp.lt.s32.totalorder %v2002_v58, %v1939_v60  ;;  %3962 = vrcp.f32 %v2143_v21  ;;  %vm1698_vm11 = vcmp.eq.s32.totalorder %v4655_v29, %v5731_v32 }
 0x211   : > { %v2004_v45 = vsel %vm2003_vm5, %v2000_v53, %v1937_v62  ;;  %v2006_v43 = vsel %vm2005_vm6, %v2002_v58, %v1939_v60  ;;  %vm1700_vm0 = vcmp.eq.s32.totalorder %v4658_v50, %v5731_v32  ;;  %vm1702_vm12 = vcmp.eq.s32.totalorder %v4661_v15, %v5731_v32  ;;  %v7217_v62 = vld [vmem:[#allocation34_spill] sm:$0xff] }
 0x212   : > { %vm2007_vm14 = vcmp.lt.s32.totalorder %v2004_v45, %v1941_v30  ;;  %vm2009_vm8 = vcmp.lt.s32.totalorder %v2006_v43, %v1943_v7  ;;  %vm1704_vm15 = vcmp.eq.s32.totalorder %v4664_v13, %v5731_v32  ;;  %vm1706_vm4 = vcmp.eq.s32.totalorder %v7201_v1, %v5731_v32 }
 0x213   : > { %v2008_v14 = vsel %vm2007_vm14, %v2004_v45, %v1941_v30  ;;  %v2010_v24 = vsel %vm2009_vm8, %v2006_v43, %v1943_v7  ;;  %vm1714_vm5 = vcmp.eq.s32.totalorder %v7205_v6, %v5731_v32  ;;  %vm1716_vm6 = vcmp.eq.s32.totalorder %v7206_v41, %v5731_v32 }
 0x214   : > { %vm2011_vm9 = vcmp.lt.s32.totalorder %v2008_v14, %v1945_v63  ;;  %vm2013_vm1 = vcmp.lt.s32.totalorder %v2010_v24, %v1947_v61  ;;  %vm1720_vm13 = vcmp.eq.s32.totalorder %v4692_v46, %v5731_v32  ;;  %vm1722_vm2 = vcmp.eq.s32.totalorder %v4695_v10, %v5731_v32 }
 0x215   : > { %v2012_v20 = vsel %vm2011_vm9, %v2008_v14, %v1945_v63  ;;  %v2014_v28 = vsel %vm2013_vm1, %v2010_v24, %v1947_v61  ;;  %vm1724_vm9 = vcmp.eq.s32.totalorder %v4698_v59, %v5731_v32  ;;  %v5779_v57 = vsel %vm1694_vm10, 1.0, %v7209_v42 }
 0x216   : > { %vm2015_vm8 = vcmp.lt.s32.totalorder %v2012_v20, %v1949_v3  ;;  %vm2017_vm7 = vcmp.lt.s32.totalorder %v2014_v28, %v1951_v25  ;;  %7210 = vst [vmem:[#allocation20_spill] sm:$0xff] %v5779_v57  ;;  %v5785_v44 = vsel %vm1696_vm3, 1.0, %v7209_v42  ;;  %v5791_v8 = vsel %vm1698_vm11, 1.0, %v7209_v42 }
 0x217   : > { %v2016_v4 = vsel %vm2015_vm8, %v2012_v20, %v1949_v3  ;;  %v2018_v47 = vsel %vm2017_vm7, %v2014_v28, %v1951_v25  ;;  %7211 = vst [vmem:[#allocation18_spill] sm:$0xff] %v5785_v44  ;;  %7212 = vst [vmem:[#allocation39_spill] sm:$0xff] %v5791_v8  ;;  %v5797_v49 = vsel %vm1700_vm0, 1.0, %v7209_v42  ;;  %v5803_v37 = vsel %vm1702_vm12, 1.0, %v7209_v42  ;;  %v615_v3 = vld [vmem:[%s5845_s23 + $0x8] sm:$0xff]  ;;  %v617_v25 = vld [vmem:[%s5845_s23 + $0x18] sm:$0xff] }
 0x218   : > { %vm2019_vm1 = vcmp.lt.s32.totalorder %v2016_v4, %v1953_v0  ;;  %vm2021_vm14 = vcmp.lt.s32.totalorder %v2018_v47, %v1955_v31  ;;  %7213 = vst [vmem:[#allocation40_spill] sm:$0xff] %v5797_v49  ;;  %7214 = vst [vmem:[#allocation41_spill] sm:$0xff] %v5803_v37  ;;  %v5811_v55 = vsel %vm1704_vm15, 1.0, %v7209_v42  ;;  %v5817_v48 = vsel %vm1706_vm4, 1.0, %v7209_v42 }
 0x219   : > { %v2020_v12 = vsel %vm2019_vm1, %v2016_v4, %v1953_v0  ;;  %v2022_v40 = vsel %vm2021_vm14, %v2018_v47, %v1955_v31  ;;  %7215 = vst [vmem:[#allocation42_spill] sm:$0xff] %v5811_v55  ;;  %7216 = vst [vmem:[#allocation43_spill] sm:$0xff] %v5817_v48  ;;  %vm7218_vm11 = vcmp.eq.s32.totalorder %v7202_v16, %v5731_v32  ;;  %v5843_v61 = vsel %vm1714_vm5, 1.0, %v7209_v42 }
 0x21a   : > { %v5805_v18 = vpop.eup %3962  ;;  %vm2023_vm10 = vcmp.lt.s32.totalorder %v2020_v12, %v1957_v33  ;;  %vm2025_vm3 = vcmp.lt.s32.totalorder %v2022_v40, %v1959_v5  ;;  %v5825_v30 = vsel %vm7218_vm11, 1.0, %v7209_v42  ;;  %vm7220_vm12 = vcmp.eq.s32.totalorder %v7203_v2, %v5731_v32  ;;  %7224 = vst [vmem:[#allocation81_spill] sm:$0xff] %v5843_v61 }
 0x21b   : > { %v2024_v38 = vsel %vm2023_vm10, %v2020_v12, %v1957_v33  ;;  %v2026_v9 = vsel %vm2025_vm3, %v2022_v40, %v1959_v5  ;;  %v2149_v60 = vadd.f32 %v5805_v18, %v7217_v62  ;;  %7219 = vst [vmem:[#allocation44_spill] sm:$0xff] %v5825_v30  ;;  %v5831_v7 = vsel %vm7220_vm12, 1.0, %v7209_v42 }
 0x21c   : > { %vm2027_vm0 = vcmp.lt.s32.totalorder %v2024_v38, %v2026_v9  ;;  %7221 = vst [vmem:[#allocation47_spill] sm:$0xff] %v5831_v7  ;;  %vm7222_vm15 = vcmp.eq.s32.totalorder %v7204_v34, %v5731_v32  ;;  %v5853_v31 = vsel %vm1716_vm6, 1.0, %v7209_v42  ;;  %vm7226_vm4 = vcmp.eq.s32.totalorder %v7207_v54, %v5731_v32 }
 0x21d   : > { %v5837_v63 = vsel %vm7222_vm15, 1.0, %v7209_v42  ;;  %v2028_v0 = vsel %vm2027_vm0, %v2024_v38, %v2026_v9  ;;  %3964 = vrcp.f32 %v2149_v60  ;;  %7225 = vst [vmem:[#allocation82_spill] sm:$0xff] %v5853_v31  ;;  %v5859_v33 = vsel %vm7226_vm4, 1.0, %v7209_v42  ;;  %v7232_v60 = vld [vmem:[#allocation13_spill] sm:$0xff] }
 0x21e   : > { %7223 = vst [vmem:[#allocation34_spill] sm:$0xff] %v5837_v63  ;;  %7227 = vst [vmem:[#allocation83_spill] sm:$0xff] %v5859_v33  ;;  %v2029_v5 = vrot.slane %v2028_v0, 4  ;;  %v5865_v21 = vsel %vm1720_vm13, 1.0, %v7209_v42  ;;  %v5871_v53 = vsel %vm1722_vm2, 1.0, %v7209_v42  ;;  %v5877_v58 = vsel %vm1724_vm9, 1.0, %v7209_v42 }
 0x21f   : > { %7228 = vst [vmem:[#allocation84_spill] sm:$0xff] %v5865_v21  ;;  %7229 = vst [vmem:[#allocation85_spill] sm:$0xff] %v5871_v53  ;;  %v1790_v45 = vmul.f32 1e+30, %v5779_v57  ;;  %v1792_v43 = vmul.f32 1e+30, %v5785_v44  ;;  %v5882_v24 = vpack.c.bf16 %v617_v25, %v615_v3 }
 0x220   : > { %7230 = vst [vmem:[#allocation86_spill] sm:$0xff] %v5877_v58  ;;  %v1794_v14 = vmul.f32 1e+30, %v5791_v8  ;;  %vm2030_vm13 = vcmp.lt.s32.totalorder %v2028_v0, %v2029_v5  ;;  %v1796_v20 = vmul.f32 1e+30, %v5797_v49 }
 0x221   : > { %7231 = vst [vmem:[#allocation87_spill] sm:$0xff] %v5882_v24  ;;  %v1798_v28 = vmul.f32 1e+30, %v5803_v37  ;;  %v1800_v4 = vmul.f32 1e+30, %v5811_v55  ;;  %v2031_v47 = vsel %vm2030_vm13, %v2028_v0, %v2029_v5  ;;  %3807 = vmatprep.subr.bf16.mxu1 %v5882_v24  ;;  %v5894_v3 = vadd.f32 %v1790_v45, %v7232_v60  ;;  %v7235_v45 = vld [vmem:[#allocation14_spill] sm:$0xff] }
 0x222   : > { %v1802_v32 = vmul.f32 1e+30, %v5817_v48  ;;  %v1804_v12 = vmul.f32 1e+30, %v5825_v30  ;;  %v1806_v40 = vmul.f32 1e+30, %v5831_v7  ;;  %v5908_v60 = vadd.f32 %v1796_v20, %v7235_v45 }
 0x223   : > { %v2032_v38 = vrot.slane %v2031_v47, 2  ;;  %v1808_v9 = vmul.f32 1e+30, %v5837_v63  ;;  %v1810_v62 = vmul.f32 1e+30, %v5843_v61  ;;  %v7233_v48 = vld [vmem:[#allocation11_spill] sm:$0xff] }
 0x224   : > { %v1812_v25 = vmul.f32 1e+30, %v5853_v31  ;;  %v1814_v0 = vmul.f32 1e+30, %v5859_v33  ;;  %v1816_v5 = vmul.f32 1e+30, %v5865_v21  ;;  %v5900_v30 = vadd.f32 %v1792_v43, %v7233_v48 }
 0x225   : > { %vm2033_vm7 = vcmp.lt.s32.totalorder %v2031_v47, %v2032_v38  ;;  %v1818_v24 = vmul.f32 1e+30, %v5871_v53  ;;  %v1820_v7 = vmul.f32 1e+30, %v5877_v58  ;;  %v7234_v63 = vld [vmem:[#allocation12_spill] sm:$0xff]  ;;  %v7236_v31 = vld [vmem:[#allocation15_spill] sm:$0xff] }
 0x226   : > { %v5905_v55 = vadd.f32 %v1794_v14, %v7234_v63  ;;  %v2034_v61 = vsel %vm2033_vm7, %v2031_v47, %v2032_v38  ;;  %v5911_v37 = vadd.f32 %v1798_v28, %v7236_v31  ;;  %v7237_v33 = vld [vmem:[#allocation19_spill] sm:$0xff]  ;;  %v7238_v43 = vld [vmem:[#allocation17_spill] sm:$0xff]  ;;  %v7239_v53 = vld [vmem:[#allocation22_spill] sm:$0xff] }
 0x227   : > { %v5914_v21 = vadd.f32 %v1800_v4, %v7237_v33  ;;  %v2035_v48 = vrot.slane %v2034_v61, 1  ;;  %v5917_v49 = vadd.f32 %v1802_v32, %v7238_v43  ;;  %v5920_v8 = vadd.f32 %v1804_v12, %v7239_v53  ;;  %v7240_v58 = vld [vmem:[#allocation21_spill] sm:$0xff]  ;;  %v3965_v14 = vpop.eup %3964  ;;  %v7241_v47 = vld [vmem:[#allocation24_spill] sm:$0xff]  ;;  %v7242_v38 = vld [vmem:[#allocation23_spill] sm:$0xff] }
 0x228   : > { %v5923_v63 = vadd.f32 %v1806_v40, %v7240_v58  ;;  %v5926_v20 = vadd.f32 %v1808_v9, %v7241_v47  ;;  %v5929_v31 = vadd.f32 %v1810_v62, %v7242_v38  ;;  %v7243_v28 = vld [vmem:[#allocation26_spill] sm:$0xff]  ;;  %v7245_v32 = vld [vmem:[#allocation37_spill] sm:$0xff]  ;;  %v5944_v40 = vmul.f32 %v3965_v14, %v5805_v18  ;;  %v7247_v18 = vld [vmem:[#allocation48_spill] sm:$0xff] }
 0x229   : > { %v5932_v33 = vadd.f32 %v1812_v25, %v7243_v28  ;;  %v7244_v4 = vld [vmem:[#allocation46_spill] sm:$0xff]  ;;  %vm2036_vm2 = vcmp.lt.s32.totalorder %v2034_v61, %v2035_v48  ;;  %v5938_v53 = vmul.f32 %v3965_v14, %v7245_v32  ;;  %v7246_v12 = vld [vmem:[#allocation25_spill] sm:$0xff]  ;;  %v5949_v62 = vadd.f32 %v1816_v5, %v5249_v52 }
 0x22a   : > { %v5935_v45 = vadd.f32 %v1814_v0, %v7244_v4  ;;  %v5941_v58 = vmul.f32 %v3965_v14, %v7246_v12  ;;  %v5946_v9 = vsel %vm2036_vm2, %v2034_v61, %v2035_v48  ;;  %v5952_v25 = vadd.f32 %v1818_v24, %v5243_v26  ;;  %v7248_v61 = vld [vmem:[#allocation49_spill] sm:$0xff]  ;;  %v7249_v24 = vld [vmem:[#allocation32_spill] sm:$0xff] }
 0x22b   : > { %v5955_v0 = vadd.f32 %v1820_v7, %v5252_v39  ;;  %vm2039_vm5 = vcmp.eq.s32.totalorder %v4247_v11, %v5946_v9  ;;  %vm2041_vm6 = vcmp.eq.s32.totalorder %v4652_v19, %v5946_v9  ;;  %v2155_v43 = vmul.f32 %v7247_v18, %v5938_v53  ;;  %v7250_v7 = vld [vmem:[#allocation45_spill] sm:$0xff] }
 0x22c   : > { %v2157_v48 = vmul.f32 %v7248_v61, %v5938_v53  ;;  %v3724_v52 = vsel %vm2039_vm5, 1.0, %v7209_v42  ;;  %v3726_v26 = vsel %vm2041_vm6, 1.0, %v7209_v42  ;;  %v2189_v39 = vmul.f32 %v7249_v24, %v5941_v58 }
 0x22d   : > { %v2191_v5 = vmul.f32 %v7250_v7, %v5941_v58  ;;  %v2255_v14 = vmul.f32 %v3724_v52, %v5944_v40  ;;  %v2257_v47 = vmul.f32 %v3726_v26, %v5944_v40  ;;  %v1854_v38 = vmin.f32 %v5894_v3, %v5905_v55  ;;  %v7251_v7 = vld [vmem:[#allocation51_spill] sm:$0xff] }
 0x22e   : > { %v1855_v28 = vmin.f32 %v5900_v30, %v5908_v60  ;;  %v2221_v4 = vadd.f32 %v2189_v39, %v2155_v43  ;;  %vm2043_vm14 = vcmp.eq.s32.totalorder %v4655_v29, %v5946_v9  ;;  %vm2045_vm8 = vcmp.eq.s32.totalorder %v4658_v50, %v5946_v9 }
 0x22f   : > { %v2223_v32 = vadd.f32 %v2191_v5, %v2157_v48  ;;  %v1856_v12 = vmin.f32 %v1854_v38, %v5911_v37  ;;  %v3728_v61 = vsel %vm2043_vm14, 1.0, %v7209_v42  ;;  %v3730_v52 = vsel %vm2045_vm8, 1.0, %v7209_v42  ;;  %v7252_v48 = vld [vmem:[#allocation52_spill] sm:$0xff] }
 0x230   : > { %v1857_v18 = vmin.f32 %v1855_v28, %v5914_v21  ;;  %v2287_v26 = vadd.f32 %v2255_v14, %v2221_v4  ;;  %v2159_v43 = vmul.f32 %v7251_v7, %v5938_v53  ;;  %v2161_v39 = vmul.f32 %v7252_v48, %v5938_v53  ;;  %v7253_v38 = vld [vmem:[#allocation72_spill] sm:$0xff]  ;;  %v7254_v28 = vld [vmem:[#allocation73_spill] sm:$0xff] }
 0x231   : > { %v2289_v24 = vadd.f32 %v2257_v47, %v2223_v32  ;;  %v1858_v5 = vmin.f32 %v1856_v12, %v5917_v49  ;;  %v2193_v57 = vmul.f32 %v7253_v38, %v5941_v58  ;;  %v2195_v27 = vmul.f32 %v7254_v28, %v5941_v58 }
 0x232   : > { %v1859_v44 = vmin.f32 %v1857_v18, %v5920_v8  ;;  %v2259_v14 = vmul.f32 %v3728_v61, %v5944_v40  ;;  %v2261_v47 = vmul.f32 %v3730_v52, %v5944_v40  ;;  %vm2047_vm9 = vcmp.eq.s32.totalorder %v4661_v15, %v5946_v9  ;;  %v7256_v52 = vld [vmem:[#allocation54_spill] sm:$0xff] }
 0x233   : > { %v2331_v51 = vpack.c.bf16 %v2289_v24, %v2287_v26  ;;  %v1860_v4 = vmin.f32 %v1858_v5, %v5923_v63  ;;  %v2225_v12 = vadd.f32 %v2193_v57, %v2159_v43  ;;  %v2227_v18 = vadd.f32 %v2195_v27, %v2161_v39  ;;  %v7255_v26 = vld [vmem:[#allocation53_spill] sm:$0xff]  ;;  %v7259_v39 = vld [vmem:[#allocation75_spill] sm:$0xff] }
 0x234   : > { %v1861_v32 = vmin.f32 %v1859_v44, %v5926_v20  ;;  %vm2049_vm1 = vcmp.eq.s32.totalorder %v4664_v13, %v5946_v9  ;;  %v3732_v7 = vsel %vm2047_vm9, 1.0, %v7209_v42  ;;  %v2163_v61 = vmul.f32 %v7255_v26, %v5938_v53  ;;  %v7258_v44 = vld [vmem:[#allocation74_spill] sm:$0xff] }
 0x235   : > { %2370 = vmatprep.subr.bf16.mxu0 %v2331_v51  ;;  %v2165_v24 = vmul.f32 %v7256_v52, %v5938_v53  ;;  %v1862_v48 = vmin.f32 %v1860_v4, %v5929_v31  ;;  %v6010_v38 = vadd.f32 %v2259_v14, %v2225_v12  ;;  %v6012_v57 = vadd.f32 %v2261_v47, %v2227_v18  ;;  %v2549_v51 = vld [vmem:[%s6842_s5] sm:$0xff] }
 0x236   : > { %v1863_v5 = vmin.f32 %v1861_v32, %v5932_v33  ;;  %v3734_v27 = vsel %vm2049_vm1, 1.0, %v7209_v42  ;;  %v2197_v43 = vmul.f32 %v7258_v44, %v5941_v58  ;;  %v2199_v28 = vmul.f32 %v7259_v39, %v5941_v58  ;;  %2559 = vperm.xlu1 %3928, %v2549_v51  }
 0x237   : > { %7257 = vst [vmem:[#allocation13_spill] sm:$0xff] %v6010_v38  ;;  %v2263_v4 = vmul.f32 %v3732_v7, %v5944_v40  ;;  %v1864_v14 = vmin.f32 %v1862_v48, %v5935_v45  ;;  %v2265_v12 = vmul.f32 %v3734_v27, %v5944_v40  ;;  %vm2051_vm10 = vcmp.eq.s32.totalorder %v7201_v1, %v5946_v9  ;;  %v7263_v27 = vld [vmem:[#allocation56_spill] sm:$0xff] }
 0x238   : > { %v1865_v47 = vmin.f32 %v1863_v5, %v5949_v62  ;;  %v2229_v18 = vadd.f32 %v2197_v43, %v2163_v61  ;;  %v2231_v26 = vadd.f32 %v2199_v28, %v2165_v24  ;;  %vm2053_vm3 = vcmp.eq.s32.totalorder %v7202_v16, %v5946_v9  ;;  %v7262_v61 = vld [vmem:[#allocation55_spill] sm:$0xff] }
 0x239   : > { %v1866_v7 = vmin.f32 %v1864_v14, %v5952_v25  ;;  %v3736_v48 = vsel %vm2051_vm10, 1.0, %v7209_v42  ;;  %v3738_v5 = vsel %vm2053_vm3, 1.0, %v7209_v42  ;;  %v2167_v24 = vmul.f32 %v7262_v61, %v5938_v53  ;;  %v7264_v14 = vld [vmem:[#allocation76_spill] sm:$0xff]  ;;  %v7265_v61 = vld [vmem:[#allocation57_spill] sm:$0xff] }
 0x23a   : > { %v1867_v52 = vmin.f32 %v1865_v47, %v5955_v0  ;;  %v6036_v51 = vadd.f32 %v2263_v4, %v2229_v18  ;;  %v6038_v44 = vadd.f32 %v2265_v12, %v2231_v26  ;;  %v2169_v43 = vmul.f32 %v7263_v27, %v5938_v53  ;;  %v7266_v27 = vld [vmem:[#allocation58_spill] sm:$0xff] }
 0x23b   : > { %v2201_v28 = vmul.f32 %v5490_v23, %v5941_v58  ;;  %v2203_v47 = vmul.f32 %v7264_v14, %v5941_v58  ;;  %v2267_v32 = vmul.f32 %v3736_v48, %v5944_v40  ;;  %v2269_v12 = vmul.f32 %v3738_v5, %v5944_v40 }
 0x23c   : > { %7260 = vst [vmem:[#allocation11_spill] sm:$0xff] %v6036_v51  ;;  %7261 = vst [vmem:[#allocation12_spill] sm:$0xff] %v6038_v44  ;;  %v1868_v39 = vmin.f32 %v1866_v7, %v1867_v52  ;;  %vm2055_vm11 = vcmp.eq.s32.totalorder %v7203_v2, %v5946_v9  ;;  %vm2057_vm0 = vcmp.eq.s32.totalorder %v7204_v34, %v5946_v9  ;;  %v2551_v52 = vld [vmem:[%s6842_s5 + $0x10] sm:$0xff] }
 0x23d   : > { %v2233_v26 = vadd.f32 %v2201_v28, %v2167_v24  ;;  %v2235_v7 = vadd.f32 %v2203_v47, %v2169_v43  ;;  %v3740_v23 = vsel %vm2055_vm11, 1.0, %v7209_v42  ;;  %v3742_v48 = vsel %vm2057_vm0, 1.0, %v7209_v42  ;;  %2569 = vperm.xlu1 %3928, %v2551_v52   ;;  %v2550_v24 = vld [vmem:[%s6842_s5 + $0x8] sm:$0xff]  ;;  %v7269_v51 = vld [vmem:[#allocation77_spill] sm:$0xff] }
 0x23e   : > { %v1869_v18 = vrot.slane %v1868_v39, 4  ;;  %v2171_v5 = vmul.f32 %v7265_v61, %v5938_v53  ;;  %v2173_v14 = vmul.f32 %v7266_v27, %v5938_v53  ;;  %v2205_v4 = vmul.f32 %v5500_v22, %v5941_v58  ;;  %v2552_v61 = vld [vmem:[%s6842_s5 + $0x18] sm:$0xff]  ;;  %2564 = vperm.xlu0 %3929, %v2550_v24   ;;  %v7271_v24 = vld [vmem:[#allocation61_spill] sm:$0xff] }
 0x23f   : > { %v6070_v28 = vadd.f32 %v2267_v32, %v2233_v26  ;;  %v6072_v47 = vadd.f32 %v2269_v12, %v2235_v7  ;;  %v2207_v44 = vmul.f32 %v7269_v51, %v5941_v58  ;;  %v2271_v22 = vmul.f32 %v3740_v23, %v5944_v40  ;;  %v2553_v32 = vld [vmem:[%s6842_s5 + $0x20] sm:$0xff] }
 0x240   : > { %v1870_v43 = vmin.f32 %v1868_v39, %v1869_v18  ;;  %v2237_v27 = vadd.f32 %v2205_v4, %v2171_v5  ;;  %v2273_v52 = vmul.f32 %v3742_v48, %v5944_v40  ;;  %vm2059_vm12 = vcmp.eq.s32.totalorder %v7205_v6, %v5946_v9  ;;  %v7270_v7 = vld [vmem:[#allocation59_spill] sm:$0xff] }
 0x241   : > { %7267 = vst [vmem:[#allocation14_spill] sm:$0xff] %v6070_v28  ;;  %7268 = vst [vmem:[#allocation15_spill] sm:$0xff] %v6072_v47  ;;  %v2239_v12 = vadd.f32 %v2207_v44, %v2173_v14  ;;  %vm2061_vm15 = vcmp.eq.s32.totalorder %v7206_v41, %v5946_v9  ;;  %v3744_v18 = vsel %vm2059_vm12, 1.0, %v7209_v42  ;;  %v2175_v23 = vmul.f32 %v7270_v7, %v5938_v53  ;;  %v7272_v44 = vld [vmem:[#allocation78_spill] sm:$0xff]  ;;  %v7274_v47 = vld [vmem:[#allocation63_spill] sm:$0xff] }
 0x242   : > { %v1871_v39 = vrot.slane %v1870_v43, 2  ;;  %v6090_v4 = vadd.f32 %v2271_v22, %v2237_v27  ;;  %v3746_v26 = vsel %vm2061_vm15, 1.0, %v7209_v42  ;;  %2574 = vperm.xlu1 %3928, %v2552_v61   ;;  %v2177_v51 = vmul.f32 %v7271_v24, %v5938_v53  ;;  %v2554_v27 = vld [vmem:[%s6842_s5 + $0x28] sm:$0xff]  ;;  %2579 = vperm.xlu0 %3929, %v2553_v32   ;;  %v2555_v61 = vld [vmem:[%s6842_s5 + $0x30] sm:$0xff] }
 0x243   : > { %v6096_v5 = vadd.f32 %v2273_v52, %v2239_v12  ;;  %v2209_v14 = vmul.f32 %v7272_v44, %v5941_v58  ;;  %v2211_v22 = vmul.f32 %v5519_v56, %v5941_v58  ;;  %v2275_v7 = vmul.f32 %v3744_v18, %v5944_v40 }
 0x244   : > { %v1872_v48 = vmin.f32 %v1870_v43, %v1871_v39  ;;  %v2277_v43 = vmul.f32 %v3746_v26, %v5944_v40  ;;  %vm2063_vm4 = vcmp.eq.s32.totalorder %v7207_v54, %v5946_v9  ;;  %vm2065_vm13 = vcmp.eq.s32.totalorder %v4692_v46, %v5946_v9  ;;  %v7273_v26 = vld [vmem:[#allocation62_spill] sm:$0xff] }
 0x245   : > { %v2339_v39 = vpack.c.bf16 %v6096_v5, %v6090_v4  ;;  %v2241_v12 = vadd.f32 %v2209_v14, %v2175_v23  ;;  %v2243_v56 = vadd.f32 %v2211_v22, %v2177_v51  ;;  %v3748_v32 = vsel %vm2063_vm4, 1.0, %v7209_v42  ;;  %v2556_v51 = vld [vmem:[%s6842_s5 + $0x38] sm:$0xff]  ;;  %v7275_v22 = vld [vmem:[#allocation79_spill] sm:$0xff]  ;;  %v3286_v4 = vld [vmem:[%s6850_s13 + $0x28] sm:$0xff] }
 0x246   : > { %v1873_v52 = vrot.slane %v1872_v48, 1  ;;  %v3750_v18 = vsel %vm2065_vm13, 1.0, %v7209_v42  ;;  %v2179_v24 = vmul.f32 %v7273_v26, %v5938_v53  ;;  %2584 = vperm.xlu1 %3928, %v2554_v27   ;;  %v2181_v38 = vmul.f32 %v7274_v47, %v5938_v53  ;;  %2589 = vperm.xlu0 %3929, %v2555_v61   ;;  %v2661_v47 = vld [vmem:[%s6844_s7] sm:$0xff] }
 0x247   : > { %v6122_v28 = vadd.f32 %v2275_v7, %v2241_v12  ;;  %v2213_v23 = vmul.f32 %v5524_v17, %v5941_v58  ;;  %v6131_v14 = vadd.f32 %v2277_v43, %v2243_v56  ;;  %v2215_v26 = vmul.f32 %v7275_v22, %v5941_v58  ;;  %v2662_v17 = vld [vmem:[%s6844_s7 + $0x8] sm:$0xff]  ;;  %v2663_v7 = vld [vmem:[%s6844_s7 + $0x10] sm:$0xff] }
 0x248   : > { %v1874_v44 = vmin.f32 %v1872_v48, %v1873_v52  ;;  %v2279_v48 = vmul.f32 %v3748_v32, %v5944_v40  ;;  %v2281_v27 = vmul.f32 %v3750_v18, %v5944_v40 }
 0x249   : > { %v2247_v22 = vadd.f32 %v2215_v26, %v2181_v38  ;;  %v2667_v38 = vld [vmem:[%s6844_s7 + $0x30] sm:$0xff] }
 0x24a   : > { %vm1896_vm7 = vcmp.eq.f32.partialorder %v5894_v3, %v1874_v44  ;;  %vm1898_vm2 = vcmp.eq.f32.partialorder %v5900_v30, %v1874_v44  ;;  %vm1900_vm5 = vcmp.eq.f32.partialorder %v5905_v55, %v1874_v44  ;;  %vm1902_vm6 = vcmp.eq.f32.partialorder %v5908_v60, %v1874_v44  ;;  %2594 = vperm.xlu1 %3928, %v2556_v51  }
 0x24b   : > { %vm1904_vm14 = vcmp.eq.f32.partialorder %v5911_v37, %v1874_v44  ;;  %vm1906_vm8 = vcmp.eq.f32.partialorder %v5914_v21, %v1874_v44  ;;  %vm1908_vm9 = vcmp.eq.f32.partialorder %v5917_v49, %v1874_v44  ;;  %vm1910_vm1 = vcmp.eq.f32.partialorder %v5920_v8, %v1874_v44  ;;  %2671 = vperm.xlu0 %3929, %v2661_v47   ;;  %v2664_v8 = vld [vmem:[%s6844_s7 + $0x18] sm:$0xff] }
 0x24c   : > { %vm1912_vm10 = vcmp.eq.f32.partialorder %v5923_v63, %v1874_v44  ;;  %vm1914_vm3 = vcmp.eq.f32.partialorder %v5926_v20, %v1874_v44  ;;  %vm1916_vm11 = vcmp.eq.f32.partialorder %v5929_v31, %v1874_v44  ;;  %vm1918_vm0 = vcmp.eq.f32.partialorder %v5932_v33, %v1874_v44 }
 0x24d   : > { %vm1920_vm12 = vcmp.eq.f32.partialorder %v5935_v45, %v1874_v44  ;;  %vm1922_vm15 = vcmp.eq.f32.partialorder %v5949_v62, %v1874_v44  ;;  %vm1924_vm4 = vcmp.eq.f32.partialorder %v5952_v25, %v1874_v44  ;;  %vm1926_vm13 = vcmp.eq.f32.partialorder %v5955_v0, %v1874_v44  ;;  %v2665_v45 = vld [vmem:[%s6844_s7 + $0x20] sm:$0xff]  ;;  %v2666_v0 = vld [vmem:[%s6844_s7 + $0x28] sm:$0xff] }
 0x24e   : > { %v1928_v43 = vsel %vm1896_vm7, %v4247_v11, 128  ;;  %v1930_v61 = vsel %vm1898_vm2, %v4652_v19, 128  ;;  %v1932_v52 = vsel %vm1900_vm5, %v4655_v29, 128  ;;  %v1934_v12 = vsel %vm1902_vm6, %v4658_v50, 128  ;;  %2676 = vperm.xlu1 %3928, %v2662_v17  }
 0x24f   : > { %v1936_v56 = vsel %vm1904_vm14, %v4661_v15, 128  ;;  %v1938_v3 = vsel %vm1906_vm8, %v4664_v13, 128  ;;  %v1940_v30 = vsel %vm1908_vm9, %v7201_v1, 128  ;;  %v1942_v55 = vsel %vm1910_vm1, %v7202_v16, 128  ;;  %2681 = vperm.xlu0 %3929, %v2663_v7  }
 0x250   : > { %v1944_v60 = vsel %vm1912_vm10, %v7203_v2, 128  ;;  %v1946_v37 = vsel %vm1914_vm3, %v7204_v34, 128  ;;  %v1948_v21 = vsel %vm1916_vm11, %v7205_v6, 128  ;;  %v1950_v49 = vsel %vm1918_vm0, %v7206_v41, 128 }
 0x251   : > { %v6204_v63 = vsel %vm1920_vm12, %v7207_v54, 128  ;;  %v6209_v20 = vsel %vm1922_vm15, %v4692_v46, 128  ;;  %v6214_v31 = vsel %vm1924_vm4, %v4695_v10, 128  ;;  %v6219_v33 = vsel %vm1926_vm13, %v4698_v59, 128 }
 0x252   : > { %vm1960_vm7 = vcmp.lt.s32.totalorder %v1928_v43, %v1932_v52  ;;  %vm1962_vm2 = vcmp.lt.s32.totalorder %v1930_v61, %v1934_v12  ;;  %v2142_v32 = vadd.f32 1e-08, %v1874_v44  ;;  %v2341_v62 = vpack.c.bf16 %v6131_v14, %v6122_v28  ;;  %2686 = vperm.xlu1 %3928, %v2664_v8  }
 0x253   : > { %v1961_v18 = vsel %vm1960_vm7, %v1928_v43, %v1932_v52  ;;  %v1963_v51 = vsel %vm1962_vm2, %v1930_v61, %v1934_v12  ;;  %v2245_v25 = vadd.f32 %v2213_v23, %v2179_v24  ;;  %vm2067_vm14 = vcmp.eq.s32.totalorder %v4695_v10, %v5946_v9  ;;  %2691 = vperm.xlu0 %3929, %v2665_v45   ;;  %v7276_v43 = vld [vmem:[#allocation50_spill] sm:$0xff]  ;;  %v7277_v52 = vld [vmem:[#allocation64_spill] sm:$0xff]  ;;  %v614_v12 = vld [vmem:[%s5845_s23] sm:$0xff] }
 0x254   : > { %vm1964_vm5 = vcmp.lt.s32.totalorder %v1961_v18, %v1936_v56  ;;  %vm1966_vm6 = vcmp.lt.s32.totalorder %v1963_v51, %v1938_v3  ;;  %3966 = vrcp.f32 %v2142_v32  ;;  %v6233_v7 = vadd.f32 %v2281_v27, %v2247_v22  ;;  %v7278_v45 = vld [vmem:[#allocation80_spill] sm:$0xff] }
 0x255   : > { %v1965_v44 = vsel %vm1964_vm5, %v1961_v18, %v1936_v56  ;;  %v1967_v47 = vsel %vm1966_vm6, %v1963_v51, %v1938_v3  ;;  %v6231_v17 = vadd.f32 %v2279_v48, %v2245_v25  ;;  %vm2069_vm1 = vcmp.eq.s32.totalorder %v4698_v59, %v5946_v9  ;;  %v616_v56 = vld [vmem:[%s5845_s23 + $0x10] sm:$0xff]  ;;  %v2668_v3 = vld [vmem:[%s6844_s7 + $0x38] sm:$0xff]  ;;  %v619_v18 = vld [vmem:[%s5845_s23 + $0x28] sm:$0xff] }
 0x256   : > { %vm1968_vm8 = vcmp.lt.s32.totalorder %v1965_v44, %v1940_v30  ;;  %vm1970_vm9 = vcmp.lt.s32.totalorder %v1967_v47, %v1942_v55  ;;  %v3752_v24 = vsel %vm2067_vm14, 1.0, %v7209_v42  ;;  %v3754_v27 = vsel %vm2069_vm1, 1.0, %v7209_v42  ;;  %2696 = vperm.xlu1 %3928, %v2666_v0   ;;  %v621_v51 = vld [vmem:[%s5845_s23 + $0x38] sm:$0xff] }
 0x257   : > { %v1969_v23 = vsel %vm1968_vm8, %v1965_v44, %v1940_v30  ;;  %v1971_v26 = vsel %vm1970_vm9, %v1967_v47, %v1942_v55  ;;  %v2343_v48 = vpack.c.bf16 %v6233_v7, %v6231_v17  ;;  %v2183_v61 = vmul.f32 %v7276_v43, %v5938_v53  ;;  %2701 = vperm.xlu0 %3929, %v2667_v38   ;;  %v620_v47 = vld [vmem:[%s5845_s23 + $0x30] sm:$0xff]  ;;  %v3931_v17 = vld [vmem:[%s5751_s16 + $0x8] sm:$0xff]  }
 0x258   : > { %vm1972_vm10 = vcmp.lt.s32.totalorder %v1969_v23, %v1944_v60  ;;  %vm1974_vm3 = vcmp.lt.s32.totalorder %v1971_v26, %v1946_v37  ;;  %v2185_v9 = vmul.f32 %v7277_v52, %v5938_v53  ;;  %v2217_v8 = vmul.f32 %v5534_v35, %v5941_v58  ;;  %v2863_v53 = vld [vmem:[%s6846_s9] sm:$0xff]  ;;  %v3932_v7 = vld [vmem:[%s5751_s16 + $0x10] sm:$0xff]  }
 0x259   : > { %v1973_v30 = vsel %vm1972_vm10, %v1969_v23, %v1944_v60  ;;  %v1975_v55 = vsel %vm1974_vm3, %v1971_v26, %v1946_v37  ;;  %v2219_v32 = vmul.f32 %v7278_v45, %v5941_v58  ;;  %v2283_v25 = vmul.f32 %v3752_v24, %v5944_v40  ;;  %v618_v35 = vld [vmem:[%s5845_s23 + $0x20] sm:$0xff]  ;;  %v2864_v23 = vld [vmem:[%s6846_s9 + $0x8] sm:$0xff]  ;;  %v2865_v26 = vld [vmem:[%s6846_s9 + $0x10] sm:$0xff] }
 0x25a   : > { %vm1976_vm11 = vcmp.lt.s32.totalorder %v1973_v30, %v1948_v21  ;;  %vm1978_vm0 = vcmp.lt.s32.totalorder %v1975_v55, %v1950_v49  ;;  %v2285_v60 = vmul.f32 %v3754_v27, %v5944_v40  ;;  %v2249_v0 = vadd.f32 %v2217_v8, %v2183_v61  ;;  %2706 = vperm.xlu1 %3928, %v2668_v3   ;;  %v2868_v3 = vld [vmem:[%s6846_s9 + $0x28] sm:$0xff] }
 0x25b   : > { %v1977_v22 = vsel %vm1976_vm11, %v1973_v30, %v1948_v21  ;;  %v1979_v37 = vsel %vm1978_vm0, %v1975_v55, %v1950_v49  ;;  %v2251_v44 = vadd.f32 %v2219_v32, %v2185_v9  ;;  %v6268_v58 = vpack.c.bf16 %v616_v56, %v614_v12  ;;  %2873 = vperm.xlu0 %3929, %v2863_v53   ;;  %v3933_v12 = vld [vmem:[%s6841_s4 + $0x10] sm:$0xff]   ;;  %v3935_v32 = vld [vmem:[%s6841_s4 + $0x18] sm:$0xff]   ;;  %v3080_v53 = vld [vmem:[%s6848_s11] sm:$0xff] }
 0x25c   : > { %vm1980_vm12 = vcmp.lt.s32.totalorder %v1977_v22, %v6204_v63  ;;  %vm1982_vm15 = vcmp.lt.s32.totalorder %v1979_v37, %v6209_v20  ;;  %v6270_v38 = vpack.c.bf16 %v621_v51, %v619_v18  ;;  %v6274_v21 = vadd.f32 %v2283_v25, %v2249_v0  ;;  %v2869_v30 = vld [vmem:[%s6846_s9 + $0x30] sm:$0xff]  ;;  %v2870_v18 = vld [vmem:[%s6846_s9 + $0x38] sm:$0xff] }
 0x25d   : > { %v1981_v24 = vsel %vm1980_vm12, %v1977_v22, %v6204_v63  ;;  %v1983_v40 = vsel %vm1982_vm15, %v1979_v37, %v6209_v20  ;;  %v6276_v49 = vadd.f32 %v2285_v60, %v2251_v44  ;;  %3809 = vmatpush1.bf16.msra.mxu1 %v6268_v58  ;;  %v6287_v63 = vpack.c.bf16 %v620_v47, %v618_v35  ;;  %v7280_v60 = vld [vmem:[#allocation60_spill] sm:$0xff] }
 0x25e   : > { %v3967_v27 = vpop.eup %3966  ;;  %vm1984_vm4 = vcmp.lt.s32.totalorder %v1981_v24, %v6214_v31  ;;  %vm1986_vm13 = vcmp.lt.s32.totalorder %v1983_v40, %v6219_v33  ;;  %3808 = vmatprep.subr.bf16.mxu1 %v6270_v38  ;;  %2878 = vperm.xlu1 %3928, %v2864_v23   ;;  %vm2463_vm2 = vcmask 261120   ;;  %v7279_v8 = vmov 0   ;;  %v7281_v37 = vld [vmem:[#allocation16_spill] sm:$0xff]  ;;  %v7283_v23 = vld [vmem:[#allocation38_spill] sm:$0xff] }
 0x25f   : > { %v1985_v20 = vsel %vm1984_vm4, %v1981_v24, %v6214_v31  ;;  %v1987_v43 = vsel %vm1986_vm13, %v1983_v40, %v6219_v33  ;;  %v2148_v61 = vadd.f32 %v3967_v27, %v5659_v36  ;;  %v2345_v52 = vpack.c.bf16 %v6276_v49, %v6274_v21  ;;  %2883 = vperm.xlu0 %3929, %v2865_v26   ;;  %v2866_v31 = vld [vmem:[%s6846_s9 + $0x18] sm:$0xff]  ;;  %v2867_v36 = vld [vmem:[%s6846_s9 + $0x20] sm:$0xff]  ;;  %v3081_v47 = vld [vmem:[%s6848_s11 + $0x8] sm:$0xff] }
 0x260   : > { %vm1988_vm7 = vcmp.lt.s32.totalorder %v1985_v20, %v1987_v43  ;;  %v7282_v24 = vld [vmem:[#allocation27_spill] sm:$0xff] }
 0x261   : > { %v1989_v9 = vsel %vm1988_vm7, %v1985_v20, %v1987_v43  ;;  %3968 = vrcp.f32 %v2148_v61  ;;  %3810 = vmatpush1.bf16.msra.mxu1 %v6287_v63 }
 0x262   : > { %v1990_v33 = vrot.slane %v1989_v9, 4  ;;  %2888 = vperm.xlu1 %3928, %v2866_v31  }
 0x263   : > { %2893 = vperm.xlu0 %3929, %v2867_v36  }
 0x264   : > { %vm1991_vm5 = vcmp.lt.s32.totalorder %v1989_v9, %v1990_v33  ;;  %3765 = vmatmul.mubr.msk.bf16.vlgmr.msra.gmra.mrb[0].mxu1 %vm2463_vm2, %v3933_v12 }
 0x265   : > { %v1992_v56 = vsel %vm1991_vm5, %v1989_v9, %v1990_v33  ;;  %2538 = vmatprep.mubr.bf16.mxu1 %v7279_v8 }
 0x266   : > { %v1993_v55 = vrot.slane %v1992_v56, 2  ;;  %2898 = vperm.xlu1 %3928, %v2868_v3  }
 0x267   : > { %2903 = vperm.xlu0 %3929, %v2869_v30   ;;  %v3083_v30 = vld [vmem:[%s6848_s11 + $0x18] sm:$0xff] }
 0x268   : > { %vm1994_vm6 = vcmp.lt.s32.totalorder %v1992_v56, %v1993_v55 }
 0x269   : > { %v1995_v45 = vsel %vm1994_vm6, %v1992_v56, %v1993_v55  ;;  %v7286_v55 = vld [vmem:[#allocation28_spill] sm:$0xff] }
 0x26a   : > { %v1996_v51 = vrot.slane %v1995_v45, 1  ;;  %2908 = vperm.xlu1 %3928, %v2870_v18  }
 0x26b   : > { %v3969_v25 = vpop.eup %3968  ;;  %3090 = vperm.xlu0 %3929, %v3080_v53  }
 0x26c   : > { %vm1997_vm14 = vcmp.lt.s32.totalorder %v1995_v45, %v1996_v51  ;;  %v6323_v22 = vmul.f32 %v3969_v25, %v7280_v60  ;;  %v6326_v0 = vmul.f32 %v3969_v25, %v7281_v37  ;;  %v6328_v44 = vmul.f32 %v3969_v25, %v3967_v27  ;;  %3766 = vmatmul.mubr.msk.bf16.gmra.mrb[4].mxu1 %vm2463_vm2, %v3935_v32  ;;  %v3082_v27 = vld [vmem:[%s6848_s11 + $0x10] sm:$0xff]  ;;  %v3084_v25 = vld [vmem:[%s6848_s11 + $0x20] sm:$0xff] }
 0x26d   : > { %v6330_v35 = vsel %vm1997_vm14, %v1995_v45, %v1996_v51  ;;  %2774 = vmatprep.mubr.bf16.mxu1 %v7279_v8  ;;  %v7289_v51 = vld [vmem:[#allocation40_spill] sm:$0xff] }
 0x26e   : > { %vm2038_vm8 = vcmp.eq.s32.totalorder %v4247_v11, %v6330_v35  ;;  %vm2040_vm9 = vcmp.eq.s32.totalorder %v4652_v19, %v6330_v35  ;;  %v2154_v40 = vmul.f32 %v7282_v24, %v6323_v22  ;;  %v2156_v26 = vmul.f32 %v7283_v23, %v6323_v22  ;;  %v7284_v11 = vld [vmem:[#allocation20_spill] sm:$0xff]  ;;  %v7285_v19 = vld [vmem:[#allocation18_spill] sm:$0xff]  ;;  %3095 = vperm.xlu1 %3928, %v3081_v47  }
 0x26f   : > { %v3723_v20 = vsel %vm2038_vm8, 1.0, %v7209_v42  ;;  %v3725_v43 = vsel %vm2040_vm9, 1.0, %v7209_v42  ;;  %v2188_v61 = vmul.f32 %v7284_v11, %v6326_v0  ;;  %v2190_v9 = vmul.f32 %v7285_v19, %v6326_v0  ;;  %3100 = vperm.xlu0 %3929, %v3082_v27  }
 0x270   : > { %v2254_v12 = vmul.f32 %v3723_v20, %v6328_v44  ;;  %v2256_v31 = vmul.f32 %v3725_v43, %v6328_v44  ;;  %vm2042_vm1 = vcmp.eq.s32.totalorder %v4655_v29, %v6330_v35  ;;  %vm2044_vm10 = vcmp.eq.s32.totalorder %v4658_v50, %v6330_v35  ;;  %v7287_v29 = vld [vmem:[#allocation29_spill] sm:$0xff]  ;;  %v7288_v50 = vld [vmem:[#allocation39_spill] sm:$0xff] }
 0x271   : > { %v2220_v36 = vadd.f32 %v2188_v61, %v2154_v40  ;;  %v2222_v33 = vadd.f32 %v2190_v9, %v2156_v26  ;;  %v3727_v56 = vsel %vm2042_vm1, 1.0, %v7209_v42  ;;  %v3729_v3 = vsel %vm2044_vm10, 1.0, %v7209_v42  ;;  %v7290_v43 = vld [vmem:[#allocation31_spill] sm:$0xff]  ;;  %v3085_v61 = vld [vmem:[%s6848_s11 + $0x28] sm:$0xff] }
 0x272   : > { %v2158_v45 = vmul.f32 %v7286_v55, %v6323_v22  ;;  %v2160_v32 = vmul.f32 %v7287_v29, %v6323_v22  ;;  %v2192_v18 = vmul.f32 %v7288_v50, %v6326_v0  ;;  %v2194_v53 = vmul.f32 %v7289_v51, %v6326_v0  ;;  %3105 = vperm.xlu1 %3928, %v3083_v30   ;;  %v7294_v55 = vld [vmem:[#allocation13_spill] sm:$0xff] }
 0x273   : > { %v2286_v60 = vadd.f32 %v2254_v12, %v2220_v36  ;;  %v2288_v37 = vadd.f32 %v2256_v31, %v2222_v33  ;;  %v2258_v47 = vmul.f32 %v3727_v56, %v6328_v44  ;;  %v2260_v24 = vmul.f32 %v3729_v3, %v6328_v44  ;;  %3110 = vperm.xlu0 %3929, %v3084_v25   ;;  %v3086_v36 = vld [vmem:[%s6848_s11 + $0x30] sm:$0xff]  ;;  %v7293_v33 = vld [vmem:[#allocation42_spill] sm:$0xff] }
 0x274   : > { %v2224_v40 = vadd.f32 %v2192_v18, %v2158_v45  ;;  %v2226_v23 = vadd.f32 %v2194_v53, %v2160_v32  ;;  %vm2046_vm3 = vcmp.eq.s32.totalorder %v4661_v15, %v6330_v35  ;;  %vm2048_vm11 = vcmp.eq.s32.totalorder %v4664_v13, %v6330_v35  ;;  %v7291_v15 = vld [vmem:[#allocation30_spill] sm:$0xff]  ;;  %v7292_v13 = vld [vmem:[#allocation41_spill] sm:$0xff] }
 0x275   : > { %v2330_v26 = vpack.c.bf16 %v2288_v37, %v2286_v60  ;;  %v3731_v27 = vsel %vm2046_vm3, 1.0, %v7209_v42  ;;  %v3733_v20 = vsel %vm2048_vm11, 1.0, %v7209_v42  ;;  %v2162_v11 = vmul.f32 %v7290_v43, %v6323_v22  ;;  %v7296_v53 = vld [vmem:[#allocation33_spill] sm:$0xff]  ;;  %v7300_v43 = vld [vmem:[#allocation12_spill] sm:$0xff] }
 0x276   : > { %v2290_v19 = vadd.f32 %v2258_v47, %v2224_v40  ;;  %v2292_v9 = vadd.f32 %v2260_v24, %v2226_v23  ;;  %v2164_v12 = vmul.f32 %v7291_v15, %v6323_v22  ;;  %v2196_v31 = vmul.f32 %v7292_v13, %v6326_v0  ;;  %3115 = vperm.xlu1 %3928, %v3085_v61   ;;  %v7299_v24 = vld [vmem:[#allocation44_spill] sm:$0xff] }
 0x277   : > { %2371 = vmatpush1.bf16.msra.mxu0 %v2330_v26  ;;  %v2198_v56 = vmul.f32 %v7293_v33, %v6326_v0  ;;  %v2262_v3 = vmul.f32 %v3731_v27, %v6328_v44  ;;  %v2264_v30 = vmul.f32 %v3733_v20, %v6328_v44  ;;  %vm2050_vm0 = vcmp.eq.s32.totalorder %v7201_v1, %v6330_v35  ;;  %v7297_v1 = vld [vmem:[#allocation35_spill] sm:$0xff] }
 0x278   : > { %v7295_v45 = vpack.c.bf16 %v6012_v57, %v7294_v55  ;;  %v2332_v29 = vpack.c.bf16 %v2292_v9, %v2290_v19  ;;  %v2228_v32 = vadd.f32 %v2196_v31, %v2162_v11  ;;  %vm2052_vm12 = vcmp.eq.s32.totalorder %v7202_v16, %v6330_v35  ;;  %v3087_v57 = vld [vmem:[%s6848_s11 + $0x38] sm:$0xff]  ;;  %3120 = vperm.xlu0 %3929, %v3086_v36   ;;  %v7298_v16 = vld [vmem:[#allocation43_spill] sm:$0xff]  ;;  %v7303_v31 = vld [vmem:[#allocation36_spill] sm:$0xff] }
 0x279   : > { %v3735_v50 = vsel %vm2050_vm0, 1.0, %v7209_v42  ;;  %v2230_v18 = vadd.f32 %v2198_v56, %v2164_v12  ;;  %v3737_v51 = vsel %vm2052_vm12, 1.0, %v7209_v42  ;;  %v2166_v25 = vmul.f32 %v7296_v53, %v6323_v22  ;;  %v3281_v26 = vld [vmem:[%s6850_s13] sm:$0xff] }
 0x27a   : > { %2372 = vmatprep.subr.bf16.mxu0 %v7295_v45  ;;  %v2168_v60 = vmul.f32 %v7297_v1, %v6323_v22  ;;  %v2294_v37 = vadd.f32 %v2262_v3, %v2228_v32  ;;  %v2200_v47 = vmul.f32 %v7298_v16, %v6326_v0  ;;  %v2202_v40 = vmul.f32 %v7299_v24, %v6326_v0  ;;  %v7301_v11 = vld [vmem:[#allocation11_spill] sm:$0xff]  ;;  %v3282_v3 = vld [vmem:[%s6850_s13 + $0x8] sm:$0xff]  ;;  %v7306_v45 = vld [vmem:[#allocation34_spill] sm:$0xff] }
 0x27b   : > { %v2266_v23 = vmul.f32 %v3735_v50, %v6328_v44  ;;  %2373 = vmatpush1.bf16.msra.mxu0 %v2332_v29  ;;  %v2296_v27 = vadd.f32 %v2264_v30, %v2230_v18  ;;  %v2268_v20 = vmul.f32 %v3737_v51, %v6328_v44  ;;  %vm2054_vm15 = vcmp.eq.s32.totalorder %v7203_v2, %v6330_v35  ;;  %v7304_v2 = vld [vmem:[#allocation65_spill] sm:$0xff]  ;;  %v7307_v53 = vld [vmem:[#allocation15_spill] sm:$0xff]  ;;  %v7310_v24 = vld [vmem:[#allocation66_spill] sm:$0xff] }
 0x27c   : > { %vm2056_vm4 = vcmp.eq.s32.totalorder %v7204_v34, %v6330_v35  ;;  %v7302_v61 = vpack.c.bf16 %v7300_v43, %v7301_v11  ;;  %v2232_v19 = vadd.f32 %v2200_v47, %v2166_v25  ;;  %v2234_v9 = vadd.f32 %v2202_v40, %v2168_v60  ;;  %3125 = vperm.xlu1 %3928, %v3087_v57   ;;  %v7305_v34 = vld [vmem:[#allocation47_spill] sm:$0xff]  ;;  %v3283_v50 = vld [vmem:[%s6850_s13 + $0x10] sm:$0xff]  ;;  %v7308_v25 = vld [vmem:[#allocation14_spill] sm:$0xff] }
 0x27d   : > { %v3739_v15 = vsel %vm2054_vm15, 1.0, %v7209_v42  ;;  %v3741_v12 = vsel %vm2056_vm4, 1.0, %v7209_v42  ;;  %v2334_v13 = vpack.c.bf16 %v2296_v27, %v2294_v37  ;;  %v2170_v36 = vmul.f32 %v7303_v31, %v6323_v22  ;;  %3291 = vperm.xlu0 %3929, %v3281_v26   ;;  %v3284_v27 = vld [vmem:[%s6850_s13 + $0x18] sm:$0xff] }
 0x27e   : > { %2374 = vmatprep.subr.bf16.mxu0 %v7302_v61  ;;  %v2172_v33 = vmul.f32 %v7304_v2, %v6323_v22  ;;  %v2204_v56 = vmul.f32 %v7305_v34, %v6326_v0  ;;  %v2298_v30 = vadd.f32 %v2266_v23, %v2232_v19  ;;  %v2300_v55 = vadd.f32 %v2268_v20, %v2234_v9  ;;  %v7313_v43 = vld [vmem:[#allocation82_spill] sm:$0xff]  ;;  %v3285_v9 = vld [vmem:[%s6850_s13 + $0x20] sm:$0xff] }
 0x27f   : > { %v2206_v29 = vmul.f32 %v7306_v45, %v6326_v0  ;;  %v2270_v32 = vmul.f32 %v3739_v15, %v6328_v44  ;;  %2375 = vmatpush1.bf16.msra.mxu0 %v2334_v13  ;;  %v2272_v51 = vmul.f32 %v3741_v12, %v6328_v44  ;;  %vm2058_vm13 = vcmp.eq.s32.totalorder %v7205_v6, %v6330_v35  ;;  %v7311_v6 = vld [vmem:[#allocation67_spill] sm:$0xff]  ;;  %v7314_v12 = vld [vmem:[#allocation69_spill] sm:$0xff] }
 0x280   : > { %v2236_v18 = vadd.f32 %v2204_v56, %v2170_v36  ;;  %vm2060_vm7 = vcmp.eq.s32.totalorder %v7206_v41, %v6330_v35  ;;  %v7309_v1 = vpack.c.bf16 %v7307_v53, %v7308_v25  ;;  %v2336_v60 = vpack.c.bf16 %v2300_v55, %v2298_v30  ;;  %3296 = vperm.xlu1 %3928, %v3282_v3   ;;  %v7312_v41 = vld [vmem:[#allocation81_spill] sm:$0xff]  ;;  %v7317_v30 = vld [vmem:[#allocation84_spill] sm:$0xff] }
 0x281   : > { %v2238_v57 = vadd.f32 %v2206_v29, %v2172_v33  ;;  %v3743_v37 = vsel %vm2058_vm13, 1.0, %v7209_v42  ;;  %v3745_v16 = vsel %vm2060_vm7, 1.0, %v7209_v42  ;;  %v2174_v40 = vmul.f32 %v7310_v24, %v6323_v22  ;;  %3301 = vperm.xlu0 %3929, %v3283_v50   ;;  %v3287_v29 = vld [vmem:[%s6850_s13 + $0x30] sm:$0xff] }
 0x282   : > { %2376 = vmatprep.subr.bf16.mxu0 %v7309_v1  ;;  %v2302_v47 = vadd.f32 %v2270_v32, %v2236_v18  ;;  %v2176_v23 = vmul.f32 %v7311_v6, %v6323_v22  ;;  %v2208_v26 = vmul.f32 %v7312_v41, %v6326_v0  ;;  %v2210_v11 = vmul.f32 %v7313_v43, %v6326_v0  ;;  %v7319_v1 = vld [vmem:[#allocation71_spill] sm:$0xff] }
 0x283   : > { %v2304_v20 = vadd.f32 %v2272_v51, %v2238_v57  ;;  %v2274_v61 = vmul.f32 %v3743_v37, %v6328_v44  ;;  %v2276_v19 = vmul.f32 %v3745_v16, %v6328_v44  ;;  %2377 = vmatpush1.bf16.msra.mxu0 %v2336_v60  ;;  %vm2062_vm5 = vcmp.eq.s32.totalorder %v7207_v54, %v6330_v35  ;;  %v7315_v54 = vld [vmem:[#allocation70_spill] sm:$0xff] }
 0x284   : > { %v2240_v15 = vadd.f32 %v2208_v26, %v2174_v40  ;;  %vm2064_vm6 = vcmp.eq.s32.totalorder %v4692_v46, %v6330_v35  ;;  %v2178_v13 = vmul.f32 %v7314_v12, %v6323_v22  ;;  %2378 = vmatprep.subr.bf16.mxu0 %v2339_v39  ;;  %v2242_v36 = vadd.f32 %v2210_v11, %v2176_v23  ;;  %v7316_v46 = vld [vmem:[#allocation83_spill] sm:$0xff]  ;;  %v7321_v16 = vld [vmem:[#allocation86_spill] sm:$0xff] }
 0x285   : > { %v2338_v31 = vpack.c.bf16 %v2304_v20, %v2302_v47  ;;  %v3747_v2 = vsel %vm2062_vm5, 1.0, %v7209_v42  ;;  %v3749_v33 = vsel %vm2064_vm6, 1.0, %v7209_v42  ;;  %3306 = vperm.xlu1 %3928, %v3284_v27   ;;  %v2180_v56 = vmul.f32 %v7315_v54, %v6323_v22  ;;  %3311 = vperm.xlu0 %3929, %v3285_v9   ;;  %v7322_v23 = vld [vmem:[#allocation87_spill] sm:$0xff] }
 0x286   : > { %v2306_v34 = vadd.f32 %v2274_v61, %v2240_v15  ;;  %v2212_v3 = vmul.f32 %v7316_v46, %v6326_v0  ;;  %v2214_v55 = vmul.f32 %v7317_v30, %v6326_v0  ;;  %v2308_v5 = vadd.f32 %v2276_v19, %v2242_v36 }
 0x287   : > { %v2278_v39 = vmul.f32 %v3747_v2, %v6328_v44  ;;  %v2280_v45 = vmul.f32 %v3749_v33, %v6328_v44  ;;  %vm2066_vm14 = vcmp.eq.s32.totalorder %v4695_v10, %v6330_v35  ;;  %2379 = vmatpush1.bf16.msra.mxu0 %v2338_v31  ;;  %vm2068_vm8 = vcmp.eq.s32.totalorder %v4698_v59, %v6330_v35  ;;  %v7318_v10 = vld [vmem:[#allocation68_spill] sm:$0xff]  ;;  %v7320_v59 = vld [vmem:[#allocation85_spill] sm:$0xff] }
 0x288   : > { %v2244_v32 = vadd.f32 %v2212_v3, %v2178_v13  ;;  %v2246_v50 = vadd.f32 %v2214_v55, %v2180_v56  ;;  %v3751_v18 = vsel %vm2066_vm14, 1.0, %v7209_v42  ;;  %2380 = vmatprep.subr.bf16.mxu0 %v2341_v62  ;;  %v2340_v51 = vpack.c.bf16 %v2308_v5, %v2306_v34 }
 0x289   : > { %v3753_v53 = vsel %vm2068_vm8, 1.0, %v7209_v42  ;;  %v2182_v25 = vmul.f32 %v7318_v10, %v6323_v22  ;;  %v2184_v60 = vmul.f32 %v7319_v1, %v6323_v22  ;;  %3316 = vperm.xlu1 %3928, %v3286_v4   ;;  %v2216_v35 = vmul.f32 %v7320_v59, %v6326_v0  ;;  %v3288_v42 = vld [vmem:[%s6850_s13 + $0x38] sm:$0xff]  ;;  %3321 = vperm.xlu0 %3929, %v3287_v29  }
 0x28a   : > { %v2310_v57 = vadd.f32 %v2278_v39, %v2244_v32  ;;  %v2312_v37 = vadd.f32 %v2280_v45, %v2246_v50  ;;  %v2218_v47 = vmul.f32 %v7321_v16, %v6326_v0  ;;  %v2282_v28 = vmul.f32 %v3751_v18, %v6328_v44 }
 0x28b   : > { %v2284_v14 = vmul.f32 %v3753_v53, %v6328_v44  ;;  %2381 = vmatpush1.bf16.msra.mxu0 %v2340_v51  ;;  %v2248_v22 = vadd.f32 %v2216_v35, %v2182_v25  ;;  %v3930_v44 = vld [vmem:[%s5751_s16] sm:$0xff]  }
 0x28c   : > { %v2342_v62 = vpack.c.bf16 %v2312_v37, %v2310_v57  ;;  %v2250_v24 = vadd.f32 %v2218_v47, %v2184_v60  ;;  %2382 = vmatprep.subr.bf16.mxu0 %v2343_v48  ;;  %v3934_v48 = vld [vmem:[%s5751_s16 + $0x18] sm:$0xff]   ;;  %s3511_s16 = sadd.s32 %s3801_s12, %s4238_s29  ;;  %s3514_s29 = sshll.u32 %s6745_s21, 4  ;;  %s6780_s29 = int_to_ptr.vmem [resolvable:$true] %s3514_s29 }
 0x28d   : > { %3326 = vperm.xlu1 %3928, %v3288_v42   ;;  %v2314_v0 = vadd.f32 %v2282_v28, %v2248_v22  ;;  %s3802_s17 = sshll.u32 %s3511_s16, 7  ;;  %s3970_s16 = scalar_lea.vmem %s6780_s29, 2048 }
 0x28e   : > { %v2316_v40 = vadd.f32 %v2284_v14, %v2250_v24  ;;  %s6777_s28 = scalar_lea.hbm %s7326_s27, %s3802_s17  ;;  %p3971_p3 = scmp.ne.s32.totalorder %s6780_s29, %s3970_s16 }
 0x28f   : > { %2383 = vmatpush1.bf16.msra.mxu0 %v2342_v62  ;;  %s4070_s17 = smov [#allocation3]  }
 0x290   : > { %v2344_v6 = vpack.c.bf16 %v2316_v40, %v2314_v0  ;;  %2384 = vmatprep.subr.bf16.mxu0 %v2345_v52  ;;  %p3972_p4 = pnand %p3971_p3, %p4209_p8  ;;  %s3974_s23 = sshll.u32 %s4070_s17, 4  ;;  %s3975_s23 = int_to_ptr.vmem [resolvable:$false] %s3974_s23 }
 0x291   : > { %s3976_s26 = scalar_lea.vmem %s3975_s23, 4096  ;;  %p3977_p6 = scmp.lt.s32.totalorder %s6780_s29, %s3975_s23 }
 0x292   : > { %p3973_p5 = pneg %p3972_p4  ;;  %p3978_p7 = scmp.lt.s32.totalorder %s3976_s26, %s3970_s16 }
 0x293   : > { %2385 = vmatpush1.bf16.msra.mxu0 %v2344_v6 }
 0x294   : > { %2476 = vmatprep.subr.bf16.mxu0 %v7322_v23  ;;  %p3979_p10 = por %p3978_p7, %p3977_p6 }
 0x296   : > { %2403 = vmatmul.mubr.bf16.vlgmr.msra.gmra.mrb[0].mxu0 %v3930_v44  ;;  %p3980_p11 = pnand %p3979_p10, %p3973_p5 }
 0x297   : > { %2477 = vmatpush1.bf16.msra.mxu0 %v6268_v58  ;;  %2412 = vmatprep.mubr.bf16.mxu0 %v7279_v8  ;;  %v3936_v58 = vld [vmem:[%s6841_s4] sm:$0xff]  }
 0x298   : > { %2478 = vmatprep.subr.bf16.mxu0 %v6270_v38  ;;  %v3937_v38 = vld [vmem:[%s6841_s4 + $0x8] sm:$0xff]  }
 0x29b   : > { %2479 = vmatpush1.bf16.msra.mxu0 %v6287_v63 }
 0x29e   : > { %2413 = vmatmul.mubr.bf16.gmra.mrb[4].mxu0 %v3931_v17 }
 0x29f   : > { %2422 = vmatprep.mubr.bf16.mxu0 %v7279_v8 }
 0x2a6   : > { %2423 = vmatmul.mubr.bf16.gmra.mrb[8].mxu0 %v3932_v7 }
 0x2a7   : > { %2432 = vmatprep.mubr.bf16.mxu0 %v7279_v8 }
 0x2ae   : > { %2433 = vmatmul.mubr.bf16.gmra.mrb[12].mxu0 %v3934_v48 }
 0x2af   : > { %2508 = vmatprep.mubr.bf16.mxu0 %v7279_v8 }
 0x2b5   : > { %v2560_v15 = vpop.permute.xlu1 %2559 }
 0x2b6   : > { %3763 = vmatmul.mubr.msk.bf16.vlgmr.msra.gmra.mrb[0].mxu0 %vm2463_vm2, %v3936_v58 }
 0x2b7   : > { %2518 = vmatprep.mubr.bf16.mxu0 %v7279_v8 }
 0x2bc   : > { %v2570_v2 = vpop.permute.xlu1 %2569 }
 0x2bd   : > { %v2565_v5 = vpop.permute.xlu0 %2564 }
 0x2be   : > { %3764 = vmatmul.mubr.msk.bf16.gmra.mrb[4].mxu0 %vm2463_vm2, %v3937_v38  ;;  %vm2729_vm2 = vcmask 523264  }
 0x2bf   : > { %3393 = vmatprep.mubr.bf16.mxu0 %v7279_v8 }
 0x2c1   : > { %v2575_v55 = vpop.permute.xlu1 %2574  ;;  %v2580_v57 = vpop.permute.xlu0 %2579 }
 0x2c5   : > { %v2585_v10 = vpop.permute.xlu1 %2584 }
 0x2c9   : > { %v2595_v40 = vpop.permute.xlu1 %2594 }
 0x337   : > { %v2530_v21 = vpop.f32.mrb[0].mxu1 }
 0x338   : > { %v2532_v49 = vpop.f32.mrb[1].mxu1 }
 0x339   : > { %v2534_v63 = vpop.f32.mrb[2].mxu1 }
 0x33a   : > { %v2536_v52 = vpop.f32.mrb[3].mxu1 }
 0x33f   : > { %v2540_v41 = vpop.f32.mrb[4].mxu1 }
 0x340   : > { %v2542_v26 = vpop.f32.mrb[5].mxu1 }
 0x341   : > { %v2544_v27 = vpop.f32.mrb[6].mxu1 }
 0x342   : > { %v2546_v20 = vpop.f32.mrb[7].mxu1 }
 0x379   : > { %v2424_v43 = vpop.f32.mrb[8].mxu0 }
 0x37a   : > { %v2531_v11 = vadd.f32 %v2530_v21, %v2424_v43  ;;  %v2426_v61 = vpop.f32.mrb[9].mxu0  ;;  %v2590_v21 = vpop.permute.xlu0 %2589 }
 0x37b   : > { %v2533_v19 = vadd.f32 %v2532_v49, %v2426_v61  ;;  %v2428_v9 = vpop.f32.mrb[10].mxu0 }
 0x37c   : > { %v2535_v12 = vadd.f32 %v2534_v63, %v2428_v9  ;;  %v2430_v13 = vpop.f32.mrb[11].mxu0  ;;  %v2605_v49 = vadd.f32 %v2580_v57, %v2531_v11 }
 0x37d   : > { %v2537_v31 = vadd.f32 %v2536_v52, %v2430_v13  ;;  %v2606_v62 = vadd.f32 %v2580_v57, %v2533_v19  ;;  %v2677_v57 = vpop.permute.xlu1 %2676 }
 0x37e   : > { %v2607_v6 = vadd.f32 %v2585_v10, %v2535_v12  ;;  %v2621_v13 = vmul.f32 0.01, %v2605_v49 }
 0x37f   : > { %v2608_v59 = vadd.f32 %v2585_v10, %v2537_v31  ;;  %v2672_v10 = vpop.permute.xlu0 %2671 }
 0x381   : > { %v2434_v36 = vpop.f32.mrb[12].mxu0  ;;  %v2624_v7 = vmul.f32 0.01, %v2608_v59 }
 0x382   : > { %v2541_v33 = vadd.f32 %v2540_v41, %v2434_v36  ;;  %v2436_v34 = vpop.f32.mrb[13].mxu0  ;;  %v2622_v41 = vmul.f32 0.01, %v2606_v62 }
 0x383   : > { %v2543_v54 = vadd.f32 %v2542_v26, %v2436_v34  ;;  %v2438_v56 = vpop.f32.mrb[14].mxu0  ;;  %v6564_v19 = vmax.f32 %v2608_v59, %v2624_v7 }
 0x384   : > { %v2545_v46 = vadd.f32 %v2544_v27, %v2438_v56  ;;  %v2440_v3 = vpop.f32.mrb[15].mxu0  ;;  %v2609_v31 = vadd.f32 %v2590_v21, %v2541_v33  ;;  %v6572_v36 = vmax.f32 %v2606_v62, %v2622_v41 }
 0x385   : > { %v2547_v30 = vadd.f32 %v2546_v20, %v2440_v3  ;;  %v2610_v26 = vadd.f32 %v2590_v21, %v2543_v54  ;;  %v2623_v20 = vmul.f32 0.01, %v2607_v6 }
 0x386   : > { %v2611_v43 = vadd.f32 %v2595_v40, %v2545_v46  ;;  %v2658_v33 = vpack.c.bf16 %v6564_v19, %v6572_v36 }
 0x387   : > { %v2612_v48 = vadd.f32 %v2595_v40, %v2547_v30  ;;  %v6576_v54 = vmax.f32 %v2607_v6, %v2623_v20  ;;  %v6584_v30 = vmax.f32 %v2605_v49, %v2621_v13  ;;  %v2687_v49 = vpop.permute.xlu1 %2686 }
 0x388   : > { %v2627_v56 = vmul.f32 0.01, %v2611_v43 }
 0x389   : > { %v2510_v4 = vpop.f32.mrb[0].mxu0  ;;  %v2628_v9 = vmul.f32 0.01, %v2612_v48 }
 0x38a   : > { %v2597_v39 = vadd.f32 %v2560_v15, %v2510_v4  ;;  %v2512_v45 = vpop.f32.mrb[1].mxu0 }
 0x38b   : > { %v2598_v29 = vadd.f32 %v2560_v15, %v2512_v45  ;;  %v2514_v32 = vpop.f32.mrb[2].mxu0  ;;  %v6580_v3 = vmax.f32 %v2612_v48, %v2628_v9 }
 0x38c   : > { %v2599_v50 = vadd.f32 %v2565_v5, %v2514_v32  ;;  %v2516_v18 = vpop.f32.mrb[3].mxu0  ;;  %v2613_v25 = vmul.f32 0.01, %v2597_v39 }
 0x38d   : > { %v2614_v51 = vmul.f32 0.01, %v2598_v29  ;;  %v2600_v53 = vadd.f32 %v2565_v5, %v2516_v18  ;;  %v2657_v5 = vpack.c.bf16 %v6576_v54, %v6584_v30  ;;  %v3939_v18 = vld [vmem:[%s6843_s6 + $0x8] sm:$0xff]  }
 0x38e   : > { %v2615_v1 = vmul.f32 0.01, %v2599_v50  ;;  %v6556_v42 = vmax.f32 %v2597_v39, %v2613_v25  ;;  %v6590_v39 = vmax.f32 %v2611_v43, %v2627_v56 }
 0x38f   : > { %v2616_v60 = vmul.f32 0.01, %v2600_v53  ;;  %v6552_v35 = vmax.f32 %v2598_v29, %v2614_v51  ;;  %v3940_v51 = vld [vmem:[%s6843_s6 + $0x10] sm:$0xff]  }
 0x390   : > { %v6550_v37 = vmax.f32 %v2599_v50, %v2615_v1  ;;  %v3938_v50 = vld [vmem:[%s6843_s6] sm:$0xff]  }
 0x391   : > { %v6554_v16 = vmax.f32 %v2600_v53, %v2616_v60  ;;  %v2520_v47 = vpop.f32.mrb[4].mxu0  ;;  %v3941_v53 = vld [vmem:[%s6843_s6 + $0x18] sm:$0xff]  }
 0x392   : > { %v2601_v28 = vadd.f32 %v2570_v2, %v2520_v47  ;;  %v2522_v14 = vpop.f32.mrb[5].mxu0  ;;  %v2653_v44 = vpack.c.bf16 %v6550_v37, %v6556_v42 }
 0x393   : > { %v2602_v22 = vadd.f32 %v2570_v2, %v2522_v14  ;;  %v2524_v24 = vpop.f32.mrb[6].mxu0  ;;  %v2654_v0 = vpack.c.bf16 %v6554_v16, %v6552_v35  ;;  %v2626_v2 = vmul.f32 0.01, %v2610_v26 }
 0x394   : > { %v2603_v23 = vadd.f32 %v2575_v55, %v2524_v24  ;;  %v2526_v17 = vpop.f32.mrb[7].mxu0  ;;  %v2617_v63 = vmul.f32 0.01, %v2601_v28 }
 0x395   : > { %v2618_v58 = vmul.f32 0.01, %v2602_v22  ;;  %v2604_v38 = vadd.f32 %v2575_v55, %v2526_v17  ;;  %2742 = vmatprep.subr.bf16.mxu1 %v2654_v0  ;;  %v2625_v55 = vmul.f32 0.01, %v2609_v31  ;;  %v6586_v4 = vmax.f32 %v2610_v26, %v2626_v2 }
 0x396   : > { %v2619_v52 = vmul.f32 0.01, %v2603_v23  ;;  %2743 = vmatpush1.bf16.msra.mxu1 %v2653_v44  ;;  %v6570_v11 = vmax.f32 %v2601_v28, %v2617_v63 }
 0x397   : > { %v2620_v27 = vmul.f32 0.01, %v2604_v38  ;;  %v6566_v15 = vmax.f32 %v2602_v22, %v2618_v58  ;;  %v2660_v45 = vpack.c.bf16 %v6580_v3, %v6586_v4  ;;  %v6594_v29 = vmax.f32 %v2609_v31, %v2625_v55 }
 0x398   : > { %v6562_v61 = vmax.f32 %v2603_v23, %v2619_v52  ;;  %v2682_v23 = vpop.permute.xlu0 %2681 }
 0x399   : > { %v6568_v12 = vmax.f32 %v2604_v38, %v2620_v27  ;;  %v2659_v32 = vpack.c.bf16 %v6590_v39, %v6594_v29 }
 0x39a   : > { %v2655_v46 = vpack.c.bf16 %v6562_v61, %v6570_v11 }
 0x39b   : > { %v2656_v34 = vpack.c.bf16 %v6568_v12, %v6566_v15 }
 0x39c   : > { %v2692_v56 = vpop.permute.xlu0 %2691 }
 0x39d   : > { %2744 = vmatprep.subr.bf16.mxu1 %v2656_v34 }
 0x39e   : > { %2745 = vmatpush1.bf16.msra.mxu1 %v2655_v46 }
 0x39f   : > { %2746 = vmatprep.subr.bf16.mxu1 %v2658_v33 }
 0x3a2   : > { %2747 = vmatpush1.bf16.msra.mxu1 %v2657_v5 }
 0x3a3   : > { %2748 = vmatprep.subr.bf16.mxu1 %v2660_v45 }
 0x3a6   : > { %2749 = vmatpush1.bf16.msra.mxu1 %v2659_v32 }
 0x3a9   : > { %3771 = vmatmul.mubr.msk.bf16.vlgmr.msra.gmra.mrb[8].mxu1 %vm2729_vm2, %v3938_v50  ;;  %v2697_v50 = vpop.permute.xlu1 %2696 }
 0x3aa   : > { %2784 = vmatprep.mubr.bf16.mxu1 %v7279_v8 }
 0x3b1   : > { %3772 = vmatmul.mubr.msk.bf16.gmra.mrb[12].mxu1 %vm2729_vm2, %v3939_v18 }
 0x3b2   : > { %2794 = vmatprep.mubr.bf16.mxu1 %v7279_v8 }
 0x3b9   : > { %3773 = vmatmul.mubr.msk.bf16.gmra.mrb[16].mxu1 %vm2729_vm2, %v3940_v51 }
 0x3ba   : > { %2804 = vmatprep.mubr.bf16.mxu1 %v7279_v8 }
 0x3c1   : > { %3774 = vmatmul.mubr.msk.bf16.gmra.mrb[20].mxu1 %vm2729_vm2, %v3941_v53 }
 0x3c2   : > { %2975 = vmatprep.mubr.bf16.mxu1 %v7279_v8 }
 0x47c   : > { %v2776_v25 = vpop.f32.mrb[8].mxu1 }
 0x47d   : > { %v2777_v1 = vadd.f32 %v2776_v25, %v2672_v10  ;;  %v2778_v60 = vpop.f32.mrb[9].mxu1 }
 0x47e   : > { %v2779_v59 = vadd.f32 %v2778_v60, %v2672_v10  ;;  %v2780_v47 = vpop.f32.mrb[10].mxu1 }
 0x47f   : > { %v2815_v28 = vmul.f32 0.01, %v2777_v1  ;;  %v2781_v14 = vadd.f32 %v2780_v47, %v2677_v57  ;;  %v2782_v62 = vpop.f32.mrb[11].mxu1 }
 0x480   : > { %v2816_v22 = vmul.f32 0.01, %v2779_v59  ;;  %v2783_v24 = vadd.f32 %v2782_v62, %v2677_v57  ;;  %v2702_v62 = vpop.permute.xlu0 %2701 }
 0x481   : > { %v2817_v0 = vmul.f32 0.01, %v2781_v14  ;;  %v2831_v6 = vmax.f32 %v2777_v1, %v2815_v28 }
 0x482   : > { %v2818_v40 = vmul.f32 0.01, %v2783_v24  ;;  %v2832_v17 = vmax.f32 %v2779_v59, %v2816_v22 }
 0x483   : > { %v2833_v44 = vmax.f32 %v2781_v14, %v2817_v0 }
 0x484   : > { %v2834_v7 = vmax.f32 %v2783_v24, %v2818_v40  ;;  %v2786_v48 = vpop.f32.mrb[12].mxu1 }
 0x485   : > { %v2855_v58 = vpack.c.bf16 %v2833_v44, %v2831_v6  ;;  %v2787_v38 = vadd.f32 %v2786_v48, %v2682_v23  ;;  %v2788_v21 = vpop.f32.mrb[13].mxu1 }
 0x486   : > { %v2789_v63 = vadd.f32 %v2788_v21, %v2682_v23  ;;  %v2790_v52 = vpop.f32.mrb[14].mxu1  ;;  %v2856_v41 = vpack.c.bf16 %v2834_v7, %v2832_v17  ;;  %v2707_v23 = vpop.permute.xlu1 %2706 }
 0x487   : > { %v2819_v26 = vmul.f32 0.01, %v2787_v38  ;;  %v2791_v27 = vadd.f32 %v2790_v52, %v2687_v49  ;;  %v2792_v20 = vpop.f32.mrb[15].mxu1 }
 0x488   : > { %v2820_v43 = vmul.f32 0.01, %v2789_v63  ;;  %v2793_v9 = vadd.f32 %v2792_v20, %v2687_v49  ;;  %2943 = vmatprep.subr.bf16.mxu1 %v2856_v41 }
 0x489   : > { %v2821_v13 = vmul.f32 0.01, %v2791_v27  ;;  %2944 = vmatpush1.bf16.msra.mxu1 %v2855_v58  ;;  %v2835_v2 = vmax.f32 %v2787_v38, %v2819_v26 }
 0x48a   : > { %v2822_v31 = vmul.f32 0.01, %v2793_v9  ;;  %v2836_v46 = vmax.f32 %v2789_v63, %v2820_v43 }
 0x48b   : > { %v2837_v34 = vmax.f32 %v2791_v27, %v2821_v13 }
 0x48c   : > { %v2838_v33 = vmax.f32 %v2793_v9, %v2822_v31  ;;  %v2796_v55 = vpop.f32.mrb[16].mxu1  ;;  %v3942_v31 = vld [vmem:[%s6845_s8] sm:$0xff]  }
 0x48d   : > { %v2857_v5 = vpack.c.bf16 %v2837_v34, %v2835_v2  ;;  %v2797_v45 = vadd.f32 %v2796_v55, %v2692_v56  ;;  %v2798_v32 = vpop.f32.mrb[17].mxu1  ;;  %v3943_v2 = vld [vmem:[%s6845_s8 + $0x8] sm:$0xff]   ;;  %v3944_v34 = vld [vmem:[%s6845_s8 + $0x10] sm:$0xff]  }
 0x48e   : > { %v2799_v18 = vadd.f32 %v2798_v32, %v2692_v56  ;;  %v2800_v51 = vpop.f32.mrb[18].mxu1  ;;  %v2858_v53 = vpack.c.bf16 %v2838_v33, %v2836_v46  ;;  %v3945_v56 = vld [vmem:[%s6845_s8 + $0x18] sm:$0xff]   ;;  %v2874_v46 = vpop.permute.xlu0 %2873 }
 0x48f   : > { %v2823_v10 = vmul.f32 0.01, %v2797_v45  ;;  %v2801_v25 = vadd.f32 %v2800_v51, %v2697_v50  ;;  %v2802_v1 = vpop.f32.mrb[19].mxu1 }
 0x490   : > { %v2824_v60 = vmul.f32 0.01, %v2799_v18  ;;  %v2803_v57 = vadd.f32 %v2802_v1, %v2697_v50  ;;  %2945 = vmatprep.subr.bf16.mxu1 %v2858_v53 }
 0x491   : > { %v2825_v59 = vmul.f32 0.01, %v2801_v25  ;;  %2946 = vmatpush1.bf16.msra.mxu1 %v2857_v5  ;;  %v2839_v28 = vmax.f32 %v2797_v45, %v2823_v10  ;;  %v2879_v45 = vpop.permute.xlu1 %2878 }
 0x492   : > { %v2826_v47 = vmul.f32 0.01, %v2803_v57  ;;  %v2840_v22 = vmax.f32 %v2799_v18, %v2824_v60 }
 0x493   : > { %v2841_v14 = vmax.f32 %v2801_v25, %v2825_v59 }
 0x494   : > { %v2842_v24 = vmax.f32 %v2803_v57, %v2826_v47  ;;  %v2806_v0 = vpop.f32.mrb[20].mxu1 }
 0x495   : > { %v2859_v40 = vpack.c.bf16 %v2841_v14, %v2839_v28  ;;  %v2807_v6 = vadd.f32 %v2806_v0, %v2702_v62  ;;  %v2808_v44 = vpop.f32.mrb[21].mxu1  ;;  %v2884_v28 = vpop.permute.xlu0 %2883 }
 0x496   : > { %v2809_v17 = vadd.f32 %v2808_v44, %v2702_v62  ;;  %v2810_v7 = vpop.f32.mrb[22].mxu1  ;;  %v2860_v48 = vpack.c.bf16 %v2842_v24, %v2840_v22 }
 0x497   : > { %v2827_v58 = vmul.f32 0.01, %v2807_v6  ;;  %v2811_v38 = vadd.f32 %v2810_v7, %v2707_v23  ;;  %v2812_v21 = vpop.f32.mrb[23].mxu1 }
 0x498   : > { %v2828_v49 = vmul.f32 0.01, %v2809_v17  ;;  %v2813_v63 = vadd.f32 %v2812_v21, %v2707_v23  ;;  %2947 = vmatprep.subr.bf16.mxu1 %v2860_v48 }
 0x499   : > { %v2829_v52 = vmul.f32 0.01, %v2811_v38  ;;  %2948 = vmatpush1.bf16.msra.mxu1 %v2859_v40  ;;  %v2843_v26 = vmax.f32 %v2807_v6, %v2827_v58 }
 0x49a   : > { %v2830_v41 = vmul.f32 0.01, %v2813_v63  ;;  %v2844_v20 = vmax.f32 %v2809_v17, %v2828_v49 }
 0x49b   : > { %v2845_v27 = vmax.f32 %v2811_v38, %v2829_v52 }
 0x49c   : > { %v2846_v43 = vmax.f32 %v2813_v63, %v2830_v41 }
 0x49d   : > { %v2861_v9 = vpack.c.bf16 %v2845_v27, %v2843_v26 }
 0x49e   : > { %v2862_v13 = vpack.c.bf16 %v2846_v43, %v2844_v20 }
 0x4a0   : > { %2949 = vmatprep.subr.bf16.mxu1 %v2862_v13 }
 0x4a1   : > { %2950 = vmatpush1.bf16.msra.mxu1 %v2861_v9 }
 0x4a4   : > { %3779 = vmatmul.mubr.msk.bf16.vlgmr.msra.gmra.mrb[24].mxu1 %vm2729_vm2, %v3942_v31 }
 0x4a5   : > { %2985 = vmatprep.mubr.bf16.mxu1 %v7279_v8 }
 0x4ac   : > { %3780 = vmatmul.mubr.msk.bf16.gmra.mrb[28].mxu1 %vm2729_vm2, %v3943_v2 }
 0x4ad   : > { %2995 = vmatprep.mubr.bf16.mxu1 %v7279_v8 }
 0x4b4   : > { %3781 = vmatmul.mubr.msk.bf16.gmra.mrb[32].mxu1 %vm2729_vm2, %v3944_v34 }
 0x4b5   : > { %3005 = vmatprep.mubr.bf16.mxu1 %v7279_v8 }
 0x4bc   : > { %3782 = vmatmul.mubr.msk.bf16.gmra.mrb[36].mxu1 %vm2729_vm2, %v3945_v56 }
 0x4bd   : > { %3192 = vmatprep.mubr.bf16.mxu1 %v7279_v8 }
 0x577   : > { %v2977_v33 = vpop.f32.mrb[24].mxu1 }
 0x578   : > { %v2978_v55 = vadd.f32 %v2977_v33, %v2874_v46  ;;  %v2979_v5 = vpop.f32.mrb[25].mxu1 }
 0x579   : > { %v2980_v32 = vadd.f32 %v2979_v5, %v2874_v46  ;;  %v2981_v50 = vpop.f32.mrb[26].mxu1 }
 0x57a   : > { %v3016_v18 = vadd.f32 %v2978_v55, %v6556_v42  ;;  %v2982_v51 = vadd.f32 %v2981_v50, %v2879_v45  ;;  %v2983_v53 = vpop.f32.mrb[27].mxu1  ;;  %v2889_v42 = vpop.permute.xlu1 %2888 }
 0x57b   : > { %v3017_v10 = vadd.f32 %v2980_v32, %v6552_v35  ;;  %v2984_v25 = vadd.f32 %v2983_v53, %v2879_v45 }
 0x57c   : > { %v3018_v1 = vadd.f32 %v2982_v51, %v6550_v37  ;;  %v3032_v59 = vmul.f32 0.01, %v3016_v18 }
 0x57d   : > { %v3033_v60 = vmul.f32 0.01, %v3017_v10  ;;  %v3019_v57 = vadd.f32 %v2984_v25, %v6554_v16 }
 0x57e   : > { %v3034_v47 = vmul.f32 0.01, %v3018_v1  ;;  %v6648_v37 = vmax.f32 %v3016_v18, %v3032_v59  ;;  %v2899_v9 = vpop.permute.xlu1 %2898 }
 0x57f   : > { %v3035_v14 = vmul.f32 0.01, %v3019_v57  ;;  %v2987_v62 = vpop.f32.mrb[28].mxu1  ;;  %v6644_v40 = vmax.f32 %v3017_v10, %v3033_v60 }
 0x580   : > { %v6642_v22 = vmax.f32 %v3018_v1, %v3034_v47  ;;  %v2988_v24 = vadd.f32 %v2987_v62, %v2884_v28  ;;  %v2989_v0 = vpop.f32.mrb[29].mxu1 }
 0x581   : > { %v6646_v6 = vmax.f32 %v3019_v57, %v3035_v14  ;;  %v2990_v35 = vadd.f32 %v2989_v0, %v2884_v28  ;;  %v2991_v44 = vpop.f32.mrb[30].mxu1 }
 0x582   : > { %v3020_v16 = vadd.f32 %v2988_v24, %v6570_v11  ;;  %v2992_v23 = vadd.f32 %v2991_v44, %v2889_v42  ;;  %v2993_v17 = vpop.f32.mrb[31].mxu1  ;;  %v3072_v38 = vpack.c.bf16 %v6642_v22, %v6648_v37  ;;  %v2894_v11 = vpop.permute.xlu0 %2893 }
 0x583   : > { %v3021_v7 = vadd.f32 %v2990_v35, %v6566_v15  ;;  %v2994_v48 = vadd.f32 %v2993_v17, %v2889_v42  ;;  %v3073_v58 = vpack.c.bf16 %v6646_v6, %v6644_v40  ;;  %v2909_v57 = vpop.permute.xlu1 %2908 }
 0x584   : > { %v3022_v21 = vadd.f32 %v2992_v23, %v6562_v61  ;;  %v3036_v52 = vmul.f32 0.01, %v3020_v16 }
 0x585   : > { %v3037_v49 = vmul.f32 0.01, %v3021_v7  ;;  %v3023_v63 = vadd.f32 %v2994_v48, %v6568_v12  ;;  %3160 = vmatprep.subr.bf16.mxu1 %v3073_v58 }
 0x586   : > { %v3038_v41 = vmul.f32 0.01, %v3022_v21  ;;  %3161 = vmatpush1.bf16.msra.mxu1 %v3072_v38  ;;  %v6664_v34 = vmax.f32 %v3020_v16, %v3036_v52  ;;  %v3948_v52 = vld [vmem:[%s7323_s25 + $0x10] sm:$0xff]  }
 0x587   : > { %v3039_v26 = vmul.f32 0.01, %v3023_v63  ;;  %v2997_v27 = vpop.f32.mrb[32].mxu1  ;;  %v6660_v13 = vmax.f32 %v3021_v7, %v3037_v49 }
 0x588   : > { %v6658_v15 = vmax.f32 %v3022_v21, %v3038_v41  ;;  %v2998_v20 = vadd.f32 %v2997_v27, %v2894_v11  ;;  %v2999_v43 = vpop.f32.mrb[33].mxu1  ;;  %v3949_v41 = vld [vmem:[%s7323_s25 + $0x18] sm:$0xff]  }
 0x589   : > { %v6662_v31 = vmax.f32 %v3023_v63, %v3039_v26  ;;  %v3000_v61 = vadd.f32 %v2999_v43, %v2894_v11  ;;  %v3001_v2 = vpop.f32.mrb[34].mxu1  ;;  %v3947_v63 = vld [vmem:[%s7323_s25 + $0x8] sm:$0xff]   ;;  %v3096_v43 = vpop.permute.xlu1 %3095 }
 0x58a   : > { %v3024_v12 = vadd.f32 %v2998_v20, %v6584_v30  ;;  %v3002_v56 = vadd.f32 %v3001_v2, %v2899_v9  ;;  %v3003_v46 = vpop.f32.mrb[35].mxu1  ;;  %v3074_v45 = vpack.c.bf16 %v6658_v15, %v6664_v34  ;;  %v2904_v30 = vpop.permute.xlu0 %2903 }
 0x58b   : > { %v3025_v33 = vadd.f32 %v3000_v61, %v6572_v36  ;;  %v3004_v55 = vadd.f32 %v3003_v46, %v2899_v9  ;;  %v3075_v5 = vpack.c.bf16 %v6662_v31, %v6660_v13 }
 0x58c   : > { %v3026_v32 = vadd.f32 %v3002_v56, %v6576_v54  ;;  %v3040_v51 = vmul.f32 0.01, %v3024_v12 }
 0x58d   : > { %v3041_v50 = vmul.f32 0.01, %v3025_v33  ;;  %v3027_v18 = vadd.f32 %v3004_v55, %v6564_v19  ;;  %3162 = vmatprep.subr.bf16.mxu1 %v3075_v5 }
 0x58e   : > { %v3042_v53 = vmul.f32 0.01, %v3026_v32  ;;  %3163 = vmatpush1.bf16.msra.mxu1 %v3074_v45  ;;  %v6680_v14 = vmax.f32 %v3024_v12, %v3040_v51  ;;  %v3091_v11 = vpop.permute.xlu0 %3090 }
 0x58f   : > { %v3043_v10 = vmul.f32 0.01, %v3027_v18  ;;  %v3007_v25 = vpop.f32.mrb[36].mxu1  ;;  %v6676_v59 = vmax.f32 %v3025_v33, %v3041_v50 }
 0x590   : > { %v6674_v36 = vmax.f32 %v3026_v32, %v3042_v53  ;;  %v3008_v1 = vadd.f32 %v3007_v25, %v2904_v30  ;;  %v3009_v60 = vpop.f32.mrb[37].mxu1 }
 0x591   : > { %v6678_v47 = vmax.f32 %v3027_v18, %v3043_v10  ;;  %v3010_v54 = vadd.f32 %v3009_v60, %v2904_v30  ;;  %v3011_v28 = vpop.f32.mrb[38].mxu1 }
 0x592   : > { %v3028_v19 = vadd.f32 %v3008_v1, %v6594_v29  ;;  %v3012_v62 = vadd.f32 %v3011_v28, %v2909_v57  ;;  %v3013_v24 = vpop.f32.mrb[39].mxu1  ;;  %v3076_v44 = vpack.c.bf16 %v6674_v36, %v6680_v14  ;;  %v3101_v50 = vpop.permute.xlu0 %3100 }
 0x593   : > { %v3029_v0 = vadd.f32 %v3010_v54, %v6586_v4  ;;  %v3014_v42 = vadd.f32 %v3013_v24, %v2909_v57  ;;  %v3077_v35 = vpack.c.bf16 %v6678_v47, %v6676_v59  ;;  %v3106_v1 = vpop.permute.xlu1 %3105 }
 0x594   : > { %v3030_v16 = vadd.f32 %v3012_v62, %v6590_v39  ;;  %v3044_v7 = vmul.f32 0.01, %v3028_v19 }
 0x595   : > { %v3045_v23 = vmul.f32 0.01, %v3029_v0  ;;  %v3031_v17 = vadd.f32 %v3014_v42, %v6580_v3  ;;  %3164 = vmatprep.subr.bf16.mxu1 %v3077_v35  ;;  %v3946_v3 = vld [vmem:[%s7323_s25] sm:$0xff]  }
 0x596   : > { %v3046_v48 = vmul.f32 0.01, %v3030_v16  ;;  %3165 = vmatpush1.bf16.msra.mxu1 %v3076_v44  ;;  %v6696_v21 = vmax.f32 %v3028_v19, %v3044_v7 }
 0x597   : > { %v3047_v29 = vmul.f32 0.01, %v3031_v17  ;;  %v6692_v4 = vmax.f32 %v3029_v0, %v3045_v23  ;;  %v3111_v23 = vpop.permute.xlu0 %3110 }
 0x598   : > { %v6690_v58 = vmax.f32 %v3030_v16, %v3046_v48 }
 0x599   : > { %v6694_v38 = vmax.f32 %v3031_v17, %v3047_v29 }
 0x59a   : > { %v3078_v39 = vpack.c.bf16 %v6690_v58, %v6696_v21 }
 0x59b   : > { %v3079_v49 = vpack.c.bf16 %v6694_v38, %v6692_v4 }
 0x59d   : > { %3166 = vmatprep.subr.bf16.mxu1 %v3079_v49 }
 0x59e   : > { %3167 = vmatpush1.bf16.msra.mxu1 %v3078_v39 }
 0x5a1   : > { %3787 = vmatmul.mubr.msk.bf16.vlgmr.msra.gmra.mrb[40].mxu1 %vm2729_vm2, %v3946_v3  ;;  %v3116_v3 = vpop.permute.xlu1 %3115 }
 0x5a2   : > { %3202 = vmatprep.mubr.bf16.mxu1 %v7279_v8 }
 0x5a9   : > { %3788 = vmatmul.mubr.msk.bf16.gmra.mrb[44].mxu1 %vm2729_vm2, %v3947_v63 }
 0x5aa   : > { %3212 = vmatprep.mubr.bf16.mxu1 %v7279_v8 }
 0x5b1   : > { %3789 = vmatmul.mubr.msk.bf16.gmra.mrb[48].mxu1 %vm2729_vm2, %v3948_v52 }
 0x5b2   : > { %3222 = vmatprep.mubr.bf16.mxu1 %v7279_v8 }
 0x5b9   : > { %3790 = vmatmul.mubr.msk.bf16.gmra.mrb[52].mxu1 %vm2729_vm2, %v3949_v41 }
 0x674   : > { %v3194_v26 = vpop.f32.mrb[40].mxu1 }
 0x675   : > { %v3195_v27 = vadd.f32 %v3194_v26, %v3091_v11  ;;  %v3196_v20 = vpop.f32.mrb[41].mxu1 }
 0x676   : > { %v3197_v9 = vadd.f32 %v3196_v20, %v3091_v11  ;;  %v3198_v61 = vpop.f32.mrb[42].mxu1 }
 0x677   : > { %v3233_v2 = vmul.f32 0.01, %v3195_v27  ;;  %v3199_v12 = vadd.f32 %v3198_v61, %v3096_v43  ;;  %v3200_v56 = vpop.f32.mrb[43].mxu1 }
 0x678   : > { %v3234_v46 = vmul.f32 0.01, %v3197_v9  ;;  %v3201_v33 = vadd.f32 %v3200_v56, %v3096_v43  ;;  %v3121_v56 = vpop.permute.xlu0 %3120 }
 0x679   : > { %v3235_v55 = vmul.f32 0.01, %v3199_v12  ;;  %v3249_v45 = vmax.f32 %v3195_v27, %v3233_v2 }
 0x67a   : > { %v3236_v5 = vmul.f32 0.01, %v3201_v33  ;;  %v3250_v18 = vmax.f32 %v3197_v9, %v3234_v46 }
 0x67b   : > { %v3251_v32 = vmax.f32 %v3199_v12, %v3235_v55 }
 0x67c   : > { %v3252_v51 = vmax.f32 %v3201_v33, %v3236_v5  ;;  %v3204_v53 = vpop.f32.mrb[44].mxu1 }
 0x67d   : > { %v3273_v30 = vpack.c.bf16 %v3251_v32, %v3249_v45  ;;  %v3205_v10 = vadd.f32 %v3204_v53, %v3101_v50  ;;  %v3206_v25 = vpop.f32.mrb[45].mxu1 }
 0x67e   : > { %v3207_v60 = vadd.f32 %v3206_v25, %v3101_v50  ;;  %v3208_v57 = vpop.f32.mrb[46].mxu1  ;;  %v3274_v54 = vpack.c.bf16 %v3252_v51, %v3250_v18  ;;  %v3126_v50 = vpop.permute.xlu1 %3125 }
 0x67f   : > { %v3237_v28 = vmul.f32 0.01, %v3205_v10  ;;  %v3209_v19 = vadd.f32 %v3208_v57, %v3106_v1  ;;  %v3210_v62 = vpop.f32.mrb[47].mxu1 }
 0x680   : > { %v3238_v24 = vmul.f32 0.01, %v3207_v60  ;;  %v3211_v0 = vadd.f32 %v3210_v62, %v3106_v1  ;;  %3361 = vmatprep.subr.bf16.mxu0 %v3274_v54 }
 0x681   : > { %v3239_v42 = vmul.f32 0.01, %v3209_v19  ;;  %3362 = vmatpush1.bf16.msra.mxu0 %v3273_v30  ;;  %v3253_v44 = vmax.f32 %v3205_v10, %v3237_v28 }
 0x682   : > { %v3240_v35 = vmul.f32 0.01, %v3211_v0  ;;  %v3254_v17 = vmax.f32 %v3207_v60, %v3238_v24 }
 0x683   : > { %v3255_v16 = vmax.f32 %v3209_v19, %v3239_v42 }
 0x684   : > { %v3256_v7 = vmax.f32 %v3211_v0, %v3240_v35  ;;  %v3214_v48 = vpop.f32.mrb[48].mxu1  ;;  %v3950_v35 = vld [vmem:[%s7324_s22] sm:$0xff]  }
 0x685   : > { %v3275_v29 = vpack.c.bf16 %v3255_v16, %v3253_v44  ;;  %v3215_v49 = vadd.f32 %v3214_v48, %v3111_v23  ;;  %v3216_v39 = vpop.f32.mrb[49].mxu1  ;;  %v3951_v44 = vld [vmem:[%s7324_s22 + $0x8] sm:$0xff]   ;;  %v3952_v16 = vld [vmem:[%s7324_s22 + $0x10] sm:$0xff]  }
 0x686   : > { %v3217_v63 = vadd.f32 %v3216_v39, %v3111_v23  ;;  %v3218_v52 = vpop.f32.mrb[50].mxu1  ;;  %v3276_v41 = vpack.c.bf16 %v3256_v7, %v3254_v17  ;;  %v3953_v23 = vld [vmem:[%s7324_s22 + $0x18] sm:$0xff]   ;;  %v3292_v17 = vpop.permute.xlu0 %3291 }
 0x687   : > { %v3241_v11 = vmul.f32 0.01, %v3215_v49  ;;  %v3219_v26 = vadd.f32 %v3218_v52, %v3116_v3  ;;  %v3220_v27 = vpop.f32.mrb[51].mxu1 }
 0x688   : > { %v3242_v20 = vmul.f32 0.01, %v3217_v63  ;;  %v3221_v43 = vadd.f32 %v3220_v27, %v3116_v3  ;;  %3363 = vmatprep.subr.bf16.mxu0 %v3276_v41 }
 0x689   : > { %v3243_v9 = vmul.f32 0.01, %v3219_v26  ;;  %3364 = vmatpush1.bf16.msra.mxu0 %v3275_v29  ;;  %v3257_v2 = vmax.f32 %v3215_v49, %v3241_v11  ;;  %v3297_v49 = vpop.permute.xlu1 %3296 }
 0x68a   : > { %v3244_v61 = vmul.f32 0.01, %v3221_v43  ;;  %v3258_v46 = vmax.f32 %v3217_v63, %v3242_v20 }
 0x68b   : > { %v3259_v12 = vmax.f32 %v3219_v26, %v3243_v9 }
 0x68c   : > { %v3260_v33 = vmax.f32 %v3221_v43, %v3244_v61  ;;  %v3224_v55 = vpop.f32.mrb[52].mxu1 }
 0x68d   : > { %v3277_v5 = vpack.c.bf16 %v3259_v12, %v3257_v2  ;;  %v3225_v45 = vadd.f32 %v3224_v55, %v3121_v56  ;;  %v3226_v32 = vpop.f32.mrb[53].mxu1  ;;  %v3302_v2 = vpop.permute.xlu0 %3301 }
 0x68e   : > { %v3227_v18 = vadd.f32 %v3226_v32, %v3121_v56  ;;  %v3228_v51 = vpop.f32.mrb[54].mxu1  ;;  %v3278_v53 = vpack.c.bf16 %v3260_v33, %v3258_v46 }
 0x68f   : > { %v3245_v30 = vmul.f32 0.01, %v3225_v45  ;;  %v3229_v10 = vadd.f32 %v3228_v51, %v3126_v50  ;;  %v3230_v25 = vpop.f32.mrb[55].mxu1 }
 0x690   : > { %v3246_v1 = vmul.f32 0.01, %v3227_v18  ;;  %v3231_v60 = vadd.f32 %v3230_v25, %v3126_v50  ;;  %3365 = vmatprep.subr.bf16.mxu0 %v3278_v53 }
 0x691   : > { %v3247_v57 = vmul.f32 0.01, %v3229_v10  ;;  %3366 = vmatpush1.bf16.msra.mxu0 %v3277_v5  ;;  %v3261_v28 = vmax.f32 %v3225_v45, %v3245_v30 }
 0x692   : > { %v3248_v54 = vmul.f32 0.01, %v3231_v60  ;;  %v3262_v62 = vmax.f32 %v3227_v18, %v3246_v1 }
 0x693   : > { %v3263_v19 = vmax.f32 %v3229_v10, %v3247_v57  ;;  %v3312_v57 = vpop.permute.xlu0 %3311 }
 0x694   : > { %v3264_v24 = vmax.f32 %v3231_v60, %v3248_v54 }
 0x695   : > { %v3279_v0 = vpack.c.bf16 %v3263_v19, %v3261_v28 }
 0x696   : > { %v3280_v42 = vpack.c.bf16 %v3264_v24, %v3262_v62 }
 0x698   : > { %3367 = vmatprep.subr.bf16.mxu0 %v3280_v42 }
 0x699   : > { %3368 = vmatpush1.bf16.msra.mxu0 %v3279_v0 }
 0x69c   : > { %3795 = vmatmul.mubr.msk.bf16.vlgmr.msra.gmra.mrb[16].mxu0 %vm2729_vm2, %v3950_v35 }
 0x69d   : > { %3403 = vmatprep.mubr.bf16.mxu0 %v7279_v8 }
 0x6a4   : > { %3796 = vmatmul.mubr.msk.bf16.gmra.mrb[20].mxu0 %vm2729_vm2, %v3951_v44 }
 0x6a5   : > { %3413 = vmatprep.mubr.bf16.mxu0 %v7279_v8 }
 0x6ac   : > { %3797 = vmatmul.mubr.msk.bf16.gmra.mrb[24].mxu0 %vm2729_vm2, %v3952_v16 }
 0x6ad   : > { %3423 = vmatprep.mubr.bf16.mxu0 %v7279_v8 }
 0x6b4   : > { %3798 = vmatmul.mubr.msk.bf16.gmra.mrb[28].mxu0 %vm2729_vm2, %v3953_v23 }
 0x76f   : > { %v3395_v7 = vpop.f32.mrb[16].mxu0 }
 0x770   : > { %v3396_v48 = vadd.f32 %v3395_v7, %v3292_v17  ;;  %v3397_v29 = vpop.f32.mrb[17].mxu0 }
 0x771   : > { %v3398_v39 = vadd.f32 %v3397_v29, %v3292_v17  ;;  %v3399_v3 = vpop.f32.mrb[18].mxu0 }
 0x772   : > { %v3434_v63 = vadd.f32 %v3396_v48, %v6648_v37  ;;  %v3400_v52 = vadd.f32 %v3399_v3, %v3297_v49  ;;  %v3401_v41 = vpop.f32.mrb[19].mxu0 }
 0x773   : > { %v3435_v8 = vadd.f32 %v3398_v39, %v6644_v40  ;;  %v3402_v11 = vadd.f32 %v3401_v41, %v3297_v49 }
 0x774   : > { %v3450_v26 = vmul.f32 0.01, %v3434_v63  ;;  %v3436_v27 = vadd.f32 %v3400_v52, %v6642_v22  ;;  %v3307_v22 = vpop.permute.xlu1 %3306 }
 0x775   : > { %v3451_v20 = vmul.f32 0.01, %v3435_v8  ;;  %v3437_v43 = vadd.f32 %v3402_v11, %v6646_v6 }
 0x776   : > { %v3466_v9 = vmax.f32 %v3434_v63, %v3450_v26  ;;  %v3452_v61 = vmul.f32 0.01, %v3436_v27 }
 0x777   : > { %v3467_v12 = vmax.f32 %v3435_v8, %v3451_v20  ;;  %v3453_v56 = vmul.f32 0.01, %v3437_v43  ;;  %v3405_v46 = vpop.f32.mrb[20].mxu0 }
 0x778   : > { %3482 = vst [vmem:[%s6745_s21] sm:$0xff] %v3466_v9  ;;  %v3468_v40 = vmax.f32 %v3436_v27, %v3452_v61  ;;  %v3406_v37 = vadd.f32 %v3405_v46, %v3302_v2  ;;  %v3407_v33 = vpop.f32.mrb[21].mxu0  ;;  %v3317_v24 = vpop.permute.xlu1 %3316 }
 0x779   : > { %3483 = vst [vmem:[%s6745_s21 + $0x8] sm:$0xff] %v3467_v12  ;;  %v3469_v55 = vmax.f32 %v3437_v43, %v3453_v56  ;;  %v3408_v6 = vadd.f32 %v3407_v33, %v3302_v2  ;;  %v3409_v5 = vpop.f32.mrb[22].mxu0 }
 0x77a   : > { %3484 = vst [vmem:[%s6745_s21 + $0x10] sm:$0xff] %v3468_v40  ;;  %v3438_v45 = vadd.f32 %v3406_v37, %v6664_v34  ;;  %v3410_v32 = vadd.f32 %v3409_v5, %v3307_v22  ;;  %v3411_v50 = vpop.f32.mrb[23].mxu0 }
 0x77b   : > { %3485 = vst [vmem:[%s6745_s21 + $0x18] sm:$0xff] %v3469_v55  ;;  %v3439_v18 = vadd.f32 %v3408_v6, %v6660_v13  ;;  %v3412_v51 = vadd.f32 %v3411_v50, %v3307_v22 }
 0x77c   : > { %v3454_v53 = vmul.f32 0.01, %v3438_v45  ;;  %v3440_v30 = vadd.f32 %v3410_v32, %v6658_v15  ;;  %v3327_v11 = vpop.permute.xlu1 %3326 }
 0x77d   : > { %v3455_v10 = vmul.f32 0.01, %v3439_v18  ;;  %v3441_v25 = vadd.f32 %v3412_v51, %v6662_v31 }
 0x77e   : > { %v3470_v1 = vmax.f32 %v3438_v45, %v3454_v53  ;;  %v3456_v60 = vmul.f32 0.01, %v3440_v30 }
 0x77f   : > { %v3471_v54 = vmax.f32 %v3439_v18, %v3455_v10  ;;  %v3457_v34 = vmul.f32 0.01, %v3441_v25  ;;  %v3415_v28 = vpop.f32.mrb[24].mxu0 }
 0x780   : > { %3486 = vst [vmem:[%s6745_s21 + $0x20] sm:$0xff] %v3470_v1  ;;  %v3472_v19 = vmax.f32 %v3440_v30, %v3456_v60  ;;  %v3416_v62 = vadd.f32 %v3415_v28, %v3312_v57  ;;  %v3417_v13 = vpop.f32.mrb[25].mxu0 }
 0x781   : > { %3487 = vst [vmem:[%s6745_s21 + $0x28] sm:$0xff] %v3471_v54  ;;  %v3473_v0 = vmax.f32 %v3441_v25, %v3457_v34  ;;  %v3418_v15 = vadd.f32 %v3417_v13, %v3312_v57  ;;  %v3419_v42 = vpop.f32.mrb[26].mxu0 }
 0x782   : > { %3488 = vst [vmem:[%s6745_s21 + $0x30] sm:$0xff] %v3472_v19  ;;  %v3442_v31 = vadd.f32 %v3416_v62, %v6680_v14  ;;  %v3420_v35 = vadd.f32 %v3419_v42, %v3317_v24  ;;  %v3421_v44 = vpop.f32.mrb[27].mxu0  ;;  %v3322_v14 = vpop.permute.xlu0 %3321 }
 0x783   : > { %3489 = vst [vmem:[%s6745_s21 + $0x38] sm:$0xff] %v3473_v0  ;;  %v3443_v16 = vadd.f32 %v3418_v15, %v6676_v59  ;;  %v3422_v23 = vadd.f32 %v3421_v44, %v3317_v24 }
 0x784   : > { %v3458_v17 = vmul.f32 0.01, %v3442_v31  ;;  %v3444_v7 = vadd.f32 %v3420_v35, %v6674_v36 }
 0x785   : > { %v3459_v48 = vmul.f32 0.01, %v3443_v16  ;;  %v3445_v29 = vadd.f32 %v3422_v23, %v6678_v47 }
 0x786   : > { %v3474_v49 = vmax.f32 %v3442_v31, %v3458_v17  ;;  %v3460_v39 = vmul.f32 0.01, %v3444_v7 }
 0x787   : > { %v3475_v3 = vmax.f32 %v3443_v16, %v3459_v48  ;;  %v3461_v63 = vmul.f32 0.01, %v3445_v29  ;;  %v3425_v52 = vpop.f32.mrb[28].mxu0 }
 0x788   : > { %3490 = vst [vmem:[%s6745_s21 + $0x40] sm:$0xff] %v3474_v49  ;;  %v3476_v59 = vmax.f32 %v3444_v7, %v3460_v39  ;;  %v3426_v41 = vadd.f32 %v3425_v52, %v3322_v14  ;;  %v3427_v8 = vpop.f32.mrb[29].mxu0 }
 0x789   : > { %3491 = vst [vmem:[%s6745_s21 + $0x48] sm:$0xff] %v3475_v3  ;;  %v3477_v36 = vmax.f32 %v3445_v29, %v3461_v63  ;;  %v3428_v26 = vadd.f32 %v3427_v8, %v3322_v14  ;;  %v3429_v47 = vpop.f32.mrb[30].mxu0 }
 0x78a   : > { %3492 = vst [vmem:[%s6745_s21 + $0x50] sm:$0xff] %v3476_v59  ;;  %v3446_v27 = vadd.f32 %v3426_v41, %v6696_v21  ;;  %v3430_v20 = vadd.f32 %v3429_v47, %v3327_v11  ;;  %v3431_v43 = vpop.f32.mrb[31].mxu0 }
 0x78b   : > { %3493 = vst [vmem:[%s6745_s21 + $0x58] sm:$0xff] %v3477_v36  ;;  %v3447_v9 = vadd.f32 %v3428_v26, %v6692_v4  ;;  %v3432_v61 = vadd.f32 %v3431_v43, %v3327_v11 }
 0x78c   : > { %v3462_v2 = vmul.f32 0.01, %v3446_v27  ;;  %v3448_v12 = vadd.f32 %v3430_v20, %v6690_v58 }
 0x78d   : > { %v3463_v56 = vmul.f32 0.01, %v3447_v9  ;;  %v3449_v46 = vadd.f32 %v3432_v61, %v6694_v38 }
 0x78e   : > { %v3478_v21 = vmax.f32 %v3446_v27, %v3462_v2  ;;  %v3464_v40 = vmul.f32 0.01, %v3448_v12 }
 0x78f   : > { %v3479_v4 = vmax.f32 %v3447_v9, %v3463_v56  ;;  %v3465_v37 = vmul.f32 0.01, %v3449_v46 }
 0x790   : > { %3494 = vst [vmem:[%s6745_s21 + $0x60] sm:$0xff] %v3478_v21  ;;  %v3480_v33 = vmax.f32 %v3448_v12, %v3464_v40 }
 0x791   : > { %3495 = vst [vmem:[%s6745_s21 + $0x68] sm:$0xff] %v3479_v4  ;;  %v3481_v58 = vmax.f32 %v3449_v46, %v3465_v37 }
 0x792   : > { %3496 = vst [vmem:[%s6745_s21 + $0x70] sm:$0xff] %v3480_v33 }
 0x793   : > { %3497 = vst [vmem:[%s6745_s21 + $0x78] sm:$0xff] %v3481_v58 }
 0x794   : > { %3983 = shalt.err (!%p3980_p11)
}
 0x795   : > { %s3984_s21 = scalar_lea.hbm %s6777_s28, 2048  ;;  %s3988_s17 = scalar_lea.hbm %s7326_s27, 8192 }
 0x796   : > { %p3985_p12 = scmp.ne.s32.totalorder %s6777_s28, %s3984_s21  ;;  %p3989_p1 = scmp.lt.u32.totalorder %s6777_s28, %s7326_s27 }
 0x797   : > { %p3990_p2 = scmp.lt.u32.totalorder %s3988_s17, %s3984_s21  ;;  %p3992_p4 = scmp.lt.u32.totalorder %s3984_s21, %s6777_s28 }
 0x798   : > { %p3986_p13 = pnand %p3985_p12, %p4209_p8 }
 0x799   : > { %p3991_p3 = por %p3990_p2, %p3989_p1 }
 0x79a   : > { %p3987_p0 = pneg %p3986_p13 }
 0x79b   : > { %p3993_p5 = por %p3992_p4, %p3991_p3 }
 0x79d   : > { %p3994_p6 = pnand %p3993_p5, %p3987_p0 }
 0x79f   : > { %3997 = shalt.err (!%p3994_p6)
}
 0x7a0   : > { %s4071_s16 = smov 256   ;;  %s4072_s26 = smov 512  }
 0x7a1   : > { %s4073_s2 = smov 16   ;;  %s7327_s0 = scalar_lea.sflag [#allocation4], %s5762_s24 }
 0x7a2   : > { %3827 = dma.vmem_to_hbm [thread:$0]  (%p4209_p8), %s6780_s29, 2048, %s6777_s28, %s7327_s0, %s4071_s16, %s4072_s26, %s4073_s2  }
 0x7a3 PF: > { %s7328_s1 = sld [smem:[#allocation6_spill]]  ;;  %p3833_p7 = scmp.ge.s32.totalorder %s4064_s20, 2 }
 0x7a5   : > { %p3830_p10 = pnand %p3833_p7, %p4213_p9 }
 0x7a9   : > { %s3529_s17 = sand.u32 1, %s7328_s1  }
 0x7aa   : > { %s3530_s21 = scalar_lea.sflag [#allocation4], %s3529_s17 }
 0x7ab   : > { %4031 = dma.done.wait (!%p3830_p10), %s3530_s21, 2048  }
 0x7ac   : > { %4033 = vsyncadd (!%p3830_p10), %s3530_s21, 4294965248  ;;  %s27_s20 = sadd.s32 1, %s4064_s20   ;;  %s7330_s2 = sld [smem:[#allocation7_spill]] }
 0x7ad   : > { %p24_p11 = scmp.ge.s32.totalorder %s27_s20, 6   ;;  %s7331_s24 = sld [smem:[#allocation8_spill]] }
 0x7ae   : > { %s7332_s29 = smov %s4040_s30  ;;  %s7333_s30 = smov %s4044_s15 }
 0x7af   : > { %s7334_s15 = smov %s4221_s10  ;;  %s7335_s16 = smov %s4056_s18 }
 0x7b0   : > { %s7336_s17 = smov %s4060_s19  ;;  %26 = sbr.rel (!%p24_p11) target bundleno = 12 (0xc), region = 148 }
 0x7b2   : > { %s7337_s18 = smov %s7330_s2 }
 0x7b3   : > { %s7338_s19 = smov %s7331_s24 }
 0x7b7   :  { %3535 = vsyncpa [#allocation4], 1 }
 0x7b8   :  { %3537 = vsyncpa [#allocation4 + $0x1], 1 }

</bundles_post_ra>
